<compile_context>
chip_gen: v7x
topology: tpu7x:2x2x1
jax: 0.10.0
libtpu: 0.0.40
codegen_flags: <defaults>
</compile_context>

<pallas_src>
import jax
import jax.numpy as jnp
from jax.experimental import pallas as pl
from jax.experimental.pallas import tpu as pltpu

LN_EPS = 1e-5  # torch.nn.LayerNorm default eps


# ----------------------------------------------------------------------------- kernel
def _make_kernel(slice_widths, vec_meta):
    """slice_widths[bi] = width of block bi's slice of the fused first-layer output.
    vec_meta[name] = (row, width) into the packed f32 vector table."""
    n_blocks = len(slice_widths)
    offsets = []
    off = 0
    for w in slice_widths:
        offsets.append(off)
        off += w

    def kernel(x_ref, w1_ref, vec_ref, *rest):
        # rest = [w2_0, w3_0, w2_1, w3_1, ..., out_ref]
        out_ref = rest[-1]
        mats = rest[:-1]
        vecs = vec_ref[...]                      # (n_rows, max_w) f32, tiny

        def vrow(name):                          # static row slice -> (1, width)
            r, w = vec_meta[name]
            return vecs[r:r + 1, :w]

        x = x_ref[...]                           # (tb, d_in) bfloat16

        # One fused MXU matmul for every block's first mask-layer Linear.
        v_all = jnp.dot(x, w1_ref[...], preferred_element_type=jnp.float32)
        v_all = jnp.maximum(v_all + vrow("b1"), 0.0)      # bias + ReLU in f32
        v_all_bf = v_all.astype(jnp.bfloat16)             # single cast, reused by all blocks

        # Mask-layer second Linears depend only on x (not on h): hoist them off
        # the serial chain so the MXU stays busy while LN chains drain.
        v_masks = []
        for bi in range(n_blocks):
            w2 = mats[2 * bi][...]
            v = v_all_bf[:, offsets[bi]: offsets[bi] + slice_widths[bi]]  # static slice
            v_masks.append(
                jnp.dot(v, w2, preferred_element_type=jnp.float32) + vrow(f"b2_{bi}"))

        # Serial part: hidden_layer per block (Linear(no bias) -> LN -> ReLU, dropout p=0).
        h = x.astype(jnp.float32)                # v_out_0 = x_cat
        for bi in range(n_blocks):
            w3 = mats[2 * bi + 1][...]
            t = (v_masks[bi] * h).astype(jnp.bfloat16)
            z = jnp.dot(t, w3, preferred_element_type=jnp.float32)

            # Two-pass LayerNorm (biased variance, torch semantics), gamma fused.
            mu = jnp.mean(z, axis=-1, keepdims=True)
            zc = z - mu
            var = jnp.mean(zc * zc, axis=-1, keepdims=True)
            scale = vrow(f"gamma_{bi}") * jax.lax.rsqrt(var + LN_EPS)
            h = jnp.maximum(zc * scale + vrow(f"beta_{bi}"), 0.0)

        # Final fc with N=1: VPU multiply + XLU lane reduce (skip the MXU pass).
        out_ref[...] = (jnp.sum(h * vrow("wfc"), axis=-1, keepdims=True)
                        + vrow("bfc"))

    return kernel


# ----------------------------------------------------------------------------- packing
def _pack_params(block_params, fc_params):
    """Pack PyTorch-layout params (weights pre-transposed to (in, out)) for the kernel.

    Returns:
      w1_all  : (d_in, sum_hidden) bf16 fused first-layer weight
      mats    : [w2_0, w3_0, w2_1, w3_1, ...] bf16 matrices
      table   : (n_rows, max_w) f32 packed vector table
      meta    : name -> (row, width) for the table
      widths  : per-block first-layer output widths
    """
    w1_all = jnp.concatenate([bp[0] for bp in block_params], axis=1).astype(jnp.bfloat16)
    slice_widths = tuple(int(bp[0].shape[1]) for bp in block_params)

    rows, meta = [], {}

    def add_row(name, vec):
        v = jnp.reshape(vec, (-1,)).astype(jnp.float32)
        meta[name] = (len(rows), int(v.shape[0]))
        rows.append(v)

    add_row("b1", jnp.concatenate([bp[1].reshape(-1) for bp in block_params]))

    mats = []
    for bi, (w1, b1, w2, b2, w3, gamma, beta) in enumerate(block_params):
        mats += [w2.astype(jnp.bfloat16), w3.astype(jnp.bfloat16)]
        add_row(f"b2_{bi}", b2)
        add_row(f"gamma_{bi}", gamma)
        add_row(f"beta_{bi}", beta)

    wfc, bfc = fc_params
    add_row("wfc", wfc.reshape(-1))
    add_row("bfc", bfc.reshape(-1))

    max_w = max(r.shape[0] for r in rows)
    table = jnp.zeros((len(rows), max_w), jnp.float32)
    for i, r in enumerate(rows):
        table = table.at[i, : r.shape[0]].set(r)

    return w1_all, mats, table, meta, slice_widths


def _choose_tb(B, tb_cap, min_grid_steps):
    """Largest batch tile that divides B, is a multiple of 8 (or == B), is <= tb_cap,
    and leaves at least `min_grid_steps` grid steps. Single-TC chips (v5e/v6e) should
    use min_grid_steps=1 (one big tile); v7x callers may pass 2 to use both TCs."""
    cap = max(1, min(tb_cap, B // max(1, min_grid_steps)))
    for cand in range(min(cap, B), 0, -1):
        if B % cand != 0:
            continue
        if cand == B or cand % 8 == 0:
            return cand
    return B


# ----------------------------------------------------------------------------- wrapper
def serial_masknet(x, block_params, fc_params, tb_cap=1024, min_grid_steps=1):
    B, d_in = x.shape
    w1_all, mats, vec_table, vec_meta, slice_widths = _pack_params(block_params, fc_params)

    tb = _choose_tb(B, tb_cap, min_grid_steps)
    assert B % tb == 0 and (tb == B or tb % 8 == 0)

    x_q = x.astype(jnp.bfloat16)    # bf16 MXU operand; halves activation DMA bytes

    flat_inputs = [x_q, w1_all, vec_table, *mats]

    in_specs = [pl.BlockSpec((tb, d_in), lambda i: (i, 0))]
    # Weights / packed vector table are small and grid-constant: one full block each.
    for p in flat_inputs[1:]:
        in_specs.append(pl.BlockSpec(p.shape, lambda i: (0, 0)))

    out_specs = pl.BlockSpec((tb, 1), lambda i: (i, 0))
    # TODO(synk): lane-dense (1, tb) output layout would avoid masked vst.msk stores,
    # but the output is tiny so it is left as a column.

    # Advisory cost estimate so XLA can overlap this small kernel with neighbors.
    sum_hidden = sum(slice_widths)
    flops = 2 * B * d_in * sum_hidden
    for (_, _, w2, _, w3, _, _) in block_params:
        flops += 2 * B * (w2.shape[0] * w2.shape[1] + w3.shape[0] * w3.shape[1])
    d_last = block_params[-1][4].shape[1]
    flops += 2 * B * d_last
    transcendentals = B * len(block_params)            # one rsqrt per row per LN
    bytes_accessed = (x_q.size * 2 + w1_all.size * 2 + vec_table.size * 4
                      + sum(m.size * 2 for m in mats) + B * 4)

    # VMEM use is ~1-3 MiB even at tb=1024, well under every generation's scoped
    # default (and far under v7x's 64 MiB physical VMEM), so no vmem_limit_bytes.
    return pl.pallas_call(
        _make_kernel(slice_widths, vec_meta),
        out_shape=jax.ShapeDtypeStruct((B, 1), jnp.float32),
        grid_spec=pltpu.PrefetchScalarGridSpec(
            num_scalar_prefetch=0,
            grid=(B // tb,),
            in_specs=in_specs,
            out_specs=out_specs,
        ),
        compiler_params=pltpu.CompilerParams(
            dimension_semantics=("parallel",),
        ),
        cost_estimate=pl.CostEstimate(
            flops=int(flops),
            transcendentals=int(transcendentals),
            bytes_accessed=int(bytes_accessed),
        ),
    )(*flat_inputs)


# ----------------------------------------------------------------------------- params / reference
def init_params(key, input_dim, block_units, reduction_ratio=1):
    """Deterministic synthetic parameters matching SerialMaskNet.__init__ shapes.

    Weights are stored pre-transposed as (in, out); biases / LN params as (1, D).
    LN gamma/beta and biases get non-trivial values so the check is strict.
    """
    hidden_units = [input_dim] + list(block_units)
    block_params = []
    for idx in range(len(block_units)):
        hidden = hidden_units[idx]
        out = hidden_units[idx + 1]
        key, k1, k2, k3, k4, k5, k6, k7 = jax.random.split(key, 8)
        w1 = 0.05 * jax.random.normal(k1, (input_dim, hidden * reduction_ratio), jnp.float32)
        b1 = 0.01 * jax.random.normal(k2, (1, hidden * reduction_ratio), jnp.float32)
        w2 = 0.05 * jax.random.normal(k3, (hidden * reduction_ratio, hidden), jnp.float32)
        b2 = 0.01 * jax.random.normal(k4, (1, hidden), jnp.float32)
        w3 = 0.05 * jax.random.normal(k5, (hidden, out), jnp.float32)      # bias=False
        gamma = 1.0 + 0.05 * jax.random.normal(k6, (1, out), jnp.float32)  # LN weight
        beta = 0.02 * jax.random.normal(k7, (1, out), jnp.float32)         # LN bias
        block_params.append((w1, b1, w2, b2, w3, gamma, beta))
    key, kf, kb = jax.random.split(key, 3)
    wfc = 0.05 * jax.random.normal(kf, (hidden_units[-1], 1), jnp.float32)
    bfc = 0.01 * jax.random.normal(kb, (1, 1), jnp.float32)
    return block_params, (wfc, bfc)


def reference(x, block_params, fc_params):
    """Independent pure-JAX reference mirroring PyTorch SerialMaskNet.forward.

    MXU operands are quantized to bfloat16 exactly where the kernel does
    (accumulation, biases, LayerNorm stay in float32).
    """
    # TODO(synk): add a torch-derived golden output to validate fidelity to
    # nn.Linear/nn.LayerNorm beyond this JAX reference.
    q = lambda a: a.astype(jnp.bfloat16)
    xq = q(x)
    h = xq.astype(jnp.float32)                       # v_out = x_cat
    for (w1, b1, w2, b2, w3, gamma, beta) in block_params:
        v = jnp.dot(xq, q(w1), preferred_element_type=jnp.float32) + b1
        v = jnp.maximum(v, 0.0)
        v_mask = jnp.dot(q(v), q(w2), preferred_element_type=jnp.float32) + b2
        t = v_mask * h
        z = jnp.dot(q(t), q(w3), preferred_element_type=jnp.float32)
        mu = jnp.mean(z, axis=-1, keepdims=True)
        var = jnp.mean((z - mu) ** 2, axis=-1, keepdims=True)   # biased (torch LN)
        zn = (z - mu) / jnp.sqrt(var + LN_EPS)
        h = jnp.maximum(zn * gamma + beta, 0.0)
    wfc, bfc = fc_params
    return jnp.dot(h, wfc, preferred_element_type=jnp.float32) + bfc.reshape(1, 1)


# ----------------------------------------------------------------------------- demo
if __name__ == "__main__":
    key = jax.random.PRNGKey(0)
    k_x, k_p = jax.random.split(key)

    B = 256
    input_dim = 128
    block_units = [128, 128, 128]   # SerialMaskNet structure, 128-aligned hidden sizes

    x = jax.random.normal(k_x, (B, input_dim), jnp.float32)
    block_params, fc_params = init_params(k_p, input_dim, block_units, reduction_ratio=1)

    y = serial_masknet(x, block_params, fc_params)   # single-TC policy: one 256-row tile
    y = jax.block_until_ready(y)

    y_ref = reference(x, block_params, fc_params)
    assert y.shape == (B, 1), y.shape
    max_err = float(jnp.max(jnp.abs(y - y_ref)))
    assert jnp.allclose(y, y_ref, rtol=2e-3, atol=2e-3), max_err

    print("KERNEL_OK")
</pallas_src>

<mosaic_0001>
module attributes {stable_mosaic.version = 11 : i64} {
  func.func @kernel(%arg0: i32, %arg1: memref<256x128xbf16, #tpu.memory_space<vmem>>, %arg2: memref<128x384xbf16, #tpu.memory_space<vmem>>, %arg3: memref<12x384xf32, #tpu.memory_space<vmem>>, %arg4: memref<128x128xbf16, #tpu.memory_space<vmem>>, %arg5: memref<128x128xbf16, #tpu.memory_space<vmem>>, %arg6: memref<128x128xbf16, #tpu.memory_space<vmem>>, %arg7: memref<128x128xbf16, #tpu.memory_space<vmem>>, %arg8: memref<128x128xbf16, #tpu.memory_space<vmem>>, %arg9: memref<128x128xbf16, #tpu.memory_space<vmem>>, %arg10: memref<256x1xf32, #tpu.memory_space<vmem>>) attributes {dimension_semantics = [#tpu.dimension_semantics<parallel>], iteration_bounds = array<i64: 1>, scalar_prefetch = 0 : i64, scratch_operands = 0 : i64, tpu.core_type = #tpu.core_type<tc>, window_params = [{transform_indices = @transform_0, window_bounds = array<i64: 256, 128>}, {pipeline_mode = #tpu.pipeline_mode<synchronous>, transform_indices = @transform_1, window_bounds = array<i64: 128, 384>}, {pipeline_mode = #tpu.pipeline_mode<synchronous>, transform_indices = @transform_2, window_bounds = array<i64: 12, 384>}, {pipeline_mode = #tpu.pipeline_mode<synchronous>, transform_indices = @transform_3, window_bounds = array<i64: 128, 128>}, {pipeline_mode = #tpu.pipeline_mode<synchronous>, transform_indices = @transform_4, window_bounds = array<i64: 128, 128>}, {pipeline_mode = #tpu.pipeline_mode<synchronous>, transform_indices = @transform_5, window_bounds = array<i64: 128, 128>}, {pipeline_mode = #tpu.pipeline_mode<synchronous>, transform_indices = @transform_6, window_bounds = array<i64: 128, 128>}, {pipeline_mode = #tpu.pipeline_mode<synchronous>, transform_indices = @transform_7, window_bounds = array<i64: 128, 128>}, {pipeline_mode = #tpu.pipeline_mode<synchronous>, transform_indices = @transform_8, window_bounds = array<i64: 128, 128>}, {transform_indices = @transform_9, window_bounds = array<i64: 256, 1>}]} {
    %c0 = arith.constant 0 : index
    %c0_0 = arith.constant 0 : index
    %0 = vector.load %arg3[%c0, %c0_0] : memref<12x384xf32, #tpu.memory_space<vmem>>, vector<12x384xf32>
    %c0_1 = arith.constant 0 : index
    %c0_2 = arith.constant 0 : index
    %1 = vector.load %arg1[%c0_1, %c0_2] : memref<256x128xbf16, #tpu.memory_space<vmem>>, vector<256x128xbf16>
    %c0_3 = arith.constant 0 : index
    %c0_4 = arith.constant 0 : index
    %2 = vector.load %arg2[%c0_3, %c0_4] : memref<128x384xbf16, #tpu.memory_space<vmem>>, vector<128x384xbf16>
    %cst = arith.constant dense<0.000000e+00> : vector<256x384xf32>
    %3 = tpu.matmul %1, %2, %cst {dimension_numbers = #tpu.dot_dimension_numbers<[1], [0], [0], [1], [0, 0, 1, 1], [], []>} : vector<256x128xbf16>, vector<128x384xbf16>, vector<256x384xf32> -> vector<256x384xf32>
    %4 = vector.extract_strided_slice %0 {offsets = [0, 0], sizes = [1, 384], strides = [1, 1]} : vector<12x384xf32> to vector<1x384xf32>
    %5 = vector.broadcast %4 : vector<1x384xf32> to vector<256x384xf32>
    %6 = arith.addf %3, %5 : vector<256x384xf32>
    %cst_5 = arith.constant 0.000000e+00 : f32
    %7 = vector.broadcast %cst_5 : f32 to vector<256x384xf32>
    %8 = arith.maximumf %6, %7 : vector<256x384xf32>
    %9 = arith.truncf %8 : vector<256x384xf32> to vector<256x384xbf16>
    %c0_6 = arith.constant 0 : index
    %c0_7 = arith.constant 0 : index
    %10 = vector.load %arg4[%c0_6, %c0_7] : memref<128x128xbf16, #tpu.memory_space<vmem>>, vector<128x128xbf16>
    %11 = vector.extract_strided_slice %9 {offsets = [0, 0], sizes = [256, 128], strides = [1, 1]} : vector<256x384xbf16> to vector<256x128xbf16>
    %cst_8 = arith.constant dense<0.000000e+00> : vector<256x128xf32>
    %12 = tpu.matmul %11, %10, %cst_8 {dimension_numbers = #tpu.dot_dimension_numbers<[1], [0], [0], [1], [0, 0, 1, 1], [], []>} : vector<256x128xbf16>, vector<128x128xbf16>, vector<256x128xf32> -> vector<256x128xf32>
    %13 = vector.extract_strided_slice %0 {offsets = [1, 0], sizes = [1, 128], strides = [1, 1]} : vector<12x384xf32> to vector<1x128xf32>
    %14 = vector.broadcast %13 : vector<1x128xf32> to vector<256x128xf32>
    %15 = arith.addf %12, %14 : vector<256x128xf32>
    %c0_9 = arith.constant 0 : index
    %c0_10 = arith.constant 0 : index
    %16 = vector.load %arg6[%c0_9, %c0_10] : memref<128x128xbf16, #tpu.memory_space<vmem>>, vector<128x128xbf16>
    %17 = vector.extract_strided_slice %9 {offsets = [0, 128], sizes = [256, 128], strides = [1, 1]} : vector<256x384xbf16> to vector<256x128xbf16>
    %cst_11 = arith.constant dense<0.000000e+00> : vector<256x128xf32>
    %18 = tpu.matmul %17, %16, %cst_11 {dimension_numbers = #tpu.dot_dimension_numbers<[1], [0], [0], [1], [0, 0, 1, 1], [], []>} : vector<256x128xbf16>, vector<128x128xbf16>, vector<256x128xf32> -> vector<256x128xf32>
    %19 = vector.extract_strided_slice %0 {offsets = [4, 0], sizes = [1, 128], strides = [1, 1]} : vector<12x384xf32> to vector<1x128xf32>
    %20 = vector.broadcast %19 : vector<1x128xf32> to vector<256x128xf32>
    %21 = arith.addf %18, %20 : vector<256x128xf32>
    %c0_12 = arith.constant 0 : index
    %c0_13 = arith.constant 0 : index
    %22 = vector.load %arg8[%c0_12, %c0_13] : memref<128x128xbf16, #tpu.memory_space<vmem>>, vector<128x128xbf16>
    %23 = vector.extract_strided_slice %9 {offsets = [0, 256], sizes = [256, 128], strides = [1, 1]} : vector<256x384xbf16> to vector<256x128xbf16>
    %cst_14 = arith.constant dense<0.000000e+00> : vector<256x128xf32>
    %24 = tpu.matmul %23, %22, %cst_14 {dimension_numbers = #tpu.dot_dimension_numbers<[1], [0], [0], [1], [0, 0, 1, 1], [], []>} : vector<256x128xbf16>, vector<128x128xbf16>, vector<256x128xf32> -> vector<256x128xf32>
    %25 = vector.extract_strided_slice %0 {offsets = [7, 0], sizes = [1, 128], strides = [1, 1]} : vector<12x384xf32> to vector<1x128xf32>
    %26 = vector.broadcast %25 : vector<1x128xf32> to vector<256x128xf32>
    %27 = arith.addf %24, %26 : vector<256x128xf32>
    %28 = arith.extf %1 : vector<256x128xbf16> to vector<256x128xf32>
    %c0_15 = arith.constant 0 : index
    %c0_16 = arith.constant 0 : index
    %29 = vector.load %arg5[%c0_15, %c0_16] : memref<128x128xbf16, #tpu.memory_space<vmem>>, vector<128x128xbf16>
    %30 = arith.mulf %15, %28 : vector<256x128xf32>
    %31 = arith.truncf %30 : vector<256x128xf32> to vector<256x128xbf16>
    %cst_17 = arith.constant dense<0.000000e+00> : vector<256x128xf32>
    %32 = tpu.matmul %31, %29, %cst_17 {dimension_numbers = #tpu.dot_dimension_numbers<[1], [0], [0], [1], [0, 0, 1, 1], [], []>} : vector<256x128xbf16>, vector<128x128xbf16>, vector<256x128xf32> -> vector<256x128xf32>
    %cst_18 = arith.constant dense<0.000000e+00> : vector<256xf32>
    %33 = vector.multi_reduction <add>, %32, %cst_18 [1] : vector<256x128xf32> to vector<256xf32>
    %34 = vector.shape_cast %33 : vector<256xf32> to vector<256x1xf32>
    %cst_19 = arith.constant 1.280000e+02 : f32
    %35 = vector.broadcast %cst_19 : f32 to vector<256x1xf32>
    %36 = arith.divf %34, %35 : vector<256x1xf32>
    %37 = vector.broadcast %36 : vector<256x1xf32> to vector<256x128xf32>
    %38 = arith.subf %32, %37 : vector<256x128xf32>
    %39 = arith.mulf %38, %38 : vector<256x128xf32>
    %cst_20 = arith.constant dense<0.000000e+00> : vector<256xf32>
    %40 = vector.multi_reduction <add>, %39, %cst_20 [1] : vector<256x128xf32> to vector<256xf32>
    %41 = vector.shape_cast %40 : vector<256xf32> to vector<256x1xf32>
    %cst_21 = arith.constant 1.280000e+02 : f32
    %42 = vector.broadcast %cst_21 : f32 to vector<256x1xf32>
    %43 = arith.divf %41, %42 : vector<256x1xf32>
    %44 = vector.extract_strided_slice %0 {offsets = [2, 0], sizes = [1, 128], strides = [1, 1]} : vector<12x384xf32> to vector<1x128xf32>
    %cst_22 = arith.constant 9.99999974E-6 : f32
    %45 = vector.broadcast %cst_22 : f32 to vector<256x1xf32>
    %46 = arith.addf %43, %45 : vector<256x1xf32>
    %47 = math.rsqrt %46 : vector<256x1xf32>
    %48 = vector.broadcast %44 : vector<1x128xf32> to vector<256x128xf32>
    %49 = vector.broadcast %47 : vector<256x1xf32> to vector<256x128xf32>
    %50 = arith.mulf %48, %49 : vector<256x128xf32>
    %51 = arith.mulf %38, %50 : vector<256x128xf32>
    %52 = vector.extract_strided_slice %0 {offsets = [3, 0], sizes = [1, 128], strides = [1, 1]} : vector<12x384xf32> to vector<1x128xf32>
    %53 = vector.broadcast %52 : vector<1x128xf32> to vector<256x128xf32>
    %54 = arith.addf %51, %53 : vector<256x128xf32>
    %cst_23 = arith.constant 0.000000e+00 : f32
    %55 = vector.broadcast %cst_23 : f32 to vector<256x128xf32>
    %56 = arith.maximumf %54, %55 : vector<256x128xf32>
    %c0_24 = arith.constant 0 : index
    %c0_25 = arith.constant 0 : index
    %57 = vector.load %arg7[%c0_24, %c0_25] : memref<128x128xbf16, #tpu.memory_space<vmem>>, vector<128x128xbf16>
    %58 = arith.mulf %21, %56 : vector<256x128xf32>
    %59 = arith.truncf %58 : vector<256x128xf32> to vector<256x128xbf16>
    %cst_26 = arith.constant dense<0.000000e+00> : vector<256x128xf32>
    %60 = tpu.matmul %59, %57, %cst_26 {dimension_numbers = #tpu.dot_dimension_numbers<[1], [0], [0], [1], [0, 0, 1, 1], [], []>} : vector<256x128xbf16>, vector<128x128xbf16>, vector<256x128xf32> -> vector<256x128xf32>
    %cst_27 = arith.constant dense<0.000000e+00> : vector<256xf32>
    %61 = vector.multi_reduction <add>, %60, %cst_27 [1] : vector<256x128xf32> to vector<256xf32>
    %62 = vector.shape_cast %61 : vector<256xf32> to vector<256x1xf32>
    %cst_28 = arith.constant 1.280000e+02 : f32
    %63 = vector.broadcast %cst_28 : f32 to vector<256x1xf32>
    %64 = arith.divf %62, %63 : vector<256x1xf32>
    %65 = vector.broadcast %64 : vector<256x1xf32> to vector<256x128xf32>
    %66 = arith.subf %60, %65 : vector<256x128xf32>
    %67 = arith.mulf %66, %66 : vector<256x128xf32>
    %cst_29 = arith.constant dense<0.000000e+00> : vector<256xf32>
    %68 = vector.multi_reduction <add>, %67, %cst_29 [1] : vector<256x128xf32> to vector<256xf32>
    %69 = vector.shape_cast %68 : vector<256xf32> to vector<256x1xf32>
    %cst_30 = arith.constant 1.280000e+02 : f32
    %70 = vector.broadcast %cst_30 : f32 to vector<256x1xf32>
    %71 = arith.divf %69, %70 : vector<256x1xf32>
    %72 = vector.extract_strided_slice %0 {offsets = [5, 0], sizes = [1, 128], strides = [1, 1]} : vector<12x384xf32> to vector<1x128xf32>
    %cst_31 = arith.constant 9.99999974E-6 : f32
    %73 = vector.broadcast %cst_31 : f32 to vector<256x1xf32>
    %74 = arith.addf %71, %73 : vector<256x1xf32>
    %75 = math.rsqrt %74 : vector<256x1xf32>
    %76 = vector.broadcast %72 : vector<1x128xf32> to vector<256x128xf32>
    %77 = vector.broadcast %75 : vector<256x1xf32> to vector<256x128xf32>
    %78 = arith.mulf %76, %77 : vector<256x128xf32>
    %79 = arith.mulf %66, %78 : vector<256x128xf32>
    %80 = vector.extract_strided_slice %0 {offsets = [6, 0], sizes = [1, 128], strides = [1, 1]} : vector<12x384xf32> to vector<1x128xf32>
    %81 = vector.broadcast %80 : vector<1x128xf32> to vector<256x128xf32>
    %82 = arith.addf %79, %81 : vector<256x128xf32>
    %cst_32 = arith.constant 0.000000e+00 : f32
    %83 = vector.broadcast %cst_32 : f32 to vector<256x128xf32>
    %84 = arith.maximumf %82, %83 : vector<256x128xf32>
    %c0_33 = arith.constant 0 : index
    %c0_34 = arith.constant 0 : index
    %85 = vector.load %arg9[%c0_33, %c0_34] : memref<128x128xbf16, #tpu.memory_space<vmem>>, vector<128x128xbf16>
    %86 = arith.mulf %27, %84 : vector<256x128xf32>
    %87 = arith.truncf %86 : vector<256x128xf32> to vector<256x128xbf16>
    %cst_35 = arith.constant dense<0.000000e+00> : vector<256x128xf32>
    %88 = tpu.matmul %87, %85, %cst_35 {dimension_numbers = #tpu.dot_dimension_numbers<[1], [0], [0], [1], [0, 0, 1, 1], [], []>} : vector<256x128xbf16>, vector<128x128xbf16>, vector<256x128xf32> -> vector<256x128xf32>
    %cst_36 = arith.constant dense<0.000000e+00> : vector<256xf32>
    %89 = vector.multi_reduction <add>, %88, %cst_36 [1] : vector<256x128xf32> to vector<256xf32>
    %90 = vector.shape_cast %89 : vector<256xf32> to vector<256x1xf32>
    %cst_37 = arith.constant 1.280000e+02 : f32
    %91 = vector.broadcast %cst_37 : f32 to vector<256x1xf32>
    %92 = arith.divf %90, %91 : vector<256x1xf32>
    %93 = vector.broadcast %92 : vector<256x1xf32> to vector<256x128xf32>
    %94 = arith.subf %88, %93 : vector<256x128xf32>
    %95 = arith.mulf %94, %94 : vector<256x128xf32>
    %cst_38 = arith.constant dense<0.000000e+00> : vector<256xf32>
    %96 = vector.multi_reduction <add>, %95, %cst_38 [1] : vector<256x128xf32> to vector<256xf32>
    %97 = vector.shape_cast %96 : vector<256xf32> to vector<256x1xf32>
    %cst_39 = arith.constant 1.280000e+02 : f32
    %98 = vector.broadcast %cst_39 : f32 to vector<256x1xf32>
    %99 = arith.divf %97, %98 : vector<256x1xf32>
    %100 = vector.extract_strided_slice %0 {offsets = [8, 0], sizes = [1, 128], strides = [1, 1]} : vector<12x384xf32> to vector<1x128xf32>
    %cst_40 = arith.constant 9.99999974E-6 : f32
    %101 = vector.broadcast %cst_40 : f32 to vector<256x1xf32>
    %102 = arith.addf %99, %101 : vector<256x1xf32>
    %103 = math.rsqrt %102 : vector<256x1xf32>
    %104 = vector.broadcast %100 : vector<1x128xf32> to vector<256x128xf32>
    %105 = vector.broadcast %103 : vector<256x1xf32> to vector<256x128xf32>
    %106 = arith.mulf %104, %105 : vector<256x128xf32>
    %107 = arith.mulf %94, %106 : vector<256x128xf32>
    %108 = vector.extract_strided_slice %0 {offsets = [9, 0], sizes = [1, 128], strides = [1, 1]} : vector<12x384xf32> to vector<1x128xf32>
    %109 = vector.broadcast %108 : vector<1x128xf32> to vector<256x128xf32>
    %110 = arith.addf %107, %109 : vector<256x128xf32>
    %cst_41 = arith.constant 0.000000e+00 : f32
    %111 = vector.broadcast %cst_41 : f32 to vector<256x128xf32>
    %112 = arith.maximumf %110, %111 : vector<256x128xf32>
    %113 = vector.extract_strided_slice %0 {offsets = [10, 0], sizes = [1, 128], strides = [1, 1]} : vector<12x384xf32> to vector<1x128xf32>
    %114 = vector.broadcast %113 : vector<1x128xf32> to vector<256x128xf32>
    %115 = arith.mulf %112, %114 : vector<256x128xf32>
    %cst_42 = arith.constant dense<0.000000e+00> : vector<256xf32>
    %116 = vector.multi_reduction <add>, %115, %cst_42 [1] : vector<256x128xf32> to vector<256xf32>
    %117 = vector.shape_cast %116 : vector<256xf32> to vector<256x1xf32>
    %118 = vector.extract_strided_slice %0 {offsets = [11, 0], sizes = [1, 1], strides = [1, 1]} : vector<12x384xf32> to vector<1x1xf32>
    %119 = vector.broadcast %118 : vector<1x1xf32> to vector<256x1xf32>
    %120 = arith.addf %117, %119 : vector<256x1xf32>
    %c0_43 = arith.constant 0 : index
    %c0_44 = arith.constant 0 : index
    %121 = vector.load %arg10[%c0_43, %c0_44] : memref<256x1xf32, #tpu.memory_space<vmem>>, vector<256x1xf32>
    tpu.vector_store %arg10[%c0_43, %c0_44], %120 {strides = array<i32>} : memref<256x1xf32, #tpu.memory_space<vmem>>, vector<256x1xf32>,
    return
  }
  func.func @transform_0(%arg0: i32) -> (i32, i32) {
    %c0_i32 = arith.constant 0 : i32
    %c0_i32_0 = arith.constant 0 : i32
    return %arg0, %c0_i32 : i32, i32
  }
  func.func @transform_1(%arg0: i32) -> (i32, i32) {
    %c0_i32 = arith.constant 0 : i32
    %c0_i32_0 = arith.constant 0 : i32
    %c0_i32_1 = arith.constant 0 : i32
    return %c0_i32, %c0_i32_0 : i32, i32
  }
  func.func @transform_2(%arg0: i32) -> (i32, i32) {
    %c0_i32 = arith.constant 0 : i32
    %c0_i32_0 = arith.constant 0 : i32
    %c0_i32_1 = arith.constant 0 : i32
    return %c0_i32, %c0_i32_0 : i32, i32
  }
  func.func @transform_3(%arg0: i32) -> (i32, i32) {
    %c0_i32 = arith.constant 0 : i32
    %c0_i32_0 = arith.constant 0 : i32
    %c0_i32_1 = arith.constant 0 : i32
    return %c0_i32, %c0_i32_0 : i32, i32
  }
  func.func @transform_4(%arg0: i32) -> (i32, i32) {
    %c0_i32 = arith.constant 0 : i32
    %c0_i32_0 = arith.constant 0 : i32
    %c0_i32_1 = arith.constant 0 : i32
    return %c0_i32, %c0_i32_0 : i32, i32
  }
  func.func @transform_5(%arg0: i32) -> (i32, i32) {
    %c0_i32 = arith.constant 0 : i32
    %c0_i32_0 = arith.constant 0 : i32
    %c0_i32_1 = arith.constant 0 : i32
    return %c0_i32, %c0_i32_0 : i32, i32
  }
  func.func @transform_6(%arg0: i32) -> (i32, i32) {
    %c0_i32 = arith.constant 0 : i32
    %c0_i32_0 = arith.constant 0 : i32
    %c0_i32_1 = arith.constant 0 : i32
    return %c0_i32, %c0_i32_0 : i32, i32
  }
  func.func @transform_7(%arg0: i32) -> (i32, i32) {
    %c0_i32 = arith.constant 0 : i32
    %c0_i32_0 = arith.constant 0 : i32
    %c0_i32_1 = arith.constant 0 : i32
    return %c0_i32, %c0_i32_0 : i32, i32
  }
  func.func @transform_8(%arg0: i32) -> (i32, i32) {
    %c0_i32 = arith.constant 0 : i32
    %c0_i32_0 = arith.constant 0 : i32
    %c0_i32_1 = arith.constant 0 : i32
    return %c0_i32, %c0_i32_0 : i32, i32
  }
  func.func @transform_9(%arg0: i32) -> (i32, i32) {
    %c0_i32 = arith.constant 0 : i32
    %c0_i32_0 = arith.constant 0 : i32
    return %arg0, %c0_i32 : i32, i32
  }
}

</mosaic_0001>

<bundles_post_ra>
// kernel: tpu_custom_call.1
= control target key start
LH: loop header
LB: loop body
LE: loop exit
PB: predicated region body
PF: predicated region fallthrough
CT: control target
= control target key end

     0   :  { %14 = vsyncpa [#allocation3], 0  ;;  %s7202_s0 = inlined_call_operand.hbm [shape: bf16[256,128], index: 0, kind: input, shape index: {}]   ;;  %s7203_s1 = inlined_call_operand.hbm [shape: bf16[128,384], index: 1, kind: input, shape index: {}]   ;;  %s7204_s2 = inlined_call_operand.hbm [shape: f32[12,384], index: 2, kind: input, shape index: {}]   ;;  %s7205_s3 = inlined_call_operand.hbm [shape: bf16[128,128], index: 3, kind: input, shape index: {}]   ;;  %s7206_s4 = inlined_call_operand.hbm [shape: bf16[128,128], index: 4, kind: input, shape index: {}]   ;;  %s7207_s5 = inlined_call_operand.hbm [shape: bf16[128,128], index: 5, kind: input, shape index: {}]   ;;  %s7208_s6 = inlined_call_operand.hbm [shape: bf16[128,128], index: 6, kind: input, shape index: {}]   ;;  %s7209_s7 = inlined_call_operand.hbm [shape: bf16[128,128], index: 7, kind: input, shape index: {}]   ;;  %s7210_s8 = inlined_call_operand.hbm [shape: bf16[128,128], index: 8, kind: input, shape index: {}]   ;;  %s7211_s9 = inlined_call_operand.vmem [shape: f32[256,1], index: 9, kind: output, shape index: {}]  }
   0x1   :  { %15 = vsyncpa [#allocation5], 0 }
   0x2   :  { %16 = vsyncpa [#allocation8], 0 }
   0x3   :  { %17 = vsyncpa [#allocation11], 0 }
   0x4   :  { %18 = vsyncpa [#allocation14], 0  ;;  %s5196_s30 = smov [#allocation4]   ;;  %s4988_s13 = scalar_lea.hbm %s7203_s1, 3072 }
   0x5   :  { %s36_s10 = sshll.u32 %s5196_s30, 4  ;;  %p4989_p0 = scmp.ne.s32.totalorder %s7203_s1, %s4988_s13  ;;  %s37_s10 = int_to_ptr.vmem [resolvable:$true] %s36_s10 }
   0x6   :  { %p4992_p1 = scmp.lt.u32.totalorder %s4988_s13, %s7203_s1 }
   0x8   :  { %p4994_p2 = pnand %p4992_p1, %p4989_p0 }
   0xa   :  { %4997 = shalt.err (!%p4994_p2)
}
   0xb   :  { %s4998_s18 = scalar_lea.vmem %s37_s10, 3072  ;;  %p5003_p4 = scmp.lt.s32.totalorder %s37_s10, %s37_s10 }
   0xc   :  { %p4999_p3 = scmp.ne.s32.totalorder %s37_s10, %s4998_s18  ;;  %p5004_p5 = scmp.lt.s32.totalorder %s4998_s18, %s4998_s18 }
   0xe   :  { %p5005_p6 = por %p5004_p5, %p5003_p4 }
  0x10   :  { %p5006_p7 = pnand %p5005_p6, %p4999_p3 }
  0x12   :  { %5009 = shalt.err (!%p5006_p7)
}
  0x13   :  { %s5197_s19 = smov 192   ;;  %s5198_s20 = smov 12  }
  0x14   :  { %42 = dma.hbm_to_vmem [thread:$0]  %s7203_s1, 3072, %s37_s10, [#allocation5], %s5197_s19, %s5197_s19, %s5198_s20  }
  0x15   :  { %s5199_s23 = smov [#allocation7]   ;;  %s5200_s25 = smov [#allocation10]  }
  0x16   :  { %s60_s24 = sshll.u32 %s5199_s23, 4  ;;  %s84_s26 = sshll.u32 %s5200_s25, 4  ;;  %s61_s24 = int_to_ptr.vmem [resolvable:$true] %s60_s24  ;;  %s85_s26 = int_to_ptr.vmem [resolvable:$true] %s84_s26 }
  0x17   :  { %s5010_s29 = scalar_lea.hbm %s7205_s3, 1024 }
  0x18   :  { %p5011_p8 = scmp.ne.s32.totalorder %s7205_s3, %s5010_s29  ;;  %p5014_p9 = scmp.lt.u32.totalorder %s5010_s29, %s7205_s3 }
  0x1a   :  { %p5016_p10 = pnand %p5014_p9, %p5011_p8 }
  0x1c   :  { %5019 = shalt.err (!%p5016_p10)
}
  0x1d   :  { %s5020_s1 = scalar_lea.vmem %s61_s24, 1024  ;;  %p5025_p12 = scmp.lt.s32.totalorder %s61_s24, %s61_s24 }
  0x1e   :  { %p5021_p11 = scmp.ne.s32.totalorder %s61_s24, %s5020_s1  ;;  %p5026_p13 = scmp.lt.s32.totalorder %s5020_s1, %s5020_s1 }
  0x20   :  { %p5027_p0 = por %p5026_p13, %p5025_p12 }
  0x22   :  { %p5028_p1 = pnand %p5027_p0, %p5021_p11 }
  0x24   :  { %5031 = shalt.err (!%p5028_p1)
}
  0x25   :  { %s5201_s10 = smov 64   ;;  %s5202_s14 = smov 4  }
  0x26   :  { %66 = dma.hbm_to_vmem [thread:$0]  %s7205_s3, 1024, %s61_s24, [#allocation8], %s5201_s10, %s5201_s10, %s5202_s14  }
  0x27   :  { %s5032_s19 = scalar_lea.hbm %s7207_s5, 1024 }
  0x28   :  { %p5033_p2 = scmp.ne.s32.totalorder %s7207_s5, %s5032_s19  ;;  %p5036_p3 = scmp.lt.u32.totalorder %s5032_s19, %s7207_s5 }
  0x2a   :  { %p5038_p4 = pnand %p5036_p3, %p5033_p2 }
  0x2c   :  { %5041 = shalt.err (!%p5038_p4)
}
  0x2d   :  { %s5042_s25 = scalar_lea.vmem %s85_s26, 1024  ;;  %p5047_p6 = scmp.lt.s32.totalorder %s85_s26, %s85_s26 }
  0x2e   :  { %p5043_p5 = scmp.ne.s32.totalorder %s85_s26, %s5042_s25  ;;  %p5048_p7 = scmp.lt.s32.totalorder %s5042_s25, %s5042_s25 }
  0x30   :  { %p5049_p8 = por %p5048_p7, %p5047_p6 }
  0x32   :  { %p5050_p9 = pnand %p5049_p8, %p5043_p5 }
  0x34   :  { %5053 = shalt.err (!%p5050_p9)
}
  0x35   :  { %90 = dma.hbm_to_vmem [thread:$0]  %s7207_s5, 1024, %s85_s26, [#allocation11], %s5201_s10, %s5201_s10, %s5202_s14  }
  0x36   :  { %s5203_s27 = smov [#allocation13]   ;;  %s5204_s29 = smov [#allocation2]  }
  0x37   :  { %s108_s28 = sshll.u32 %s5203_s27, 4  ;;  %s24_s30 = sshll.u32 %s5204_s29, 4  ;;  %s109_s28 = int_to_ptr.vmem [resolvable:$true] %s108_s28  ;;  %s25_s30 = int_to_ptr.vmem [resolvable:$true] %s24_s30 }
  0x38   :  { %s5054_s13 = scalar_lea.hbm %s7209_s7, 1024 }
  0x39   :  { %p5055_p10 = scmp.ne.s32.totalorder %s7209_s7, %s5054_s13  ;;  %p5058_p11 = scmp.lt.u32.totalorder %s5054_s13, %s7209_s7 }
  0x3b   :  { %p5060_p12 = pnand %p5058_p11, %p5055_p10 }
  0x3d   :  { %5063 = shalt.err (!%p5060_p12)
}
  0x3e   :  { %s5064_s5 = scalar_lea.vmem %s109_s28, 1024  ;;  %p5069_p0 = scmp.lt.s32.totalorder %s109_s28, %s109_s28 }
  0x3f   :  { %p5065_p13 = scmp.ne.s32.totalorder %s109_s28, %s5064_s5  ;;  %p5070_p1 = scmp.lt.s32.totalorder %s5064_s5, %s5064_s5 }
  0x41   :  { %p5071_p2 = por %p5070_p1, %p5069_p0 }
  0x43   :  { %p5072_p3 = pnand %p5071_p2, %p5065_p13 }
  0x45   :  { %5075 = shalt.err (!%p5072_p3)
}
  0x46   :  { %114 = dma.hbm_to_vmem [thread:$0]  %s7209_s7, 1024, %s109_s28, [#allocation14], %s5201_s10, %s5201_s10, %s5202_s14  }
  0x47   :  { %s5076_s21 = scalar_lea.hbm %s7202_s0, 2048 }
  0x48   :  { %p5077_p4 = scmp.ne.s32.totalorder %s7202_s0, %s5076_s21  ;;  %p5080_p5 = scmp.lt.u32.totalorder %s5076_s21, %s7202_s0 }
  0x4a   :  { %p5082_p6 = pnand %p5080_p5, %p5077_p4 }
  0x4c   :  { %5085 = shalt.err (!%p5082_p6)
}
  0x4d   :  { %s5086_s24 = scalar_lea.vmem %s25_s30, 2048  ;;  %p5091_p8 = scmp.lt.s32.totalorder %s25_s30, %s25_s30 }
  0x4e   :  { %p5087_p7 = scmp.ne.s32.totalorder %s25_s30, %s5086_s24  ;;  %p5092_p9 = scmp.lt.s32.totalorder %s5086_s24, %s5086_s24 }
  0x50   :  { %p5093_p10 = por %p5092_p9, %p5091_p8 }
  0x52   :  { %p5094_p11 = pnand %p5093_p10, %p5087_p7 }
  0x54   :  { %5097 = shalt.err (!%p5094_p11)
}
  0x55   :  { %30 = dma.hbm_to_vmem [thread:$0]  %s7202_s0, 2048, %s25_s30, [#allocation3], %s5201_s10, %s5201_s10, %s5202_s14  }
  0x56   :  { %s5205_s28 = smov [#allocation6]   ;;  %s5098_s13 = scalar_lea.hbm %s7204_s2, 768 }
  0x57   :  { %s48_s29 = sshll.u32 %s5205_s28, 4  ;;  %p5099_p12 = scmp.ne.s32.totalorder %s7204_s2, %s5098_s13  ;;  %s49_s29 = int_to_ptr.vmem [resolvable:$true] %s48_s29 }
  0x58   :  { %p5102_p13 = scmp.lt.u32.totalorder %s5098_s13, %s7204_s2 }
  0x5a   :  { %p5104_p0 = pnand %p5102_p13, %p5099_p12 }
  0x5c   :  { %5107 = shalt.err (!%p5104_p0)
}
  0x5d   :  { %s5108_s5 = scalar_lea.vmem %s49_s29, 768  ;;  %p5113_p2 = scmp.lt.s32.totalorder %s49_s29, %s49_s29 }
  0x5e   :  { %p5109_p1 = scmp.ne.s32.totalorder %s49_s29, %s5108_s5  ;;  %p5114_p3 = scmp.lt.s32.totalorder %s5108_s5, %s5108_s5 }
  0x60   :  { %p5115_p4 = por %p5114_p3, %p5113_p2 }
  0x62   :  { %p5116_p5 = pnand %p5115_p4, %p5109_p1 }
  0x64   :  { %5119 = shalt.err (!%p5116_p5)
}
  0x65   :  { %s5206_s0 = smov 384   ;;  %s5207_s30 = smov 24  }
  0x66   :  { %54 = dma.hbm_to_vmem [thread:$0]  %s7204_s2, 768, %s49_s29, [#allocation5], %s5206_s0, %s5206_s0, %s5207_s30  }
  0x67   :  { %s5208_s19 = smov [#allocation9]   ;;  %s5209_s21 = smov [#allocation12]  }
  0x68   :  { %s72_s20 = sshll.u32 %s5208_s19, 4  ;;  %s96_s22 = sshll.u32 %s5209_s21, 4  ;;  %s73_s20 = int_to_ptr.vmem [resolvable:$true] %s72_s20  ;;  %s5346_s22 = int_to_ptr.vmem [resolvable:$true] %s96_s22 }
  0x69   :  { %s5120_s3 = scalar_lea.hbm %s7206_s4, 1024 }
  0x6a   :  { %p5121_p6 = scmp.ne.s32.totalorder %s7206_s4, %s5120_s3  ;;  %p5124_p7 = scmp.lt.u32.totalorder %s5120_s3, %s7206_s4 }
  0x6c   :  { %p5126_p8 = pnand %p5124_p7, %p5121_p6 }
  0x6e   :  { %5129 = shalt.err (!%p5126_p8)
}
  0x6f   :  { %s5130_s2 = scalar_lea.vmem %s73_s20, 1024  ;;  %p5135_p10 = scmp.lt.s32.totalorder %s73_s20, %s73_s20 }
  0x70   :  { %p5131_p9 = scmp.ne.s32.totalorder %s73_s20, %s5130_s2  ;;  %p5136_p11 = scmp.lt.s32.totalorder %s5130_s2, %s5130_s2 }
  0x72   :  { %p5137_p12 = por %p5136_p11, %p5135_p10 }
  0x74   :  { %p5138_p13 = pnand %p5137_p12, %p5131_p9 }
  0x76   :  { %5141 = shalt.err (!%p5138_p13)
}
  0x77   :  { %78 = dma.hbm_to_vmem [thread:$0]  %s7206_s4, 1024, %s73_s20, [#allocation8], %s5201_s10, %s5201_s10, %s5202_s14  }
  0x78   :  { %s5142_s1 = scalar_lea.hbm %s7208_s6, 1024 }
  0x79   :  { %p5143_p0 = scmp.ne.s32.totalorder %s7208_s6, %s5142_s1  ;;  %p5146_p1 = scmp.lt.u32.totalorder %s5142_s1, %s7208_s6 }
  0x7b   :  { %p5148_p2 = pnand %p5146_p1, %p5143_p0 }
  0x7d   :  { %5151 = shalt.err (!%p5148_p2)
}
  0x7e   :  { %s5152_s0 = scalar_lea.vmem %s5346_s22, 1024  ;;  %p5157_p4 = scmp.lt.s32.totalorder %s5346_s22, %s5346_s22 }
  0x7f   :  { %p5153_p3 = scmp.ne.s32.totalorder %s5346_s22, %s5152_s0  ;;  %p5158_p5 = scmp.lt.s32.totalorder %s5152_s0, %s5152_s0 }
  0x81   :  { %p5159_p6 = por %p5158_p5, %p5157_p4 }
  0x83   :  { %p5160_p7 = pnand %p5159_p6, %p5153_p3 }
  0x85   :  { %5163 = shalt.err (!%p5160_p7)
}
  0x86   :  { %102 = dma.hbm_to_vmem [thread:$0]  %s7208_s6, 1024, %s5346_s22, [#allocation11], %s5201_s10, %s5201_s10, %s5202_s14  }
  0x87   :  { %s5210_s26 = smov [#allocation15]   ;;  %s5164_s21 = scalar_lea.hbm %s7210_s8, 1024 }
  0x88   :  { %s120_s18 = sshll.u32 %s5210_s26, 4  ;;  %p5165_p8 = scmp.ne.s32.totalorder %s7210_s8, %s5164_s21  ;;  %s121_s18 = int_to_ptr.vmem [resolvable:$true] %s120_s18 }
  0x89   :  { %p5168_p9 = scmp.lt.u32.totalorder %s5164_s21, %s7210_s8 }
  0x8b   :  { %p5170_p10 = pnand %p5168_p9, %p5165_p8 }
  0x8d   :  { %5173 = shalt.err (!%p5170_p10)
}
  0x8e   :  { %s5174_s7 = scalar_lea.vmem %s121_s18, 1024  ;;  %p5179_p12 = scmp.lt.s32.totalorder %s121_s18, %s121_s18 }
  0x8f   :  { %p5175_p11 = scmp.ne.s32.totalorder %s121_s18, %s5174_s7  ;;  %p5180_p13 = scmp.lt.s32.totalorder %s5174_s7, %s5174_s7 }
  0x91   :  { %p5181_p0 = por %p5180_p13, %p5179_p12 }
  0x93   :  { %p5182_p1 = pnand %p5181_p0, %p5175_p11 }
  0x95   :  { %5185 = shalt.err (!%p5182_p1)
}
  0x96   :  { %126 = dma.hbm_to_vmem [thread:$0]  %s7210_s8, 1024, %s121_s18, [#allocation14], %s5201_s10, %s5201_s10, %s5202_s14  }
  0x97   :  { %5186 = dma.done.wait [#allocation3], 2048  }
  0x98   :  { %5187 = vsyncadd [#allocation3], 4294965248 }
  0x99   :  { %5188 = dma.done.wait [#allocation5], 3840  }
  0x9a   :  { %5189 = vsyncadd [#allocation5], 4294963456 }
  0x9b   :  { %5190 = dma.done.wait [#allocation8], 2048  }
  0x9c   :  { %5191 = vsyncadd [#allocation8], 4294965248 }
  0x9d   :  { %5192 = dma.done.wait [#allocation11], 2048  }
  0x9e   :  { %5193 = vsyncadd [#allocation11], 4294965248 }
  0x9f   :  { %5194 = dma.done.wait [#allocation14], 2048  }
  0xa0   :  { %5195 = vsyncadd [#allocation14], 4294965248  ;;  %v5211_v0 = vmov 0   ;;  %v4666_v1 = vld [vmem:[#allocation4 + $0x4] ss:$12 sps:$4 sm:$0xff]   ;;  %v4717_v22 = vld [vmem:[#allocation10 + $0x8] sm:$0xff]   ;;  %v223_v57 = vlaneseq }
  0xa1   :  { %491 = vmatprep.mubr.bf16.mxu0 %v5211_v0  ;;  %611 = vmatprep.mubr.bf16.mxu1 %v5211_v0  ;;  %v4668_v2 = vld [vmem:[#allocation4] ss:$12 sps:$4 sm:$0xff]   ;;  %v4669_v3 = vld [vmem:[#allocation4 + $0x1c] ss:$12 sps:$4 sm:$0xff]   ;;  %v4671_v4 = vld [vmem:[#allocation4 + $0x18] ss:$12 sps:$4 sm:$0xff]  }
  0xa2   :  { %459 = vmatprep.subr.bf16.mxu0 %v4666_v1  ;;  %4634 = vmatprep.subr.bf16.mxu1 %v4666_v1  ;;  %v4672_v5 = vld [vmem:[#allocation4 + $0x34] ss:$12 sps:$4 sm:$0xff]   ;;  %v4674_v6 = vld [vmem:[#allocation4 + $0x30] ss:$12 sps:$4 sm:$0xff]   ;;  %v4675_v7 = vld [vmem:[#allocation4 + $0x4c] ss:$12 sps:$4 sm:$0xff]  }
  0xa3   :  { %460 = vmatpush1.bf16.msra.mxu0 %v4668_v2  ;;  %4642 = vmatpush1.bf16.msra.mxu1 %v4668_v2  ;;  %v4677_v8 = vld [vmem:[#allocation4 + $0x48] ss:$12 sps:$4 sm:$0xff]   ;;  %v4678_v9 = vld [vmem:[#allocation4 + $0x64] ss:$12 sps:$4 sm:$0xff]   ;;  %v4680_v10 = vld [vmem:[#allocation4 + $0x60] ss:$12 sps:$4 sm:$0xff]  }
  0xa4   :  { %461 = vmatprep.subr.bf16.mxu0 %v4669_v3  ;;  %4635 = vmatprep.subr.bf16.mxu1 %v4669_v3  ;;  %v4681_v11 = vld [vmem:[#allocation4 + $0x7c] ss:$12 sps:$4 sm:$0xff]   ;;  %v4683_v12 = vld [vmem:[#allocation4 + $0x78] ss:$12 sps:$4 sm:$0xff]   ;;  %v4684_v13 = vld [vmem:[#allocation4 + $0x94] ss:$12 sps:$4 sm:$0xff]  }
  0xa5   :  { %v4686_v14 = vld [vmem:[#allocation4 + $0x90] ss:$12 sps:$4 sm:$0xff]   ;;  %v4687_v15 = vld [vmem:[#allocation4 + $0xac] ss:$12 sps:$4 sm:$0xff]   ;;  %v4689_v16 = vld [vmem:[#allocation4 + $0xa8] ss:$12 sps:$4 sm:$0xff]  }
  0xa6   :  { %v159_v17 = vld [vmem:[#allocation2] sm:$0xff]   ;;  %v4706_v19 = vld [vmem:[#allocation4 + $0x8] ss:$12 sps:$4 sm:$0xff]   ;;  %v4709_v27 = vld [vmem:[#allocation4 + $0x50] ss:$12 sps:$4 sm:$0xff]   ;;  %v5433_v59 = vshrl.u32 %v223_v57, 7 }
  0xa7   :  { %462 = vmatpush1.bf16.msra.mxu0 %v4671_v4  ;;  %4643 = vmatpush1.bf16.msra.mxu1 %v4671_v4  ;;  %v5400_v18 = vld [vmem:[#allocation2 + $0x60] sm:$0xff]   ;;  %v4715_v20 = vld [vmem:[#allocation10] sm:$0xff]   ;;  %v161_v23 = vld [vmem:[#allocation2 + $0x8] sm:$0xff]   ;;  %vm4000_vm0 = vcmask 7168  }
  0xa8   :  { %463 = vmatprep.subr.bf16.mxu0 %v4672_v5  ;;  %4636 = vmatprep.subr.bf16.mxu1 %v4672_v5  ;;  %v4707_v21 = vld [vmem:[#allocation4 + $0x20] ss:$12 sps:$4 sm:$0xff]   ;;  %v4708_v25 = vld [vmem:[#allocation4 + $0x38] ss:$12 sps:$4 sm:$0xff]   ;;  %v163_v29 = vld [vmem:[#allocation2 + $0x10] sm:$0xff]   ;;  %7226 = vst [vmem:[#allocation21_spill] sm:$0xff] %v5433_v59 }
  0xa9   :  { %v5402_v24 = vld [vmem:[#allocation2 + $0x68] sm:$0xff]   ;;  %v4719_v26 = vld [vmem:[#allocation10 + $0x10] sm:$0xff]   ;;  %v5407_v30 = vld [vmem:[#allocation2 + $0x70] sm:$0xff]   ;;  %v5436_v60 = vsub.s32 0, %v5433_v59 }
  0xaa   :  { %v4721_v28 = vld [vmem:[#allocation10 + $0x18] sm:$0xff]   ;;  %v165_v33 = vld [vmem:[#allocation2 + $0x18] sm:$0xff]   ;;  %v167_v37 = vld [vmem:[#allocation2 + $0x20] sm:$0xff]  }
  0xab   :  { %464 = vmatpush1.bf16.msra.mxu0 %v4674_v6  ;;  %4644 = vmatpush1.bf16.msra.mxu1 %v4674_v6  ;;  %v4710_v31 = vld [vmem:[#allocation4 + $0x68] ss:$12 sps:$4 sm:$0xff]   ;;  %v4711_v32 = vld [vmem:[#allocation4 + $0x80] ss:$12 sps:$4 sm:$0xff]   ;;  %v5412_v34 = vld [vmem:[#allocation2 + $0x78] sm:$0xff]   ;;  %7227 = vst [vmem:[#allocation22_spill] sm:$0xff] %v5436_v60 }
  0xac   :  { %465 = vmatprep.subr.bf16.mxu0 %v4675_v7  ;;  %4637 = vmatprep.subr.bf16.mxu1 %v4675_v7  ;;  %v4712_v35 = vld [vmem:[#allocation4 + $0x98] ss:$12 sps:$4 sm:$0xff]   ;;  %v4713_v36 = vld [vmem:[#allocation4 + $0xb0] ss:$12 sps:$4 sm:$0xff]   ;;  %v169_v40 = vld [vmem:[#allocation2 + $0x28] sm:$0xff]  }
  0xad   :  { %v4714_v38 = vld [vmem:[#allocation7] sm:$0xff]   ;;  %v4716_v39 = vld [vmem:[#allocation7 + $0x8] sm:$0xff]   ;;  %v4718_v41 = vld [vmem:[#allocation7 + $0x10] sm:$0xff]  }
  0xae   :  { %v4720_v42 = vld [vmem:[#allocation7 + $0x18] sm:$0xff]   ;;  %v171_v43 = vld [vmem:[#allocation2 + $0x30] sm:$0xff]   ;;  %v173_v44 = vld [vmem:[#allocation2 + $0x38] sm:$0xff]  }
  0xaf   :  { %466 = vmatpush1.bf16.msra.mxu0 %v4677_v8  ;;  %4645 = vmatpush1.bf16.msra.mxu1 %v4677_v8  ;;  %v175_v45 = vld [vmem:[#allocation2 + $0x40] sm:$0xff]   ;;  %v177_v46 = vld [vmem:[#allocation2 + $0x48] sm:$0xff]   ;;  %v179_v47 = vld [vmem:[#allocation2 + $0x50] sm:$0xff]  }
  0xb0   :  { %467 = vmatprep.subr.bf16.mxu0 %v4678_v9  ;;  %4638 = vmatprep.subr.bf16.mxu1 %v4678_v9  ;;  %v181_v48 = vld [vmem:[#allocation2 + $0x58] sm:$0xff]   ;;  %v4722_v49 = vld [vmem:[#allocation7 + $0x20] sm:$0xff]   ;;  %v4726_v53 = vld [vmem:[#allocation7 + $0x30] sm:$0xff]  }
  0xb1   :  { %v4723_v50 = vld [vmem:[#allocation10 + $0x20] sm:$0xff]   ;;  %v4724_v51 = vld [vmem:[#allocation7 + $0x28] sm:$0xff]   ;;  %v4727_v54 = vld [vmem:[#allocation10 + $0x30] sm:$0xff]  }
  0xb2   :  { %v4725_v52 = vld [vmem:[#allocation10 + $0x28] sm:$0xff]   ;;  %v4728_v55 = vld [vmem:[#allocation7 + $0x38] sm:$0xff]   ;;  %v5430_v58 = vld [vmem:[#allocation13] sm:$0xff]  }
  0xb3   :  { %468 = vmatpush1.bf16.msra.mxu0 %v4680_v10  ;;  %4646 = vmatpush1.bf16.msra.mxu1 %v4680_v10  ;;  %v4729_v56 = vld [vmem:[#allocation10 + $0x38] sm:$0xff]   ;;  %v5438_v61 = vld [vmem:[#allocation9] sm:$0xff]   ;;  %v5440_v62 = vld [vmem:[#allocation6] sm:$0xff] }
  0xb4   :  { %469 = vmatprep.subr.bf16.mxu0 %v4681_v11  ;;  %4639 = vmatprep.subr.bf16.mxu1 %v4681_v11  ;;  %v156_v63 = vld [vmem:[#allocation6 + $0x8] sm:$0xff] }
  0xb5   :  { %v5448_v1 = vrot.slane %v156_v63, %v5436_v60 }
  0xb7   :  { %470 = vmatpush1.bf16.msra.mxu0 %v4683_v12  ;;  %4647 = vmatpush1.bf16.msra.mxu1 %v4683_v12 }
  0xb8   :  { %471 = vmatprep.subr.bf16.mxu0 %v4684_v13  ;;  %4640 = vmatprep.subr.bf16.mxu1 %v4684_v13 }
  0xbb   :  { %472 = vmatpush1.bf16.msra.mxu0 %v4686_v14  ;;  %4648 = vmatpush1.bf16.msra.mxu1 %v4686_v14 }
  0xbc   :  { %473 = vmatprep.subr.bf16.mxu0 %v4687_v15  ;;  %4641 = vmatprep.subr.bf16.mxu1 %v4687_v15 }
  0xbf   :  { %474 = vmatpush1.bf16.msra.mxu0 %v4689_v16  ;;  %4649 = vmatpush1.bf16.msra.mxu1 %v4689_v16 }
  0xc0   :  { %4298 = vmatprep.subr.bf16.mxu1 %v4706_v19  ;;  %4394 = vmatprep.subr.bf16.mxu0 %v4715_v20 }
  0xc2   :  { %492 = vmatmul.mubr.bf16.vlgmr.msra.gmra.mrb[0].mxu0 %v159_v17  ;;  %612 = vmatmul.mubr.bf16.vlgmr.msra.gmra.mrb[0].mxu1 %v5400_v18 }
  0xc3   :  { %501 = vmatprep.mubr.bf16.mxu0 %v5211_v0  ;;  %621 = vmatprep.mubr.bf16.mxu1 %v5211_v0 }
  0xc4   :  { %4299 = vmatpush3.bf16.msra.mxu1 %v4706_v19  ;;  %4395 = vmatpush3.bf16.msra.mxu0 %v4715_v20 }
  0xc5   :  { %4300 = vmatprep.subr.bf16.mxu1 %v4707_v21  ;;  %4396 = vmatprep.subr.bf16.mxu0 %v4717_v22 }
  0xc8   :  { %4301 = vmatpush3.bf16.msra.mxu1 %v4707_v21  ;;  %4397 = vmatpush3.bf16.msra.mxu0 %v4717_v22 }
  0xc9   :  { %4302 = vmatprep.subr.bf16.mxu1 %v4708_v25  ;;  %4398 = vmatprep.subr.bf16.mxu0 %v4719_v26 }
  0xca   :  { %502 = vmatmul.mubr.bf16.gmra.mrb[4].mxu0 %v161_v23  ;;  %622 = vmatmul.mubr.bf16.gmra.mrb[4].mxu1 %v5402_v24 }
  0xcb   :  { %511 = vmatprep.mubr.bf16.mxu0 %v5211_v0  ;;  %631 = vmatprep.mubr.bf16.mxu1 %v5211_v0 }
  0xcc   :  { %4303 = vmatpush3.bf16.msra.mxu1 %v4708_v25  ;;  %4399 = vmatpush3.bf16.msra.mxu0 %v4719_v26 }
  0xcd   :  { %4304 = vmatprep.subr.bf16.mxu1 %v4709_v27  ;;  %4400 = vmatprep.subr.bf16.mxu0 %v4721_v28 }
  0xd0   :  { %4305 = vmatpush3.bf16.msra.mxu1 %v4709_v27  ;;  %4401 = vmatpush3.bf16.msra.mxu0 %v4721_v28 }
  0xd1   :  { %4306 = vmatprep.subr.bf16.mxu1 %v4710_v31  ;;  %4402 = vmatprep.subr.bf16.mxu0 %v4723_v50 }
  0xd2   :  { %512 = vmatmul.mubr.bf16.gmra.mrb[8].mxu0 %v163_v29  ;;  %632 = vmatmul.mubr.bf16.gmra.mrb[8].mxu1 %v5407_v30 }
  0xd3   :  { %521 = vmatprep.mubr.bf16.mxu0 %v5211_v0  ;;  %641 = vmatprep.mubr.bf16.mxu1 %v5211_v0 }
  0xd4   :  { %4307 = vmatpush3.bf16.msra.mxu1 %v4710_v31  ;;  %4403 = vmatpush3.bf16.msra.mxu0 %v4723_v50 }
  0xd5   :  { %4308 = vmatprep.subr.bf16.mxu1 %v4711_v32  ;;  %4404 = vmatprep.subr.bf16.mxu0 %v4725_v52 }
  0xd8   :  { %4309 = vmatpush3.bf16.msra.mxu1 %v4711_v32  ;;  %4405 = vmatpush3.bf16.msra.mxu0 %v4725_v52 }
  0xd9   :  { %4310 = vmatprep.subr.bf16.mxu1 %v4712_v35  ;;  %4406 = vmatprep.subr.bf16.mxu0 %v4727_v54 }
  0xda   :  { %522 = vmatmul.mubr.bf16.gmra.mrb[12].mxu0 %v165_v33  ;;  %642 = vmatmul.mubr.bf16.gmra.mrb[12].mxu1 %v5412_v34 }
  0xdb   :  { %531 = vmatprep.mubr.bf16.mxu0 %v5211_v0  ;;  %4314 = vmatprep.mubr.bf16.mxu1 %v159_v17 }
  0xdc   :  { %4311 = vmatpush3.bf16.msra.mxu1 %v4712_v35  ;;  %4407 = vmatpush3.bf16.msra.mxu0 %v4727_v54 }
  0xdd   :  { %4312 = vmatprep.subr.bf16.mxu1 %v4713_v36  ;;  %4408 = vmatprep.subr.bf16.mxu0 %v4729_v56 }
  0xe0   :  { %4313 = vmatpush3.bf16.msra.mxu1 %v4713_v36  ;;  %4409 = vmatpush3.bf16.msra.mxu0 %v4729_v56  ;;  %v4731_v56 = vld [vmem:[#allocation13 + $0x8] sm:$0xff]  }
  0xe1   :  { %4346 = vmatprep.subr.bf16.mxu1 %v4714_v38  ;;  %4490 = vmatprep.subr.bf16.mxu0 %v5438_v61 }
  0xe2   :  { %532 = vmatmul.mubr.bf16.gmra.mrb[16].mxu0 %v167_v37 }
  0xe3   :  { %541 = vmatprep.mubr.bf16.mxu0 %v5211_v0  ;;  %4315 = vmatmul.mubr.bf16.vlgmr.msra.gmra.mrb[16].mxu1 %v161_v23 }
  0xe4   :  { %4318 = vmatprep.mubr.bf16.mxu1 %v163_v29  ;;  %4347 = vmatpush3.bf16.msra.mxu1 %v4714_v38 }
  0xe5   :  { %4348 = vmatprep.subr.bf16.mxu1 %v4716_v39 }
  0xe8   :  { %4349 = vmatpush3.bf16.msra.mxu1 %v4716_v39 }
  0xe9   :  { %4350 = vmatprep.subr.bf16.mxu1 %v4718_v41 }
  0xea   :  { %542 = vmatmul.mubr.bf16.gmra.mrb[20].mxu0 %v169_v40 }
  0xeb   :  { %551 = vmatprep.mubr.bf16.mxu0 %v5211_v0  ;;  %4319 = vmatmul.mubr.bf16.gmra.mrb[20].mxu1 %v165_v33 }
  0xec   :  { %4322 = vmatprep.mubr.bf16.mxu1 %v167_v37  ;;  %4351 = vmatpush3.bf16.msra.mxu1 %v4718_v41 }
  0xed   :  { %4352 = vmatprep.subr.bf16.mxu1 %v4720_v42 }
  0xf0   :  { %4353 = vmatpush3.bf16.msra.mxu1 %v4720_v42 }
  0xf1   :  { %4354 = vmatprep.subr.bf16.mxu1 %v4722_v49 }
  0xf2   :  { %552 = vmatmul.mubr.bf16.gmra.mrb[24].mxu0 %v171_v43 }
  0xf3   :  { %561 = vmatprep.mubr.bf16.mxu0 %v5211_v0  ;;  %4323 = vmatmul.mubr.bf16.gmra.mrb[24].mxu1 %v169_v40 }
  0xf4   :  { %4326 = vmatprep.mubr.bf16.mxu1 %v171_v43  ;;  %4355 = vmatpush3.bf16.msra.mxu1 %v4722_v49 }
  0xf5   :  { %4356 = vmatprep.subr.bf16.mxu1 %v4724_v51 }
  0xf8   :  { %4357 = vmatpush3.bf16.msra.mxu1 %v4724_v51 }
  0xf9   :  { %4358 = vmatprep.subr.bf16.mxu1 %v4726_v53 }
  0xfa   :  { %562 = vmatmul.mubr.bf16.gmra.mrb[28].mxu0 %v173_v44 }
  0xfb   :  { %571 = vmatprep.mubr.bf16.mxu0 %v5211_v0  ;;  %4327 = vmatmul.mubr.bf16.gmra.mrb[28].mxu1 %v173_v44 }
  0xfc   :  { %4330 = vmatprep.mubr.bf16.mxu1 %v175_v45  ;;  %4359 = vmatpush3.bf16.msra.mxu1 %v4726_v53 }
  0xfd   :  { %4360 = vmatprep.subr.bf16.mxu1 %v4728_v55 }
 0x100   :  { %4361 = vmatpush3.bf16.msra.mxu1 %v4728_v55 }
 0x101   :  { %4442 = vmatprep.subr.bf16.mxu1 %v5430_v58 }
 0x102   :  { %572 = vmatmul.mubr.bf16.gmra.mrb[32].mxu0 %v175_v45 }
 0x103   :  { %581 = vmatprep.mubr.bf16.mxu0 %v5211_v0  ;;  %4331 = vmatmul.mubr.bf16.gmra.mrb[32].mxu1 %v177_v46 }
 0x104   :  { %4334 = vmatprep.mubr.bf16.mxu1 %v179_v47 }
 0x10a   :  { %582 = vmatmul.mubr.bf16.gmra.mrb[36].mxu0 %v177_v46 }
 0x10b   :  { %591 = vmatprep.mubr.bf16.mxu0 %v5211_v0  ;;  %4335 = vmatmul.mubr.bf16.gmra.mrb[36].mxu1 %v181_v48 }
 0x10c   :  { %4338 = vmatprep.mubr.bf16.mxu1 %v5400_v18 }
 0x112   :  { %592 = vmatmul.mubr.bf16.gmra.mrb[40].mxu0 %v179_v47 }
 0x113   :  { %601 = vmatprep.mubr.bf16.mxu0 %v5211_v0  ;;  %4339 = vmatmul.mubr.bf16.gmra.mrb[40].mxu1 %v5402_v24  ;;  %v5445_v0 = vrot.slane %v5440_v62, %v5436_v60 }
 0x114   :  { %4342 = vmatprep.mubr.bf16.mxu1 %v5407_v30 }
 0x11a   :  { %602 = vmatmul.mubr.bf16.gmra.mrb[44].mxu0 %v181_v48 }
 0x11b   :  { %4343 = vmatmul.mubr.bf16.gmra.mrb[44].mxu1 %v5412_v34 }
 0x195   :  { %v493_v2 = vpop.f32.mrb[0].mxu0  ;;  %v613_v3 = vpop.f32.mrb[0].mxu1 }
 0x196   :  { %v494_v4 = vadd.f32 %v493_v2, %v5445_v0  ;;  %v495_v5 = vpop.f32.mrb[1].mxu0  ;;  %v614_v6 = vadd.f32 %v613_v3, %v5445_v0  ;;  %v615_v7 = vpop.f32.mrb[1].mxu1 }
 0x197   :  { %v496_v8 = vadd.f32 %v495_v5, %v5448_v1  ;;  %v497_v9 = vpop.f32.mrb[2].mxu0  ;;  %v616_v10 = vadd.f32 %v615_v7, %v5448_v1  ;;  %v617_v11 = vpop.f32.mrb[2].mxu1 }
 0x198   :  { %v498_v12 = vadd.f32 %v497_v9, %v5445_v0  ;;  %v499_v13 = vpop.f32.mrb[3].mxu0  ;;  %v885_v14 = vmax.f32 %v614_v6, 0.0  ;;  %v618_v15 = vadd.f32 %v617_v11, %v5445_v0  ;;  %v619_v16 = vpop.f32.mrb[3].mxu1  ;;  %v813_v20 = vmax.f32 %v494_v4, 0.0  ;;  %v4739_v4 = vld [vmem:[#allocation9 + $0x8] sm:$0xff]  }
 0x199   :  { %v500_v17 = vadd.f32 %v499_v13, %v5448_v1  ;;  %v886_v18 = vmax.f32 %v616_v10, 0.0  ;;  %v620_v19 = vadd.f32 %v619_v16, %v5448_v1  ;;  %v814_v23 = vmax.f32 %v496_v8, 0.0 }
 0x19a   :  { %v816_v21 = vmax.f32 %v498_v12, 0.0  ;;  %v888_v22 = vmax.f32 %v618_v15, 0.0 }
 0x19b   :  { %v817_v24 = vmax.f32 %v500_v17, 0.0  ;;  %v889_v25 = vmax.f32 %v620_v19, 0.0 }
 0x19c   :  { %v909_v26 = vpack.c.bf16 %v816_v21, %v813_v20  ;;  %v5458_v27 = vpack.c.bf16 %v888_v22, %v885_v14  ;;  %v4740_v22 = vld [vmem:[#allocation9 + $0x10] sm:$0xff]  }
 0x19d   :  { %v910_v28 = vpack.c.bf16 %v817_v24, %v814_v23  ;;  %v503_v29 = vpop.f32.mrb[4].mxu0  ;;  %v5460_v30 = vpack.c.bf16 %v889_v25, %v886_v18  ;;  %v623_v31 = vpop.f32.mrb[4].mxu1  ;;  %v4732_v18 = vld [vmem:[#allocation13 + $0x10] sm:$0xff]  }
 0x19e   :  { %v504_v32 = vadd.f32 %v503_v29, %v5445_v0  ;;  %v505_v33 = vpop.f32.mrb[5].mxu0  ;;  %4362 = vmatprep.mubr.bf16.mxu1 %v909_v26  ;;  %v624_v34 = vadd.f32 %v623_v31, %v5445_v0  ;;  %v625_v35 = vpop.f32.mrb[5].mxu1 }
 0x19f   :  { %v506_v36 = vadd.f32 %v505_v33, %v5448_v1  ;;  %v507_v37 = vpop.f32.mrb[6].mxu0  ;;  %4410 = vmatprep.mubr.bf16.mxu0 %v910_v28  ;;  %v626_v38 = vadd.f32 %v625_v35, %v5448_v1  ;;  %v627_v39 = vpop.f32.mrb[6].mxu1 }
 0x1a0   :  { %v508_v40 = vadd.f32 %v507_v37, %v5445_v0  ;;  %v509_v41 = vpop.f32.mrb[7].mxu0  ;;  %v891_v42 = vmax.f32 %v624_v34, 0.0  ;;  %v628_v43 = vadd.f32 %v627_v39, %v5445_v0  ;;  %v629_v44 = vpop.f32.mrb[7].mxu1  ;;  %v819_v48 = vmax.f32 %v504_v32, 0.0  ;;  %v4733_v32 = vld [vmem:[#allocation13 + $0x18] sm:$0xff]  }
 0x1a1   :  { %v510_v45 = vadd.f32 %v509_v41, %v5448_v1  ;;  %v892_v46 = vmax.f32 %v626_v38, 0.0  ;;  %v630_v47 = vadd.f32 %v629_v44, %v5448_v1  ;;  %v820_v51 = vmax.f32 %v506_v36, 0.0  ;;  %v4741_v36 = vld [vmem:[#allocation9 + $0x18] sm:$0xff]  }
 0x1a2   :  { %v822_v49 = vmax.f32 %v508_v40, 0.0  ;;  %v894_v50 = vmax.f32 %v628_v43, 0.0 }
 0x1a3   :  { %v823_v52 = vmax.f32 %v510_v45, 0.0  ;;  %v895_v53 = vmax.f32 %v630_v47, 0.0 }
 0x1a4   :  { %v912_v54 = vpack.c.bf16 %v822_v49, %v819_v48  ;;  %v5470_v55 = vpack.c.bf16 %v894_v50, %v891_v42  ;;  %v4734_v50 = vld [vmem:[#allocation13 + $0x20] sm:$0xff]  }
 0x1a5   :  { %v913_v57 = vpack.c.bf16 %v823_v52, %v820_v51  ;;  %v513_v63 = vpop.f32.mrb[8].mxu0  ;;  %v5472_v2 = vpack.c.bf16 %v895_v53, %v892_v46  ;;  %v633_v3 = vpop.f32.mrb[8].mxu1  ;;  %v157_v51 = vld [vmem:[#allocation6 + $0x10] sm:$0xff] }
 0x1a6   :  { %v514_v5 = vadd.f32 %v513_v63, %v5445_v0  ;;  %v515_v6 = vpop.f32.mrb[9].mxu0  ;;  %4363 = vmatmul.mubr.bf16.vlgmr.msra.gmra.mrb[48].mxu1 %v912_v54  ;;  %v634_v7 = vadd.f32 %v633_v3, %v5445_v0  ;;  %v635_v8 = vpop.f32.mrb[9].mxu1 }
 0x1a7   :  { %v516_v9 = vadd.f32 %v515_v6, %v5448_v1  ;;  %v517_v10 = vpop.f32.mrb[10].mxu0  ;;  %4411 = vmatmul.mubr.bf16.vlgmr.msra.gmra.mrb[48].mxu0 %v913_v57  ;;  %v636_v11 = vadd.f32 %v635_v8, %v5448_v1  ;;  %v637_v12 = vpop.f32.mrb[10].mxu1  ;;  %4443 = vmatpush3.bf16.msra.mxu1 %v5430_v58 }
 0x1a8   :  { %v518_v13 = vadd.f32 %v517_v10, %v5445_v0  ;;  %v519_v14 = vpop.f32.mrb[11].mxu0  ;;  %v897_v15 = vmax.f32 %v634_v7, 0.0  ;;  %v638_v16 = vadd.f32 %v637_v12, %v5445_v0  ;;  %v639_v17 = vpop.f32.mrb[11].mxu1  ;;  %4444 = vmatprep.subr.bf16.mxu1 %v4731_v56  ;;  %4491 = vmatpush3.bf16.msra.mxu0 %v5438_v61  ;;  %v825_v23 = vmax.f32 %v514_v5, 0.0  ;;  %v4735_v10 = vld [vmem:[#allocation13 + $0x28] sm:$0xff]  }
 0x1a9   :  { %v520_v19 = vadd.f32 %v519_v14, %v5448_v1  ;;  %v898_v20 = vmax.f32 %v636_v11, 0.0  ;;  %v640_v21 = vadd.f32 %v639_v17, %v5448_v1  ;;  %4492 = vmatprep.subr.bf16.mxu0 %v4739_v4  ;;  %v826_v25 = vmax.f32 %v516_v9, 0.0  ;;  %v4743_v14 = vld [vmem:[#allocation9 + $0x28] sm:$0xff]  }
 0x1aa   :  { %v828_v58 = vmax.f32 %v518_v13, 0.0  ;;  %v900_v24 = vmax.f32 %v638_v16, 0.0  ;;  %v5497_v7 = vrot.slane %v157_v51, %v5436_v60 }
 0x1ab   :  { %v829_v26 = vmax.f32 %v520_v19, 0.0  ;;  %v901_v28 = vmax.f32 %v640_v21, 0.0  ;;  %4445 = vmatpush3.bf16.msra.mxu1 %v4731_v56  ;;  %v4742_v56 = vld [vmem:[#allocation9 + $0x20] sm:$0xff]  }
 0x1ac   :  { %v915_v29 = vpack.c.bf16 %v828_v58, %v825_v23  ;;  %v5484_v31 = vpack.c.bf16 %v900_v24, %v897_v15  ;;  %4446 = vmatprep.subr.bf16.mxu1 %v4732_v18  ;;  %4493 = vmatpush3.bf16.msra.mxu0 %v4739_v4 }
 0x1ad   :  { %v916_v61 = vpack.c.bf16 %v829_v26, %v826_v25  ;;  %v523_v33 = vpop.f32.mrb[12].mxu0  ;;  %v5486_v34 = vpack.c.bf16 %v901_v28, %v898_v20  ;;  %v643_v35 = vpop.f32.mrb[12].mxu1  ;;  %4494 = vmatprep.subr.bf16.mxu0 %v4740_v22  ;;  %v4736_v25 = vld [vmem:[#allocation13 + $0x30] sm:$0xff]  }
 0x1ae   :  { %v524_v37 = vadd.f32 %v523_v33, %v5445_v0  ;;  %v525_v38 = vpop.f32.mrb[13].mxu0  ;;  %4366 = vmatprep.mubr.bf16.mxu1 %v915_v29  ;;  %v644_v39 = vadd.f32 %v643_v35, %v5445_v0  ;;  %v645_v40 = vpop.f32.mrb[13].mxu1 }
 0x1af   :  { %v526_v41 = vadd.f32 %v525_v38, %v5448_v1  ;;  %v527_v42 = vpop.f32.mrb[14].mxu0  ;;  %4414 = vmatprep.mubr.bf16.mxu0 %v916_v61  ;;  %v646_v43 = vadd.f32 %v645_v40, %v5448_v1  ;;  %v647_v44 = vpop.f32.mrb[14].mxu1  ;;  %4447 = vmatpush3.bf16.msra.mxu1 %v4732_v18 }
 0x1b0   :  { %v528_v45 = vadd.f32 %v527_v42, %v5445_v0  ;;  %v529_v46 = vpop.f32.mrb[15].mxu0  ;;  %v903_v47 = vmax.f32 %v644_v39, 0.0  ;;  %v648_v48 = vadd.f32 %v647_v44, %v5445_v0  ;;  %v649_v49 = vpop.f32.mrb[15].mxu1  ;;  %4448 = vmatprep.subr.bf16.mxu1 %v4733_v32  ;;  %4495 = vmatpush3.bf16.msra.mxu0 %v4740_v22  ;;  %v831_v57 = vmax.f32 %v524_v37, 0.0  ;;  %v4737_v42 = vld [vmem:[#allocation13 + $0x38] sm:$0xff]  }
 0x1b1   :  { %v530_v52 = vadd.f32 %v529_v46, %v5448_v1  ;;  %v904_v53 = vmax.f32 %v646_v43, 0.0  ;;  %v650_v54 = vadd.f32 %v649_v49, %v5448_v1  ;;  %4496 = vmatprep.subr.bf16.mxu0 %v4741_v36  ;;  %v832_v4 = vmax.f32 %v526_v41, 0.0 }
 0x1b2   :  { %v834_v63 = vmax.f32 %v528_v45, 0.0  ;;  %v906_v3 = vmax.f32 %v648_v48, 0.0 }
 0x1b3   :  { %v835_v5 = vmax.f32 %v530_v52, 0.0  ;;  %v907_v6 = vmax.f32 %v650_v54, 0.0  ;;  %4449 = vmatpush3.bf16.msra.mxu1 %v4733_v32 }
 0x1b4   :  { %v918_v8 = vpack.c.bf16 %v834_v63, %v831_v57  ;;  %v5499_v9 = vpack.c.bf16 %v906_v3, %v903_v47  ;;  %4450 = vmatprep.subr.bf16.mxu1 %v4734_v50  ;;  %4497 = vmatpush3.bf16.msra.mxu0 %v4741_v36 }
 0x1b5   :  { %v919_v11 = vpack.c.bf16 %v835_v5, %v832_v4  ;;  %v533_v12 = vpop.f32.mrb[16].mxu0  ;;  %v5501_v13 = vpack.c.bf16 %v907_v6, %v904_v53  ;;  %4498 = vmatprep.subr.bf16.mxu0 %v4742_v56 }
 0x1b6   :  { %v534_v15 = vadd.f32 %v533_v12, %v5445_v0  ;;  %v535_v16 = vpop.f32.mrb[17].mxu0  ;;  %4367 = vmatmul.mubr.bf16.gmra.mrb[52].mxu1 %v918_v8  ;;  %v4316_v17 = vpop.f32.mrb[16].mxu1 }
 0x1b7   :  { %v536_v18 = vadd.f32 %v535_v16, %v5448_v1  ;;  %v537_v19 = vpop.f32.mrb[18].mxu0  ;;  %4415 = vmatmul.mubr.bf16.gmra.mrb[52].mxu0 %v919_v11  ;;  %4451 = vmatpush3.bf16.msra.mxu1 %v4734_v50  ;;  %v695_v20 = vadd.f32 %v4316_v17, %v5497_v7  ;;  %v686_v21 = vpop.f32.mrb[17].mxu1 }
 0x1b8   :  { %v538_v22 = vadd.f32 %v537_v19, %v5445_v0  ;;  %v539_v23 = vpop.f32.mrb[19].mxu0  ;;  %4452 = vmatprep.subr.bf16.mxu1 %v4735_v10  ;;  %v687_v58 = vadd.f32 %v686_v21, %v5497_v7  ;;  %v4317_v24 = vpop.f32.mrb[18].mxu1  ;;  %4499 = vmatpush3.bf16.msra.mxu0 %v4742_v56  ;;  %v837_v61 = vmax.f32 %v534_v15, 0.0 }
 0x1b9   :  { %v540_v26 = vadd.f32 %v539_v23, %v5448_v1  ;;  %v821_v28 = vmax.f32 %v695_v20, 0.0  ;;  %v698_v29 = vadd.f32 %v4317_v24, %v5497_v7  ;;  %v689_v32 = vpop.f32.mrb[19].mxu1  ;;  %4500 = vmatprep.subr.bf16.mxu0 %v4743_v14  ;;  %v838_v37 = vmax.f32 %v536_v18, 0.0 }
 0x1ba   :  { %v840_v33 = vmax.f32 %v538_v22, 0.0  ;;  %v815_v35 = vmax.f32 %v687_v58, 0.0  ;;  %v690_v36 = vadd.f32 %v689_v32, %v5497_v7 }
 0x1bb   :  { %v841_v38 = vmax.f32 %v540_v26, 0.0  ;;  %4453 = vmatpush3.bf16.msra.mxu1 %v4735_v10  ;;  %v824_v39 = vmax.f32 %v698_v29, 0.0 }
 0x1bc   :  { %v921_v40 = vpack.c.bf16 %v840_v33, %v837_v61  ;;  %v818_v41 = vmax.f32 %v690_v36, 0.0  ;;  %4454 = vmatprep.subr.bf16.mxu1 %v4736_v25  ;;  %4501 = vmatpush3.bf16.msra.mxu0 %v4743_v14 }
 0x1bd   :  { %v922_v43 = vpack.c.bf16 %v841_v38, %v838_v37  ;;  %v543_v44 = vpop.f32.mrb[20].mxu0  ;;  %v5511_v45 = vpack.c.bf16 %v824_v39, %v821_v28 }
 0x1be   :  { %v544_v46 = vadd.f32 %v543_v44, %v5445_v0  ;;  %v545_v47 = vpop.f32.mrb[21].mxu0  ;;  %4370 = vmatprep.mubr.bf16.mxu1 %v921_v40  ;;  %v5514_v48 = vpack.c.bf16 %v818_v41, %v815_v35  ;;  %v4320_v49 = vpop.f32.mrb[20].mxu1 }
 0x1bf   :  { %v546_v50 = vadd.f32 %v545_v47, %v5448_v1  ;;  %v547_v51 = vpop.f32.mrb[22].mxu0  ;;  %4418 = vmatprep.mubr.bf16.mxu0 %v922_v43  ;;  %4455 = vmatpush3.bf16.msra.mxu1 %v4736_v25  ;;  %v711_v52 = vadd.f32 %v4320_v49, %v5497_v7  ;;  %v702_v53 = vpop.f32.mrb[21].mxu1 }
 0x1c0   :  { %v548_v54 = vadd.f32 %v547_v51, %v5445_v0  ;;  %v549_v56 = vpop.f32.mrb[23].mxu0  ;;  %v703_v57 = vadd.f32 %v702_v53, %v5497_v7  ;;  %v4321_v63 = vpop.f32.mrb[22].mxu1  ;;  %4456 = vmatprep.subr.bf16.mxu1 %v4737_v42  ;;  %v843_v8 = vmax.f32 %v544_v46, 0.0 }
 0x1c1   :  { %v550_v3 = vadd.f32 %v549_v56, %v5448_v1  ;;  %v833_v4 = vmax.f32 %v711_v52, 0.0  ;;  %v714_v5 = vadd.f32 %v4321_v63, %v5497_v7  ;;  %v705_v6 = vpop.f32.mrb[23].mxu1  ;;  %v844_v14 = vmax.f32 %v546_v50, 0.0 }
 0x1c2   :  { %v846_v10 = vmax.f32 %v548_v54, 0.0  ;;  %v827_v11 = vmax.f32 %v703_v57, 0.0  ;;  %v706_v12 = vadd.f32 %v705_v6, %v5497_v7 }
 0x1c3   :  { %v847_v15 = vmax.f32 %v550_v3, 0.0  ;;  %v836_v16 = vmax.f32 %v714_v5, 0.0  ;;  %4457 = vmatpush3.bf16.msra.mxu1 %v4737_v42 }
 0x1c4   :  { %v924_v17 = vpack.c.bf16 %v846_v10, %v843_v8  ;;  %v830_v18 = vmax.f32 %v706_v12, 0.0 }
 0x1c5   :  { %v925_v19 = vpack.c.bf16 %v847_v15, %v844_v14  ;;  %v553_v20 = vpop.f32.mrb[24].mxu0  ;;  %v5523_v21 = vpack.c.bf16 %v836_v16, %v833_v4 }
 0x1c6   :  { %v554_v22 = vadd.f32 %v553_v20, %v5445_v0  ;;  %v555_v23 = vpop.f32.mrb[25].mxu0  ;;  %4371 = vmatmul.mubr.bf16.gmra.mrb[56].mxu1 %v924_v17  ;;  %v5526_v58 = vpack.c.bf16 %v830_v18, %v827_v11  ;;  %v4324_v24 = vpop.f32.mrb[24].mxu1 }
 0x1c7   :  { %v556_v25 = vadd.f32 %v555_v23, %v5448_v1  ;;  %v557_v26 = vpop.f32.mrb[26].mxu0  ;;  %4419 = vmatmul.mubr.bf16.gmra.mrb[56].mxu0 %v925_v19  ;;  %v727_v28 = vadd.f32 %v4324_v24, %v5497_v7  ;;  %v718_v29 = vpop.f32.mrb[25].mxu1 }
 0x1c8   :  { %v558_v32 = vadd.f32 %v557_v26, %v5445_v0  ;;  %v559_v61 = vpop.f32.mrb[27].mxu0  ;;  %v719_v33 = vadd.f32 %v718_v29, %v5497_v7  ;;  %v4325_v35 = vpop.f32.mrb[26].mxu1  ;;  %v849_v40 = vmax.f32 %v554_v22, 0.0 }
 0x1c9   :  { %v560_v36 = vadd.f32 %v559_v61, %v5448_v1  ;;  %v845_v37 = vmax.f32 %v727_v28, 0.0  ;;  %v730_v38 = vadd.f32 %v4325_v35, %v5497_v7  ;;  %v721_v39 = vpop.f32.mrb[27].mxu1  ;;  %v850_v44 = vmax.f32 %v556_v25, 0.0 }
 0x1ca   :  { %v852_v41 = vmax.f32 %v558_v32, 0.0  ;;  %v839_v42 = vmax.f32 %v719_v33, 0.0  ;;  %v722_v43 = vadd.f32 %v721_v39, %v5497_v7 }
 0x1cb   :  { %v853_v46 = vmax.f32 %v560_v36, 0.0  ;;  %v848_v47 = vmax.f32 %v730_v38, 0.0 }
 0x1cc   :  { %v927_v49 = vpack.c.bf16 %v852_v41, %v849_v40  ;;  %v842_v50 = vmax.f32 %v722_v43, 0.0 }
 0x1cd   :  { %v928_v51 = vpack.c.bf16 %v853_v46, %v850_v44  ;;  %v563_v52 = vpop.f32.mrb[28].mxu0  ;;  %v5535_v53 = vpack.c.bf16 %v848_v47, %v845_v37 }
 0x1ce   :  { %v564_v54 = vadd.f32 %v563_v52, %v5445_v0  ;;  %v565_v56 = vpop.f32.mrb[29].mxu0  ;;  %4374 = vmatprep.mubr.bf16.mxu1 %v927_v49  ;;  %v5538_v57 = vpack.c.bf16 %v842_v50, %v839_v42  ;;  %v4328_v63 = vpop.f32.mrb[28].mxu1 }
 0x1cf   :  { %v566_v3 = vadd.f32 %v565_v56, %v5448_v1  ;;  %v567_v4 = vpop.f32.mrb[30].mxu0  ;;  %4422 = vmatprep.mubr.bf16.mxu0 %v928_v51  ;;  %v743_v5 = vadd.f32 %v4328_v63, %v5497_v7  ;;  %v734_v6 = vpop.f32.mrb[29].mxu1 }
 0x1d0   :  { %v568_v8 = vadd.f32 %v567_v4, %v5445_v0  ;;  %v569_v10 = vpop.f32.mrb[31].mxu0  ;;  %v735_v11 = vadd.f32 %v734_v6, %v5497_v7  ;;  %v4329_v12 = vpop.f32.mrb[30].mxu1  ;;  %v855_v18 = vmax.f32 %v564_v54, 0.0 }
 0x1d1   :  { %v570_v14 = vadd.f32 %v569_v10, %v5448_v1  ;;  %v857_v15 = vmax.f32 %v743_v5, 0.0  ;;  %v746_v16 = vadd.f32 %v4329_v12, %v5497_v7  ;;  %v737_v17 = vpop.f32.mrb[31].mxu1  ;;  %v856_v23 = vmax.f32 %v566_v3, 0.0 }
 0x1d2   :  { %v858_v19 = vmax.f32 %v568_v8, 0.0  ;;  %v851_v20 = vmax.f32 %v735_v11, 0.0  ;;  %v738_v22 = vadd.f32 %v737_v17, %v5497_v7 }
 0x1d3   :  { %v859_v24 = vmax.f32 %v570_v14, 0.0  ;;  %v860_v25 = vmax.f32 %v746_v16, 0.0 }
 0x1d4   :  { %v930_v26 = vpack.c.bf16 %v858_v19, %v855_v18  ;;  %v854_v28 = vmax.f32 %v738_v22, 0.0 }
 0x1d5   :  { %v931_v29 = vpack.c.bf16 %v859_v24, %v856_v23  ;;  %v573_v32 = vpop.f32.mrb[32].mxu0  ;;  %v5547_v61 = vpack.c.bf16 %v860_v25, %v857_v15 }
 0x1d6   :  { %v574_v33 = vadd.f32 %v573_v32, %v5445_v0  ;;  %v575_v35 = vpop.f32.mrb[33].mxu0  ;;  %4375 = vmatmul.mubr.bf16.gmra.mrb[60].mxu1 %v930_v26  ;;  %v5550_v36 = vpack.c.bf16 %v854_v28, %v851_v20  ;;  %v4332_v37 = vpop.f32.mrb[32].mxu1 }
 0x1d7   :  { %v576_v38 = vadd.f32 %v575_v35, %v5448_v1  ;;  %v577_v39 = vpop.f32.mrb[34].mxu0  ;;  %4423 = vmatmul.mubr.bf16.gmra.mrb[60].mxu0 %v931_v29  ;;  %v759_v40 = vadd.f32 %v4332_v37, %v5497_v7  ;;  %v750_v41 = vpop.f32.mrb[33].mxu1 }
 0x1d8   :  { %v578_v42 = vadd.f32 %v577_v39, %v5445_v0  ;;  %v579_v43 = vpop.f32.mrb[35].mxu0  ;;  %v751_v44 = vadd.f32 %v750_v41, %v5497_v7  ;;  %v4333_v46 = vpop.f32.mrb[34].mxu1  ;;  %v861_v52 = vmax.f32 %v574_v33, 0.0 }
 0x1d9   :  { %v580_v47 = vadd.f32 %v579_v43, %v5448_v1  ;;  %v869_v49 = vmax.f32 %v759_v40, 0.0  ;;  %v762_v50 = vadd.f32 %v4333_v46, %v5497_v7  ;;  %v753_v51 = vpop.f32.mrb[35].mxu1  ;;  %v862_v3 = vmax.f32 %v576_v38, 0.0 }
 0x1da   :  { %v864_v54 = vmax.f32 %v578_v42, 0.0  ;;  %v863_v56 = vmax.f32 %v751_v44, 0.0  ;;  %v754_v63 = vadd.f32 %v753_v51, %v5497_v7 }
 0x1db   :  { %v865_v4 = vmax.f32 %v580_v47, 0.0  ;;  %v872_v5 = vmax.f32 %v762_v50, 0.0 }
 0x1dc   :  { %v933_v6 = vpack.c.bf16 %v864_v54, %v861_v52  ;;  %v866_v8 = vmax.f32 %v754_v63, 0.0 }
 0x1dd   :  { %v934_v10 = vpack.c.bf16 %v865_v4, %v862_v3  ;;  %v583_v11 = vpop.f32.mrb[36].mxu0  ;;  %v5559_v12 = vpack.c.bf16 %v872_v5, %v869_v49 }
 0x1de   :  { %v584_v14 = vadd.f32 %v583_v11, %v5445_v0  ;;  %v585_v15 = vpop.f32.mrb[37].mxu0  ;;  %4378 = vmatprep.mubr.bf16.mxu1 %v933_v6  ;;  %v5562_v16 = vpack.c.bf16 %v866_v8, %v863_v56  ;;  %v4336_v17 = vpop.f32.mrb[36].mxu1 }
 0x1df   :  { %v586_v18 = vadd.f32 %v585_v15, %v5448_v1  ;;  %v587_v19 = vpop.f32.mrb[38].mxu0  ;;  %4426 = vmatprep.mubr.bf16.mxu0 %v934_v10  ;;  %v775_v20 = vadd.f32 %v4336_v17, %v5497_v7  ;;  %v766_v22 = vpop.f32.mrb[37].mxu1 }
 0x1e0   :  { %v588_v23 = vadd.f32 %v587_v19, %v5445_v0  ;;  %v589_v24 = vpop.f32.mrb[39].mxu0  ;;  %v767_v25 = vadd.f32 %v766_v22, %v5497_v7  ;;  %v4337_v26 = vpop.f32.mrb[38].mxu1  ;;  %v867_v35 = vmax.f32 %v584_v14, 0.0 }
 0x1e1   :  { %v590_v28 = vadd.f32 %v589_v24, %v5448_v1  ;;  %v881_v29 = vmax.f32 %v775_v20, 0.0  ;;  %v778_v32 = vadd.f32 %v4337_v26, %v5497_v7  ;;  %v769_v33 = vpop.f32.mrb[39].mxu1  ;;  %v868_v40 = vmax.f32 %v586_v18, 0.0 }
 0x1e2   :  { %v870_v37 = vmax.f32 %v588_v23, 0.0  ;;  %v875_v38 = vmax.f32 %v767_v25, 0.0  ;;  %v770_v39 = vadd.f32 %v769_v33, %v5497_v7 }
 0x1e3   :  { %v871_v41 = vmax.f32 %v590_v28, 0.0  ;;  %v884_v42 = vmax.f32 %v778_v32, 0.0 }
 0x1e4   :  { %v936_v43 = vpack.c.bf16 %v870_v37, %v867_v35  ;;  %v878_v44 = vmax.f32 %v770_v39, 0.0 }
 0x1e5   :  { %v937_v46 = vpack.c.bf16 %v871_v41, %v868_v40  ;;  %v593_v47 = vpop.f32.mrb[40].mxu0  ;;  %v5571_v49 = vpack.c.bf16 %v884_v42, %v881_v29 }
 0x1e6   :  { %v594_v50 = vadd.f32 %v593_v47, %v5445_v0  ;;  %v595_v51 = vpop.f32.mrb[41].mxu0  ;;  %4379 = vmatmul.mubr.bf16.gmra.mrb[64].mxu1 %v936_v43  ;;  %v5574_v52 = vpack.c.bf16 %v878_v44, %v875_v38  ;;  %v4340_v54 = vpop.f32.mrb[40].mxu1 }
 0x1e7   :  { %v596_v56 = vadd.f32 %v595_v51, %v5448_v1  ;;  %v597_v63 = vpop.f32.mrb[42].mxu0  ;;  %4427 = vmatmul.mubr.bf16.gmra.mrb[64].mxu0 %v937_v46  ;;  %v791_v3 = vadd.f32 %v4340_v54, %v5497_v7  ;;  %v782_v4 = vpop.f32.mrb[41].mxu1 }
 0x1e8   :  { %v598_v5 = vadd.f32 %v597_v63, %v5445_v0  ;;  %v599_v6 = vpop.f32.mrb[43].mxu0  ;;  %v783_v8 = vadd.f32 %v782_v4, %v5497_v7  ;;  %v4341_v10 = vpop.f32.mrb[42].mxu1  ;;  %v873_v18 = vmax.f32 %v594_v50, 0.0 }
 0x1e9   :  { %v600_v11 = vadd.f32 %v599_v6, %v5448_v1  ;;  %v893_v14 = vmax.f32 %v791_v3, 0.0  ;;  %v794_v15 = vadd.f32 %v4341_v10, %v5497_v7  ;;  %v785_v17 = vpop.f32.mrb[43].mxu1  ;;  %v874_v23 = vmax.f32 %v596_v56, 0.0 }
 0x1ea   :  { %v876_v19 = vmax.f32 %v598_v5, 0.0  ;;  %v887_v20 = vmax.f32 %v783_v8, 0.0  ;;  %v786_v22 = vadd.f32 %v785_v17, %v5497_v7 }
 0x1eb   :  { %v877_v24 = vmax.f32 %v600_v11, 0.0  ;;  %v896_v25 = vmax.f32 %v794_v15, 0.0 }
 0x1ec   :  { %v939_v26 = vpack.c.bf16 %v876_v19, %v873_v18  ;;  %v890_v28 = vmax.f32 %v786_v22, 0.0  ;;  %v4744_v18 = vld [vmem:[#allocation9 + $0x30] sm:$0xff]   ;;  %v4745_v19 = vld [vmem:[#allocation9 + $0x38] sm:$0xff]  }
 0x1ed   :  { %v940_v29 = vpack.c.bf16 %v877_v24, %v874_v23  ;;  %v603_v32 = vpop.f32.mrb[44].mxu0  ;;  %v950_v33 = vpack.c.bf16 %v896_v25, %v893_v14  ;;  %4502 = vmatprep.subr.bf16.mxu0 %v4744_v18 }
 0x1ee   :  { %v604_v35 = vadd.f32 %v603_v32, %v5445_v0  ;;  %v605_v37 = vpop.f32.mrb[45].mxu0  ;;  %4382 = vmatprep.mubr.bf16.mxu1 %v939_v26  ;;  %v947_v38 = vpack.c.bf16 %v890_v28, %v887_v20  ;;  %v4344_v41 = vpop.f32.mrb[44].mxu1  ;;  %4503 = vmatpush3.bf16.msra.mxu0 %v4744_v18  ;;  %v4972_v28 = vld [vmem:[#allocation2 + $0x18] sm:$0xff]  }
 0x1ef   :  { %v606_v39 = vadd.f32 %v605_v37, %v5448_v1  ;;  %v607_v40 = vpop.f32.mrb[46].mxu0  ;;  %4430 = vmatprep.mubr.bf16.mxu0 %v940_v29  ;;  %v807_v44 = vadd.f32 %v4344_v41, %v5497_v7  ;;  %v798_v46 = vpop.f32.mrb[45].mxu1  ;;  %4504 = vmatprep.subr.bf16.mxu0 %v4745_v19  ;;  %v1650_v29 = vunpack.c.l.bf16 %v4972_v28 }
 0x1f0   :  { %v608_v42 = vadd.f32 %v607_v40, %v5445_v0  ;;  %v609_v43 = vpop.f32.mrb[47].mxu0  ;;  %v799_v50 = vadd.f32 %v798_v46, %v5497_v7  ;;  %v4345_v51 = vpop.f32.mrb[46].mxu1  ;;  %v879_v54 = vmax.f32 %v604_v35, 0.0  ;;  %v1651_v35 = vunpack.c.h.bf16 %v4972_v28 }
 0x1f1   :  { %v610_v47 = vadd.f32 %v609_v43, %v5448_v1  ;;  %v905_v63 = vmax.f32 %v807_v44, 0.0  ;;  %v810_v3 = vadd.f32 %v4345_v51, %v5497_v7  ;;  %v801_v4 = vpop.f32.mrb[47].mxu1  ;;  %v880_v5 = vmax.f32 %v606_v39, 0.0 }
 0x1f2   :  { %v882_v56 = vmax.f32 %v608_v42, 0.0  ;;  %v899_v8 = vmax.f32 %v799_v50, 0.0  ;;  %v802_v0 = vadd.f32 %v801_v4, %v5497_v7  ;;  %4505 = vmatpush3.bf16.msra.mxu0 %v4745_v19 }
 0x1f3   :  { %v883_v6 = vmax.f32 %v610_v47, 0.0  ;;  %v908_v11 = vmax.f32 %v810_v3, 0.0 }
 0x1f4   :  { %v942_v10 = vpack.c.bf16 %v882_v56, %v879_v54  ;;  %v902_v15 = vmax.f32 %v802_v0, 0.0 }
 0x1f5   :  { %v943_v14 = vpack.c.bf16 %v883_v6, %v880_v5  ;;  %v956_v1 = vpack.c.bf16 %v908_v11, %v905_v63 }
 0x1f6   :  { %4383 = vmatmul.mubr.bf16.gmra.mrb[68].mxu1 %v942_v10  ;;  %v953_v17 = vpack.c.bf16 %v902_v15, %v899_v8  ;;  %v4974_v8 = vld [vmem:[#allocation2 + $0x28] sm:$0xff]  }
 0x1f7   :  { %4386 = vmatprep.mubr.bf16.mxu1 %v5458_v27  ;;  %4431 = vmatmul.mubr.bf16.gmra.mrb[68].mxu0 %v943_v14  ;;  %v7212_v27 = vsub.s32 1, %v5433_v59  ;;  %v1654_v0 = vunpack.c.l.bf16 %v4974_v8  ;;  %v1655_v14 = vunpack.c.h.bf16 %v4974_v8 }
 0x1f8   :  { %4434 = vmatprep.mubr.bf16.mxu0 %v5460_v30 }
 0x1f9   :  { %v5615_v30 = vrot.slane %v5440_v62, %v7212_v27 }
 0x1fe   :  { %4387 = vmatmul.mubr.bf16.gmra.mrb[72].mxu1 %v5470_v55 }
 0x1ff   :  { %4390 = vmatprep.mubr.bf16.mxu1 %v5484_v31  ;;  %4435 = vmatmul.mubr.bf16.gmra.mrb[72].mxu0 %v5472_v2  ;;  %v4970_v31 = vld [vmem:[#allocation2 + $0x8] sm:$0xff]  }
 0x200   :  { %4438 = vmatprep.mubr.bf16.mxu0 %v5486_v34  ;;  %v1646_v34 = vunpack.c.l.bf16 %v4970_v31 }
 0x206   :  { %4391 = vmatmul.mubr.bf16.gmra.mrb[76].mxu1 %v5499_v9 }
 0x207   :  { %4439 = vmatmul.mubr.bf16.gmra.mrb[76].mxu0 %v5501_v13  ;;  %4458 = vmatprep.mubr.bf16.mxu1 %v5514_v48  ;;  %v1647_v13 = vunpack.c.h.bf16 %v4970_v31  ;;  %v4971_v48 = vld [vmem:[#allocation2] sm:$0xff]  }
 0x20e   :  { %4459 = vmatmul.mubr.bf16.vlgmr.msra.gmra.mrb[80].mxu1 %v5511_v45 }
 0x20f   :  { %4462 = vmatprep.mubr.bf16.mxu1 %v5526_v58 }
 0x216   :  { %4463 = vmatmul.mubr.bf16.gmra.mrb[84].mxu1 %v5523_v21  ;;  %v1644_v21 = vunpack.c.l.bf16 %v4971_v48 }
 0x217   :  { %4466 = vmatprep.mubr.bf16.mxu1 %v5538_v57  ;;  %v1645_v57 = vunpack.c.h.bf16 %v4971_v48 }
 0x21e   :  { %4467 = vmatmul.mubr.bf16.gmra.mrb[88].mxu1 %v5535_v53 }
 0x21f   :  { %4470 = vmatprep.mubr.bf16.mxu1 %v5550_v36 }
 0x226   :  { %4471 = vmatmul.mubr.bf16.gmra.mrb[92].mxu1 %v5547_v61 }
 0x227   :  { %4474 = vmatprep.mubr.bf16.mxu1 %v5562_v16 }
 0x22e   :  { %4475 = vmatmul.mubr.bf16.gmra.mrb[96].mxu1 %v5559_v12 }
 0x22f   :  { %4478 = vmatprep.mubr.bf16.mxu1 %v5574_v52 }
 0x236   :  { %4479 = vmatmul.mubr.bf16.gmra.mrb[100].mxu1 %v5571_v49 }
 0x237   :  { %4482 = vmatprep.mubr.bf16.mxu1 %v947_v38  ;;  %v4973_v38 = vld [vmem:[#allocation2 + $0x10] sm:$0xff]  }
 0x238   :  { %v1648_v39 = vunpack.c.l.bf16 %v4973_v38  ;;  %v1649_v42 = vunpack.c.h.bf16 %v4973_v38 }
 0x23e   :  { %4483 = vmatmul.mubr.bf16.gmra.mrb[104].mxu1 %v950_v33 }
 0x23f   :  { %4486 = vmatprep.mubr.bf16.mxu1 %v953_v17 }
 0x246   :  { %4487 = vmatmul.mubr.bf16.gmra.mrb[108].mxu1 %v956_v1  ;;  %v4975_v1 = vld [vmem:[#allocation2 + $0x20] sm:$0xff]  }
 0x247   :  { %v1652_v17 = vunpack.c.l.bf16 %v4975_v1 }
 0x279   :  { %v4364_v55 = vpop.f32.mrb[48].mxu1 }
 0x27a   :  { %v1068_v2 = vadd.f32 %v4364_v55, %v5615_v30  ;;  %v1059_v7 = vpop.f32.mrb[49].mxu1  ;;  %v5618_v9 = vpop.f32.mrb[48].mxu0  ;;  %v1653_v55 = vunpack.c.h.bf16 %v4975_v1 }
 0x27b   :  { %v1060_v45 = vadd.f32 %v1059_v7, %v5615_v30  ;;  %v4365_v58 = vpop.f32.mrb[50].mxu1  ;;  %v5621_v53 = vpop.f32.mrb[49].mxu0 }
 0x27c   :  { %v1071_v62 = vadd.f32 %v4365_v58, %v5615_v30  ;;  %v1062_v61 = vpop.f32.mrb[51].mxu1  ;;  %v5624_v36 = vpop.f32.mrb[50].mxu0  ;;  %v1694_v49 = vmul.f32 %v1646_v34, %v1068_v2 }
 0x27d   :  { %v1063_v12 = vadd.f32 %v1062_v61, %v5615_v30  ;;  %v5627_v16 = vpop.f32.mrb[51].mxu0  ;;  %v1692_v20 = vmul.f32 %v1644_v21, %v1060_v45 }
 0x27e   :  { %v1695_v52 = vmul.f32 %v1647_v13, %v1071_v62 }
 0x27f   :  { %v1693_v22 = vmul.f32 %v1645_v57, %v1063_v12 }
 0x280   :  { %v1725_v23 = vpack.c.bf16 %v1695_v52, %v1694_v49  ;;  %v4976_v49 = vld [vmem:[#allocation2 + $0x38] sm:$0xff]  }
 0x281   :  { %v1724_v24 = vpack.c.bf16 %v1693_v22, %v1692_v20  ;;  %v1658_v52 = vunpack.c.l.bf16 %v4976_v49 }
 0x283   :  { %4506 = vmatprep.mubr.bf16.mxu0 %v1724_v24 }
 0x284   :  { %4507 = vmatmul.mubr.bf16.vlgmr.msra.gmra.mrb[80].mxu0 %v1725_v23  ;;  %v1659_v23 = vunpack.c.h.bf16 %v4976_v49  ;;  %v4980_v49 = vld [vmem:[#allocation2 + $0x58] sm:$0xff]  }
 0x289   :  { %v4368_v25 = vpop.f32.mrb[52].mxu1 }
 0x28a   :  { %v1084_v26 = vadd.f32 %v4368_v25, %v5615_v30  ;;  %v1075_v32 = vpop.f32.mrb[53].mxu1  ;;  %v5630_v33 = vpop.f32.mrb[52].mxu0  ;;  %v4977_v25 = vld [vmem:[#allocation2 + $0x30] sm:$0xff]  }
 0x28b   :  { %v1076_v37 = vadd.f32 %v1075_v32, %v5615_v30  ;;  %v4369_v40 = vpop.f32.mrb[54].mxu1  ;;  %v5633_v41 = vpop.f32.mrb[53].mxu0  ;;  %v1657_v32 = vunpack.c.h.bf16 %v4977_v25 }
 0x28c   :  { %v1087_v43 = vadd.f32 %v4369_v40, %v5615_v30  ;;  %v1078_v44 = vpop.f32.mrb[55].mxu1  ;;  %v5636_v46 = vpop.f32.mrb[54].mxu0  ;;  %v1698_v51 = vmul.f32 %v1650_v29, %v1084_v26  ;;  %v1656_v26 = vunpack.c.l.bf16 %v4977_v25 }
 0x28d   :  { %v1079_v47 = vadd.f32 %v1078_v44, %v5615_v30  ;;  %v5639_v50 = vpop.f32.mrb[55].mxu0  ;;  %v1696_v56 = vmul.f32 %v1648_v39, %v1076_v37 }
 0x28e   :  { %v1699_v54 = vmul.f32 %v1651_v35, %v1087_v43 }
 0x28f   :  { %v1697_v63 = vmul.f32 %v1649_v42, %v1079_v47 }
 0x290   :  { %v1727_v3 = vpack.c.bf16 %v1699_v54, %v1698_v51 }
 0x291   :  { %v1726_v4 = vpack.c.bf16 %v1697_v63, %v1696_v56 }
 0x293   :  { %4510 = vmatprep.mubr.bf16.mxu0 %v1726_v4 }
 0x294   :  { %4511 = vmatmul.mubr.bf16.gmra.mrb[84].mxu0 %v1727_v3  ;;  %v4978_v3 = vld [vmem:[#allocation2 + $0x48] sm:$0xff]  }
 0x295   :  { %v1662_v4 = vunpack.c.l.bf16 %v4978_v3  ;;  %v1663_v8 = vunpack.c.h.bf16 %v4978_v3 }
 0x299   :  { %v4372_v5 = vpop.f32.mrb[56].mxu1 }
 0x29a   :  { %v1100_v6 = vadd.f32 %v4372_v5, %v5615_v30  ;;  %v1091_v10 = vpop.f32.mrb[57].mxu1  ;;  %v5642_v11 = vpop.f32.mrb[56].mxu0 }
 0x29b   :  { %v1092_v15 = vadd.f32 %v1091_v10, %v5615_v30  ;;  %v4373_v18 = vpop.f32.mrb[58].mxu1  ;;  %v5645_v19 = vpop.f32.mrb[57].mxu0  ;;  %v4979_v10 = vld [vmem:[#allocation2 + $0x40] sm:$0xff]  }
 0x29c   :  { %v1103_v2 = vadd.f32 %v4373_v18, %v5615_v30  ;;  %v1094_v31 = vpop.f32.mrb[59].mxu1  ;;  %v5648_v34 = vpop.f32.mrb[58].mxu0  ;;  %v1702_v45 = vmul.f32 %v1654_v0, %v1100_v6 }
 0x29d   :  { %v1095_v7 = vadd.f32 %v1094_v31, %v5615_v30  ;;  %v5651_v13 = vpop.f32.mrb[59].mxu0  ;;  %v1700_v21 = vmul.f32 %v1652_v17, %v1092_v15  ;;  %v1661_v17 = vunpack.c.h.bf16 %v4979_v10 }
 0x29e   :  { %v1703_v48 = vmul.f32 %v1655_v14, %v1103_v2  ;;  %v1660_v14 = vunpack.c.l.bf16 %v4979_v10 }
 0x29f   :  { %v1701_v58 = vmul.f32 %v1653_v55, %v1095_v7 }
 0x2a0   :  { %v1729_v57 = vpack.c.bf16 %v1703_v48, %v1702_v45 }
 0x2a1   :  { %v1728_v62 = vpack.c.bf16 %v1701_v58, %v1700_v21 }
 0x2a3   :  { %4514 = vmatprep.mubr.bf16.mxu0 %v1728_v62 }
 0x2a4   :  { %4515 = vmatmul.mubr.bf16.gmra.mrb[88].mxu0 %v1729_v57 }
 0x2a9   :  { %v4376_v61 = vpop.f32.mrb[60].mxu1 }
 0x2aa   :  { %v1116_v12 = vadd.f32 %v4376_v61, %v5615_v30  ;;  %v1107_v20 = vpop.f32.mrb[61].mxu1  ;;  %v5654_v22 = vpop.f32.mrb[60].mxu0 }
 0x2ab   :  { %v1108_v24 = vadd.f32 %v1107_v20, %v5615_v30  ;;  %v4377_v28 = vpop.f32.mrb[62].mxu1  ;;  %v5657_v29 = vpop.f32.mrb[61].mxu0 }
 0x2ac   :  { %v1119_v35 = vadd.f32 %v4377_v28, %v5615_v30  ;;  %v1110_v37 = vpop.f32.mrb[63].mxu1  ;;  %v5660_v38 = vpop.f32.mrb[62].mxu0  ;;  %v1706_v42 = vmul.f32 %v1658_v52, %v1116_v12  ;;  %v1666_v52 = vunpack.c.l.bf16 %v4980_v49 }
 0x2ad   :  { %v1111_v39 = vadd.f32 %v1110_v37, %v5615_v30  ;;  %v5663_v40 = vpop.f32.mrb[63].mxu0  ;;  %v1704_v44 = vmul.f32 %v1656_v26, %v1108_v24  ;;  %v1667_v24 = vunpack.c.h.bf16 %v4980_v49  ;;  %v4981_v26 = vld [vmem:[#allocation2 + $0x50] sm:$0xff]  }
 0x2ae   :  { %v1707_v43 = vmul.f32 %v1659_v23, %v1119_v35  ;;  %v1664_v28 = vunpack.c.l.bf16 %v4981_v26  ;;  %v1665_v37 = vunpack.c.h.bf16 %v4981_v26 }
 0x2af   :  { %v1705_v47 = vmul.f32 %v1657_v32, %v1111_v39 }
 0x2b0   :  { %v1731_v51 = vpack.c.bf16 %v1707_v43, %v1706_v42 }
 0x2b1   :  { %v1730_v54 = vpack.c.bf16 %v1705_v47, %v1704_v44 }
 0x2b3   :  { %4518 = vmatprep.mubr.bf16.mxu0 %v1730_v54 }
 0x2b4   :  { %4519 = vmatmul.mubr.bf16.gmra.mrb[92].mxu0 %v1731_v51 }
 0x2b9   :  { %v4380_v56 = vpop.f32.mrb[64].mxu1 }
 0x2ba   :  { %v1132_v63 = vadd.f32 %v4380_v56, %v5615_v30  ;;  %v1123_v5 = vpop.f32.mrb[65].mxu1  ;;  %v5666_v6 = vpop.f32.mrb[64].mxu0 }
 0x2bb   :  { %7228 = vst [vmem:[#allocation23_spill] sm:$0xff] %v5666_v6  ;;  %v1124_v0 = vadd.f32 %v1123_v5, %v5615_v30  ;;  %v4381_v15 = vpop.f32.mrb[66].mxu1  ;;  %v5669_v1 = vpop.f32.mrb[65].mxu0 }
 0x2bc   :  { %v1135_v18 = vadd.f32 %v4381_v15, %v5615_v30  ;;  %v1126_v55 = vpop.f32.mrb[67].mxu1  ;;  %v5672_v2 = vpop.f32.mrb[66].mxu0  ;;  %v1710_v45 = vmul.f32 %v1662_v4, %v1132_v63 }
 0x2bd   :  { %7229 = vst [vmem:[#allocation24_spill] sm:$0xff] %v5672_v2  ;;  %v1127_v31 = vadd.f32 %v1126_v55, %v5615_v30  ;;  %v5675_v7 = vpop.f32.mrb[67].mxu0  ;;  %v1708_v21 = vmul.f32 %v1660_v14, %v1124_v0  ;;  %v4982_v0 = vld [vmem:[#allocation2 + $0x68] sm:$0xff]   ;;  %v4983_v55 = vld [vmem:[#allocation2 + $0x60] sm:$0xff]  }
 0x2be   :  { %7230 = vst [vmem:[#allocation25_spill] sm:$0xff] %v5675_v7  ;;  %v1711_v48 = vmul.f32 %v1663_v8, %v1135_v18  ;;  %v1670_v10 = vunpack.c.l.bf16 %v4982_v0 }
 0x2bf   :  { %v1709_v58 = vmul.f32 %v1661_v17, %v1127_v31  ;;  %v1671_v17 = vunpack.c.h.bf16 %v4982_v0  ;;  %v1668_v31 = vunpack.c.l.bf16 %v4983_v55 }
 0x2c0   :  { %v1733_v57 = vpack.c.bf16 %v1711_v48, %v1710_v45 }
 0x2c1   :  { %v1732_v62 = vpack.c.bf16 %v1709_v58, %v1708_v21  ;;  %v1669_v21 = vunpack.c.h.bf16 %v4983_v55 }
 0x2c3   :  { %4522 = vmatprep.mubr.bf16.mxu0 %v1732_v62 }
 0x2c4   :  { %4523 = vmatmul.mubr.bf16.gmra.mrb[96].mxu0 %v1733_v57 }
 0x2c9   :  { %v4384_v61 = vpop.f32.mrb[68].mxu1 }
 0x2ca   :  { %v1148_v12 = vadd.f32 %v4384_v61, %v5615_v30  ;;  %v1139_v20 = vpop.f32.mrb[69].mxu1  ;;  %v5678_v23 = vpop.f32.mrb[68].mxu0 }
 0x2cb   :  { %7231 = vst [vmem:[#allocation26_spill] sm:$0xff] %v5678_v23  ;;  %v1140_v25 = vadd.f32 %v1139_v20, %v5615_v30  ;;  %v4385_v32 = vpop.f32.mrb[70].mxu1  ;;  %v5681_v35 = vpop.f32.mrb[69].mxu0 }
 0x2cc   :  { %7232 = vst [vmem:[#allocation27_spill] sm:$0xff] %v5681_v35  ;;  %v1151_v39 = vadd.f32 %v4385_v32, %v5615_v30  ;;  %v1142_v42 = vpop.f32.mrb[71].mxu1  ;;  %v5684_v43 = vpop.f32.mrb[70].mxu0  ;;  %v1714_v51 = vmul.f32 %v1666_v52, %v1148_v12 }
 0x2cd   :  { %7233 = vst [vmem:[#allocation28_spill] sm:$0xff] %v5684_v43  ;;  %v1143_v44 = vadd.f32 %v1142_v42, %v5615_v30  ;;  %v5687_v47 = vpop.f32.mrb[71].mxu0  ;;  %v1712_v56 = vmul.f32 %v1664_v28, %v1140_v25 }
 0x2ce   :  { %7234 = vst [vmem:[#allocation29_spill] sm:$0xff] %v5687_v47  ;;  %v1715_v54 = vmul.f32 %v1667_v24, %v1151_v39 }
 0x2cf   :  { %v1713_v63 = vmul.f32 %v1665_v37, %v1143_v44  ;;  %v4984_v37 = vld [vmem:[#allocation2 + $0x78] sm:$0xff]  }
 0x2d0   :  { %v1735_v3 = vpack.c.bf16 %v1715_v54, %v1714_v51  ;;  %v1674_v39 = vunpack.c.l.bf16 %v4984_v37  ;;  %v1675_v51 = vunpack.c.h.bf16 %v4984_v37 }
 0x2d1   :  { %v4388_v4 = vpop.f32.mrb[72].mxu1  ;;  %v1734_v5 = vpack.c.bf16 %v1713_v63, %v1712_v56  ;;  %v4985_v56 = vld [vmem:[#allocation2 + $0x70] sm:$0xff]  }
 0x2d2   :  { %v1164_v8 = vadd.f32 %v4388_v4, %v5615_v30  ;;  %v1155_v14 = vpop.f32.mrb[73].mxu1  ;;  %v5690_v15 = vpop.f32.mrb[72].mxu0  ;;  %v1672_v63 = vunpack.c.l.bf16 %v4985_v56 }
 0x2d3   :  { %7235 = vst [vmem:[#allocation30_spill] sm:$0xff] %v5690_v15  ;;  %v1156_v18 = vadd.f32 %v1155_v14, %v5615_v30  ;;  %v4389_v45 = vpop.f32.mrb[74].mxu1  ;;  %v5693_v48 = vpop.f32.mrb[73].mxu0  ;;  %4526 = vmatprep.mubr.bf16.mxu0 %v1734_v5  ;;  %v1673_v5 = vunpack.c.h.bf16 %v4985_v56 }
 0x2d4   :  { %7236 = vst [vmem:[#allocation31_spill] sm:$0xff] %v5693_v48  ;;  %v1167_v58 = vadd.f32 %v4389_v45, %v5615_v30  ;;  %v1158_v57 = vpop.f32.mrb[75].mxu1  ;;  %v5696_v62 = vpop.f32.mrb[74].mxu0  ;;  %4527 = vmatmul.mubr.bf16.gmra.mrb[100].mxu0 %v1735_v3  ;;  %v1718_v49 = vmul.f32 %v1670_v10, %v1164_v8 }
 0x2d5   :  { %7237 = vst [vmem:[#allocation32_spill] sm:$0xff] %v5696_v62  ;;  %v1159_v61 = vadd.f32 %v1158_v57, %v5615_v30  ;;  %v5699_v12 = vpop.f32.mrb[75].mxu0  ;;  %v1716_v20 = vmul.f32 %v1668_v31, %v1156_v18 }
 0x2d6   :  { %7238 = vst [vmem:[#allocation33_spill] sm:$0xff] %v5699_v12  ;;  %v1719_v52 = vmul.f32 %v1671_v17, %v1167_v58 }
 0x2d7   :  { %v1717_v24 = vmul.f32 %v1669_v21, %v1159_v61 }
 0x2d8   :  { %v1737_v25 = vpack.c.bf16 %v1719_v52, %v1718_v49 }
 0x2d9   :  { %v4392_v26 = vpop.f32.mrb[76].mxu1  ;;  %v1736_v28 = vpack.c.bf16 %v1717_v24, %v1716_v20 }
 0x2da   :  { %v1180_v32 = vadd.f32 %v4392_v26, %v5615_v30  ;;  %v1171_v42 = vpop.f32.mrb[77].mxu1  ;;  %v5702_v44 = vpop.f32.mrb[76].mxu0 }
 0x2db   :  { %7239 = vst [vmem:[#allocation34_spill] sm:$0xff] %v5702_v44  ;;  %v1172_v54 = vadd.f32 %v1171_v42, %v5615_v30  ;;  %v4393_v3 = vpop.f32.mrb[78].mxu1  ;;  %v5705_v4 = vpop.f32.mrb[77].mxu0  ;;  %4530 = vmatprep.mubr.bf16.mxu0 %v1736_v28 }
 0x2dc   :  { %7240 = vst [vmem:[#allocation35_spill] sm:$0xff] %v5705_v4  ;;  %v1183_v8 = vadd.f32 %v4393_v3, %v5615_v30  ;;  %v1174_v0 = vpop.f32.mrb[79].mxu1  ;;  %v5708_v10 = vpop.f32.mrb[78].mxu0  ;;  %4531 = vmatmul.mubr.bf16.gmra.mrb[104].mxu0 %v1737_v25  ;;  %v1722_v18 = vmul.f32 %v1674_v39, %v1180_v32 }
 0x2dd   :  { %7241 = vst [vmem:[#allocation36_spill] sm:$0xff] %v5708_v10  ;;  %v1175_v14 = vadd.f32 %v1174_v0, %v5615_v30  ;;  %v5711_v17 = vpop.f32.mrb[79].mxu0  ;;  %v1720_v31 = vmul.f32 %v1672_v63, %v1172_v54  ;;  %v1433_v54 = vsub.s32 7, %v5433_v59  ;;  %v5746_v63 = vld [vmem:[#allocation6] sm:$0xff] }
 0x2de   :  { %7242 = vst [vmem:[#allocation37_spill] sm:$0xff] %v5711_v17  ;;  %v1723_v55 = vmul.f32 %v1675_v51, %v1183_v8 }
 0x2df   :  { %v1721_v45 = vmul.f32 %v1673_v5, %v1175_v14  ;;  %v5749_v3 = vrot.slane %v5746_v63, %v1433_v54 }
 0x2e0   :  { %v1739_v21 = vpack.c.bf16 %v1723_v55, %v1722_v18 }
 0x2e1   :  { %v1738_v58 = vpack.c.bf16 %v1721_v45, %v1720_v31  ;;  %v5713_v57 = vpop.f32.mrb[80].mxu1  ;;  %7259 = vst [vmem:[#allocation54_spill] sm:$0xff] %v5749_v3 }
 0x2e2   :  { %7243 = vst [vmem:[#allocation38_spill] sm:$0xff] %v5713_v57  ;;  %v5715_v61 = vpop.f32.mrb[81].mxu1 }
 0x2e3   :  { %7244 = vst [vmem:[#allocation39_spill] sm:$0xff] %v5715_v61  ;;  %4534 = vmatprep.mubr.bf16.mxu0 %v1738_v58  ;;  %v5717_v49 = vpop.f32.mrb[82].mxu1 }
 0x2e4   :  { %7245 = vst [vmem:[#allocation40_spill] sm:$0xff] %v5717_v49  ;;  %4535 = vmatmul.mubr.bf16.gmra.mrb[108].mxu0 %v1739_v21  ;;  %v5719_v52 = vpop.f32.mrb[83].mxu1 }
 0x2e5   :  { %7246 = vst [vmem:[#allocation41_spill] sm:$0xff] %v5719_v52 }
 0x2e9   :  { %v5721_v20 = vpop.f32.mrb[84].mxu1 }
 0x2ea   :  { %7247 = vst [vmem:[#allocation42_spill] sm:$0xff] %v5721_v20  ;;  %v5723_v30 = vpop.f32.mrb[85].mxu1 }
 0x2eb   :  { %7248 = vst [vmem:[#allocation43_spill] sm:$0xff] %v5723_v30  ;;  %v5725_v24 = vpop.f32.mrb[86].mxu1 }
 0x2ec   :  { %7249 = vst [vmem:[#allocation44_spill] sm:$0xff] %v5725_v24  ;;  %v5727_v25 = vpop.f32.mrb[87].mxu1 }
 0x2ed   :  { %7250 = vst [vmem:[#allocation45_spill] sm:$0xff] %v5727_v25 }
 0x2f1   :  { %v5729_v26 = vpop.f32.mrb[88].mxu1 }
 0x2f2   :  { %7251 = vst [vmem:[#allocation46_spill] sm:$0xff] %v5729_v26  ;;  %v5731_v28 = vpop.f32.mrb[89].mxu1 }
 0x2f3   :  { %7252 = vst [vmem:[#allocation47_spill] sm:$0xff] %v5731_v28  ;;  %v5733_v32 = vpop.f32.mrb[90].mxu1 }
 0x2f4   :  { %7253 = vst [vmem:[#allocation48_spill] sm:$0xff] %v5733_v32  ;;  %v5735_v37 = vpop.f32.mrb[91].mxu1 }
 0x2f5   :  { %7254 = vst [vmem:[#allocation49_spill] sm:$0xff] %v5735_v37 }
 0x2f9   :  { %v5737_v39 = vpop.f32.mrb[92].mxu1 }
 0x2fa   :  { %7255 = vst [vmem:[#allocation50_spill] sm:$0xff] %v5737_v39  ;;  %v5739_v42 = vpop.f32.mrb[93].mxu1 }
 0x2fb   :  { %7256 = vst [vmem:[#allocation51_spill] sm:$0xff] %v5739_v42  ;;  %v5741_v51 = vpop.f32.mrb[94].mxu1 }
 0x2fc   :  { %7257 = vst [vmem:[#allocation52_spill] sm:$0xff] %v5741_v51  ;;  %v5744_v56 = vpop.f32.mrb[95].mxu1 }
 0x2fd   :  { %7258 = vst [vmem:[#allocation53_spill] sm:$0xff] %v5744_v56 }
 0x301   :  { %v4476_v5 = vpop.f32.mrb[96].mxu1 }
 0x302   :  { %v5752_v8 = vadd.f32 %v4476_v5, %v5749_v3  ;;  %v5754_v0 = vpop.f32.mrb[97].mxu1 }
 0x303   :  { %7261 = vst [vmem:[#allocation56_spill] sm:$0xff] %v5754_v0  ;;  %v4477_v14 = vpop.f32.mrb[98].mxu1 }
 0x304   :  { %7260 = vst [vmem:[#allocation55_spill] sm:$0xff] %v5752_v8  ;;  %v5757_v18 = vadd.f32 %v4477_v14, %v5749_v3  ;;  %v5759_v55 = vpop.f32.mrb[99].mxu1 }
 0x305   :  { %7263 = vst [vmem:[#allocation58_spill] sm:$0xff] %v5759_v55 }
 0x306   :  { %7262 = vst [vmem:[#allocation57_spill] sm:$0xff] %v5757_v18 }
 0x309   :  { %v4480_v31 = vpop.f32.mrb[100].mxu1 }
 0x30a   :  { %v5762_v45 = vadd.f32 %v4480_v31, %v5749_v3  ;;  %v1597_v21 = vpop.f32.mrb[101].mxu1 }
 0x30b   :  { %v5765_v58 = vadd.f32 %v1597_v21, %v5749_v3  ;;  %v4481_v54 = vpop.f32.mrb[102].mxu1 }
 0x30c   :  { %7264 = vst [vmem:[#allocation59_spill] sm:$0xff] %v5762_v45  ;;  %v5768_v5 = vadd.f32 %v4481_v54, %v5749_v3  ;;  %v1600_v27 = vpop.f32.mrb[103].mxu1 }
 0x30d   :  { %7265 = vst [vmem:[#allocation60_spill] sm:$0xff] %v5765_v58  ;;  %v5771_v60 = vadd.f32 %v1600_v27, %v5749_v3 }
 0x30e   :  { %7266 = vst [vmem:[#allocation61_spill] sm:$0xff] %v5768_v5 }
 0x30f   :  { %7267 = vst [vmem:[#allocation62_spill] sm:$0xff] %v5771_v60 }
 0x311   :  { %v4484_v14 = vpop.f32.mrb[104].mxu1 }
 0x312   :  { %v5774_v18 = vadd.f32 %v4484_v14, %v5749_v3  ;;  %v1613_v8 = vpop.f32.mrb[105].mxu1 }
 0x313   :  { %v5777_v31 = vadd.f32 %v1613_v8, %v5749_v3  ;;  %v4485_v45 = vpop.f32.mrb[106].mxu1 }
 0x314   :  { %7268 = vst [vmem:[#allocation63_spill] sm:$0xff] %v5774_v18  ;;  %v5780_v21 = vadd.f32 %v4485_v45, %v5749_v3  ;;  %v1616_v58 = vpop.f32.mrb[107].mxu1 }
 0x315   :  { %7269 = vst [vmem:[#allocation64_spill] sm:$0xff] %v5777_v31  ;;  %v5783_v54 = vadd.f32 %v1616_v58, %v5749_v3 }
 0x316   :  { %7270 = vst [vmem:[#allocation65_spill] sm:$0xff] %v5780_v21 }
 0x317   :  { %7271 = vst [vmem:[#allocation66_spill] sm:$0xff] %v5783_v54 }
 0x319   :  { %v4488_v5 = vpop.f32.mrb[108].mxu1 }
 0x31a   :  { %v5786_v27 = vadd.f32 %v4488_v5, %v5749_v3  ;;  %v1629_v60 = vpop.f32.mrb[109].mxu1 }
 0x31b   :  { %v5789_v14 = vadd.f32 %v1629_v60, %v5749_v3  ;;  %v4489_v18 = vpop.f32.mrb[110].mxu1 }
 0x31c   :  { %7272 = vst [vmem:[#allocation67_spill] sm:$0xff] %v5786_v27  ;;  %v5792_v8 = vadd.f32 %v4489_v18, %v5749_v3  ;;  %v1632_v31 = vpop.f32.mrb[111].mxu1 }
 0x31d   :  { %7273 = vst [vmem:[#allocation68_spill] sm:$0xff] %v5789_v14  ;;  %v5795_v45 = vadd.f32 %v1632_v31, %v5749_v3 }
 0x31e   :  { %7274 = vst [vmem:[#allocation69_spill] sm:$0xff] %v5792_v8 }
 0x31f   :  { %7275 = vst [vmem:[#allocation70_spill] sm:$0xff] %v5795_v45 }
 0x357   :  { %v5797_v21 = vpop.f32.mrb[80].mxu0 }
 0x358   :  { %1953 = vadd.xlane.f32.xlu1 %v5797_v21  ;;  %v5800_v58 = vpop.f32.mrb[81].mxu0 }
 0x359   :  { %1949 = vadd.xlane.f32.xlu0 %v5800_v58  ;;  %v5803_v5 = vpop.f32.mrb[82].mxu0 }
 0x35a   :  { %v5805_v60 = vpop.f32.mrb[83].mxu0 }
 0x35c   :  { %1955 = vadd.xlane.f32.xlu1 %v5803_v5 }
 0x35d   :  { %1951 = vadd.xlane.f32.xlu0 %v5805_v60 }
 0x367   :  { %v5809_v18 = vpop.f32.mrb[84].mxu0 }
 0x368   :  { %v5811_v31 = vpop.f32.mrb[85].mxu0 }
 0x369   :  { %1957 = vadd.xlane.f32.xlu0 %v5811_v31  ;;  %v5814_v8 = vpop.f32.mrb[86].mxu0 }
 0x36a   :  { %v5816_v27 = vpop.f32.mrb[87].mxu0 }
 0x36b   :  { %1959 = vadd.xlane.f32.xlu1 %v5816_v27 }
 0x36d   :  { %1961 = vadd.xlane.f32.xlu0 %v5809_v18 }
 0x36f   :  { %1963 = vadd.xlane.f32.xlu1 %v5814_v8 }
 0x377   :  { %v5821_v45 = vpop.f32.mrb[88].mxu0 }
 0x378   :  { %v5823_v14 = vpop.f32.mrb[89].mxu0 }
 0x379   :  { %1965 = vadd.xlane.f32.xlu0 %v5823_v14  ;;  %v5826_v54 = vpop.f32.mrb[90].mxu0 }
 0x37a   :  { %v5828_v55 = vpop.f32.mrb[91].mxu0 }
 0x37b   :  { %1967 = vadd.xlane.f32.xlu1 %v5828_v55 }
 0x37d   :  { %1969 = vadd.xlane.f32.xlu0 %v5821_v45 }
 0x37f   :  { %1971 = vadd.xlane.f32.xlu1 %v5826_v54 }
 0x387   :  { %v5833_v0 = vpop.f32.mrb[92].mxu0 }
 0x388   :  { %v5835_v51 = vpop.f32.mrb[93].mxu0 }
 0x389   :  { %1973 = vadd.xlane.f32.xlu0 %v5835_v51  ;;  %v5838_v39 = vpop.f32.mrb[94].mxu0 }
 0x38a   :  { %v5840_v56 = vpop.f32.mrb[95].mxu0 }
 0x38b   :  { %1975 = vadd.xlane.f32.xlu1 %v5840_v56 }
 0x38d   :  { %1977 = vadd.xlane.f32.xlu0 %v5833_v0 }
 0x38f   :  { %1979 = vadd.xlane.f32.xlu1 %v5838_v39 }
 0x397   :  { %v5845_v42 = vpop.f32.mrb[96].mxu0 }
 0x398   :  { %v5847_v32 = vpop.f32.mrb[97].mxu0 }
 0x399   :  { %1981 = vadd.xlane.f32.xlu0 %v5847_v32  ;;  %v5850_v26 = vpop.f32.mrb[98].mxu0 }
 0x39a   :  { %v5852_v37 = vpop.f32.mrb[99].mxu0 }
 0x39b   :  { %1983 = vadd.xlane.f32.xlu1 %v5852_v37 }
 0x39d   :  { %1985 = vadd.xlane.f32.xlu0 %v5845_v42 }
 0x39f   :  { %1987 = vadd.xlane.f32.xlu1 %v5850_v26 }
 0x3a7   :  { %v5857_v28 = vpop.f32.mrb[100].mxu0 }
 0x3a8   :  { %v5859_v24 = vpop.f32.mrb[101].mxu0 }
 0x3a9   :  { %1989 = vadd.xlane.f32.xlu0 %v5859_v24  ;;  %v5862_v20 = vpop.f32.mrb[102].mxu0 }
 0x3aa   :  { %v5864_v25 = vpop.f32.mrb[103].mxu0 }
 0x3ab   :  { %1991 = vadd.xlane.f32.xlu1 %v5864_v25 }
 0x3ad   :  { %1993 = vadd.xlane.f32.xlu0 %v5857_v28 }
 0x3af   :  { %1995 = vadd.xlane.f32.xlu1 %v5862_v20  ;;  %v5869_v30 = vpop.f32.mrb[104].mxu0 }
 0x3b0   :  { %v5871_v49 = vpop.f32.mrb[105].mxu0 }
 0x3b1   :  { %1997 = vadd.xlane.f32.xlu0 %v5871_v49  ;;  %v5874_v57 = vpop.f32.mrb[106].mxu0 }
 0x3b2   :  { %v5876_v52 = vpop.f32.mrb[107].mxu0 }
 0x3b3   :  { %1999 = vadd.xlane.f32.xlu1 %v5876_v52 }
 0x3b5   :  { %2001 = vadd.xlane.f32.xlu0 %v5869_v30 }
 0x3b7   :  { %2003 = vadd.xlane.f32.xlu1 %v5874_v57  ;;  %v5881_v61 = vpop.f32.mrb[108].mxu0 }
 0x3b8   :  { %v5883_v3 = vpop.f32.mrb[109].mxu0 }
 0x3b9   :  { %2005 = vadd.xlane.f32.xlu0 %v5883_v3  ;;  %v5886_v10 = vpop.f32.mrb[110].mxu0 }
 0x3ba   :  { %v5888_v44 = vpop.f32.mrb[111].mxu0 }
 0x3bb   :  { %2007 = vadd.xlane.f32.xlu1 %v5888_v44 }
 0x3bd   :  { %2009 = vadd.xlane.f32.xlu0 %v5881_v61 }
 0x3bf   :  { %2011 = vadd.xlane.f32.xlu1 %v5886_v10 }
 0x3e5   :  { %v1954_v17 = vpop.xlane.xlu1 %1953 }
 0x3e6   :  { %v1950_v4 = vpop.xlane.xlu0 %1949  ;;  %v2016_v62 = vmul.f32 0.0078125, %v1954_v17 }
 0x3e7   :  { %v2014_v15 = vmul.f32 0.0078125, %v1950_v4 }
 0x3e8   :  { %v5899_v2 = vsub.f32 %v5797_v21, %v2016_v62 }
 0x3e9   :  { %v1956_v12 = vpop.xlane.xlu1 %1955  ;;  %v5894_v48 = vsub.f32 %v5800_v58, %v2014_v15 }
 0x3ea   :  { %v1952_v43 = vpop.xlane.xlu0 %1951  ;;  %v2017_v23 = vmul.f32 0.0078125, %v1956_v12  ;;  %v2080_v4 = vmul.f32 %v5899_v2, %v5899_v2 }
 0x3eb   :  { %v2015_v47 = vmul.f32 0.0078125, %v1952_v43  ;;  %v2078_v35 = vmul.f32 %v5894_v48, %v5894_v48 }
 0x3ec   :  { %v5909_v17 = vsub.f32 %v5803_v5, %v2017_v23 }
 0x3ed   :  { %2110 = vadd.xlane.f32.xlu0 %v2078_v35  ;;  %v5902_v6 = vsub.f32 %v5805_v60, %v2015_v47 }
 0x3ee   :  { %v2081_v43 = vmul.f32 %v5909_v17, %v5909_v17 }
 0x3ef   :  { %v2079_v15 = vmul.f32 %v5902_v6, %v5902_v6 }
 0x3f1   :  { %2114 = vadd.xlane.f32.xlu0 %v2080_v4  ;;  %2112 = vadd.xlane.f32.xlu1 %v2079_v15  ;;  %v4746_v4 = vld [vmem:[#allocation12] sm:$0xff]  }
 0x3f2   :  { %4538 = vmatprep.subr.bf16.mxu1 %v4746_v4 }
 0x3f3   :  { %4539 = vmatpush3.bf16.msra.mxu1 %v4746_v4 }
 0x3f5   :  { %2116 = vadd.xlane.f32.xlu1 %v2081_v43 }
 0x3f6   :  { %v1958_v62 = vpop.xlane.xlu0 %1957 }
 0x3f7   :  { %v2018_v35 = vmul.f32 0.0078125, %v1958_v62 }
 0x3f8   :  { %v1960_v12 = vpop.xlane.xlu1 %1959 }
 0x3f9   :  { %v2019_v47 = vmul.f32 0.0078125, %v1960_v12  ;;  %v5914_v21 = vsub.f32 %v5811_v31, %v2018_v35  ;;  %v4748_v12 = vld [vmem:[#allocation12 + $0x10] sm:$0xff]  }
 0x3fa   :  { %v1962_v58 = vpop.xlane.xlu0 %1961 }
 0x3fb   :  { %v2020_v60 = vmul.f32 0.0078125, %v1962_v58  ;;  %v2082_v7 = vmul.f32 %v5914_v21, %v5914_v21  ;;  %v5919_v23 = vsub.f32 %v5816_v27, %v2019_v47 }
 0x3fc   :  { %v1964_v5 = vpop.xlane.xlu1 %1963 }
 0x3fd   :  { %v2021_v15 = vmul.f32 0.0078125, %v1964_v5  ;;  %2118 = vadd.xlane.f32.xlu0 %v2082_v7  ;;  %v2083_v43 = vmul.f32 %v5919_v23, %v5919_v23  ;;  %v5924_v62 = vsub.f32 %v5809_v18, %v2020_v60  ;;  %v4747_v7 = vld [vmem:[#allocation12 + $0x8] sm:$0xff]  }
 0x3fe   :  { %4540 = vmatprep.subr.bf16.mxu1 %v4747_v7 }
 0x3ff   :  { %2120 = vadd.xlane.f32.xlu1 %v2083_v43  ;;  %v2084_v31 = vmul.f32 %v5924_v62, %v5924_v62  ;;  %v5929_v35 = vsub.f32 %v5814_v8, %v2021_v15  ;;  %4541 = vmatpush3.bf16.msra.mxu1 %v4747_v7  ;;  %v4749_v8 = vld [vmem:[#allocation12 + $0x18] sm:$0xff]  }
 0x400   :  { %4542 = vmatprep.subr.bf16.mxu1 %v4748_v12 }
 0x401   :  { %2122 = vadd.xlane.f32.xlu0 %v2084_v31  ;;  %v2085_v27 = vmul.f32 %v5929_v35, %v5929_v35 }
 0x403   :  { %2124 = vadd.xlane.f32.xlu1 %v2085_v27  ;;  %4543 = vmatpush3.bf16.msra.mxu1 %v4748_v12 }
 0x404   :  { %4544 = vmatprep.subr.bf16.mxu1 %v4749_v8 }
 0x406   :  { %v1966_v18 = vpop.xlane.xlu0 %1965 }
 0x407   :  { %v2022_v47 = vmul.f32 0.0078125, %v1966_v18  ;;  %4545 = vmatpush3.bf16.msra.mxu1 %v4749_v8  ;;  %v4750_v18 = vld [vmem:[#allocation12 + $0x20] sm:$0xff]   ;;  %v4753_v8 = vld [vmem:[#allocation12 + $0x38] sm:$0xff]  }
 0x408   :  { %v1968_v58 = vpop.xlane.xlu1 %1967  ;;  %4546 = vmatprep.subr.bf16.mxu1 %v4750_v18 }
 0x409   :  { %v2023_v60 = vmul.f32 0.0078125, %v1968_v58  ;;  %v5934_v5 = vsub.f32 %v5823_v14, %v2022_v47 }
 0x40a   :  { %v1970_v4 = vpop.xlane.xlu0 %1969 }
 0x40b   :  { %v2024_v15 = vmul.f32 0.0078125, %v1970_v4  ;;  %v2086_v43 = vmul.f32 %v5934_v5, %v5934_v5  ;;  %v5939_v31 = vsub.f32 %v5828_v55, %v2023_v60  ;;  %4547 = vmatpush3.bf16.msra.mxu1 %v4750_v18  ;;  %v4751_v60 = vld [vmem:[#allocation12 + $0x28] sm:$0xff]  }
 0x40c   :  { %v1972_v27 = vpop.xlane.xlu1 %1971  ;;  %4548 = vmatprep.subr.bf16.mxu1 %v4751_v60 }
 0x40d   :  { %v2025_v7 = vmul.f32 0.0078125, %v1972_v27  ;;  %2126 = vadd.xlane.f32.xlu0 %v2086_v43  ;;  %v2087_v12 = vmul.f32 %v5939_v31, %v5939_v31  ;;  %v5944_v14 = vsub.f32 %v5821_v45, %v2024_v15  ;;  %v4752_v45 = vld [vmem:[#allocation12 + $0x30] sm:$0xff]  }
 0x40f   :  { %2128 = vadd.xlane.f32.xlu1 %v2087_v12  ;;  %v2088_v47 = vmul.f32 %v5944_v14, %v5944_v14  ;;  %v5949_v58 = vsub.f32 %v5826_v54, %v2025_v7  ;;  %4549 = vmatpush3.bf16.msra.mxu1 %v4751_v60 }
 0x410   :  { %4550 = vmatprep.subr.bf16.mxu1 %v4752_v45 }
 0x411   :  { %2130 = vadd.xlane.f32.xlu0 %v2088_v47  ;;  %v2089_v55 = vmul.f32 %v5949_v58, %v5949_v58 }
 0x413   :  { %2132 = vadd.xlane.f32.xlu1 %v2089_v55  ;;  %4551 = vmatpush3.bf16.msra.mxu1 %v4752_v45 }
 0x414   :  { %4552 = vmatprep.subr.bf16.mxu1 %v4753_v8 }
 0x416   :  { %v1974_v4 = vpop.xlane.xlu0 %1973 }
 0x417   :  { %v2026_v15 = vmul.f32 0.0078125, %v1974_v4  ;;  %4553 = vmatpush3.bf16.msra.mxu1 %v4753_v8 }
 0x418   :  { %v1976_v43 = vpop.xlane.xlu1 %1975 }
 0x419   :  { %v2027_v27 = vmul.f32 0.0078125, %v1976_v43  ;;  %v5954_v54 = vsub.f32 %v5835_v51, %v2026_v15 }
 0x41a   :  { %v1978_v7 = vpop.xlane.xlu0 %1977 }
 0x41b   :  { %v2028_v12 = vmul.f32 0.0078125, %v1978_v7  ;;  %v2090_v18 = vmul.f32 %v5954_v54, %v5954_v54  ;;  %v5959_v47 = vsub.f32 %v5840_v56, %v2027_v27 }
 0x41c   :  { %v1980_v55 = vpop.xlane.xlu1 %1979 }
 0x41d   :  { %v2029_v60 = vmul.f32 0.0078125, %v1980_v55  ;;  %2134 = vadd.xlane.f32.xlu0 %v2090_v18  ;;  %v2091_v45 = vmul.f32 %v5959_v47, %v5959_v47  ;;  %v5964_v4 = vsub.f32 %v5833_v0, %v2028_v12 }
 0x41f   :  { %2136 = vadd.xlane.f32.xlu1 %v2091_v45  ;;  %v2092_v51 = vmul.f32 %v5964_v4, %v5964_v4  ;;  %v5969_v15 = vsub.f32 %v5838_v39, %v2029_v60 }
 0x421   :  { %2138 = vadd.xlane.f32.xlu0 %v2092_v51  ;;  %v2093_v56 = vmul.f32 %v5969_v15, %v5969_v15 }
 0x423   :  { %2140 = vadd.xlane.f32.xlu1 %v2093_v56 }
 0x426   :  { %v1982_v8 = vpop.xlane.xlu0 %1981 }
 0x427   :  { %v2030_v43 = vmul.f32 0.0078125, %v1982_v8 }
 0x428   :  { %v1984_v27 = vpop.xlane.xlu1 %1983 }
 0x429   :  { %v2031_v7 = vmul.f32 0.0078125, %v1984_v27  ;;  %v5974_v18 = vsub.f32 %v5847_v32, %v2030_v43 }
 0x42a   :  { %v1986_v0 = vpop.xlane.xlu0 %1985 }
 0x42b   :  { %v2032_v12 = vmul.f32 0.0078125, %v1986_v0  ;;  %v2094_v55 = vmul.f32 %v5974_v18, %v5974_v18  ;;  %v5979_v39 = vsub.f32 %v5852_v37, %v2031_v7 }
 0x42c   :  { %v1988_v60 = vpop.xlane.xlu1 %1987 }
 0x42d   :  { %v2033_v45 = vmul.f32 0.0078125, %v1988_v60  ;;  %2142 = vadd.xlane.f32.xlu0 %v2094_v55  ;;  %v2095_v51 = vmul.f32 %v5979_v39, %v5979_v39  ;;  %v5984_v56 = vsub.f32 %v5845_v42, %v2032_v12 }
 0x42f   :  { %2144 = vadd.xlane.f32.xlu1 %v2095_v51  ;;  %v2096_v32 = vmul.f32 %v5984_v56, %v5984_v56  ;;  %v5989_v8 = vsub.f32 %v5850_v26, %v2033_v45 }
 0x431   :  { %2146 = vadd.xlane.f32.xlu0 %v2096_v32  ;;  %v2097_v37 = vmul.f32 %v5989_v8, %v5989_v8 }
 0x433   :  { %2148 = vadd.xlane.f32.xlu1 %v2097_v37 }
 0x436   :  { %v1990_v43 = vpop.xlane.xlu0 %1989 }
 0x437   :  { %v2034_v27 = vmul.f32 0.0078125, %v1990_v43 }
 0x438   :  { %v1992_v7 = vpop.xlane.xlu1 %1991 }
 0x439   :  { %v2035_v0 = vmul.f32 0.0078125, %v1992_v7  ;;  %v5994_v55 = vsub.f32 %v5859_v24, %v2034_v27 }
 0x43a   :  { %v1994_v42 = vpop.xlane.xlu0 %1993 }
 0x43b   :  { %v2036_v12 = vmul.f32 0.0078125, %v1994_v42  ;;  %v2098_v60 = vmul.f32 %v5994_v55, %v5994_v55  ;;  %v5999_v26 = vsub.f32 %v5864_v25, %v2035_v0 }
 0x43c   :  { %v1996_v45 = vpop.xlane.xlu1 %1995 }
 0x43d   :  { %v2037_v51 = vmul.f32 0.0078125, %v1996_v45  ;;  %2150 = vadd.xlane.f32.xlu0 %v2098_v60  ;;  %v2099_v32 = vmul.f32 %v5999_v26, %v5999_v26  ;;  %v6004_v37 = vsub.f32 %v5857_v28, %v2036_v12 }
 0x43e   :  { %v1998_v43 = vpop.xlane.xlu0 %1997 }
 0x43f   :  { %v2038_v24 = vmul.f32 0.0078125, %v1998_v43  ;;  %2152 = vadd.xlane.f32.xlu1 %v2099_v32  ;;  %v2100_v27 = vmul.f32 %v6004_v37, %v6004_v37  ;;  %v6009_v7 = vsub.f32 %v5862_v20, %v2037_v51 }
 0x440   :  { %v2000_v25 = vpop.xlane.xlu1 %1999 }
 0x441   :  { %v2039_v0 = vmul.f32 0.0078125, %v2000_v25  ;;  %2154 = vadd.xlane.f32.xlu0 %v2100_v27  ;;  %v2101_v42 = vmul.f32 %v6009_v7, %v6009_v7  ;;  %v6014_v60 = vsub.f32 %v5871_v49, %v2038_v24 }
 0x442   :  { %v2002_v28 = vpop.xlane.xlu0 %2001 }
 0x443   :  { %v2040_v12 = vmul.f32 0.0078125, %v2002_v28  ;;  %2156 = vadd.xlane.f32.xlu1 %v2101_v42  ;;  %v2102_v45 = vmul.f32 %v6014_v60, %v6014_v60  ;;  %v6019_v32 = vsub.f32 %v5876_v52, %v2039_v0 }
 0x444   :  { %v2004_v20 = vpop.xlane.xlu1 %2003 }
 0x445   :  { %v2041_v51 = vmul.f32 0.0078125, %v2004_v20  ;;  %2158 = vadd.xlane.f32.xlu0 %v2102_v45  ;;  %v2103_v43 = vmul.f32 %v6019_v32, %v6019_v32  ;;  %v6024_v27 = vsub.f32 %v5869_v30, %v2040_v12 }
 0x446   :  { %v2006_v49 = vpop.xlane.xlu0 %2005 }
 0x447   :  { %7276 = vst [vmem:[#allocation71_spill] sm:$0xff] %v6024_v27  ;;  %v2042_v24 = vmul.f32 0.0078125, %v2006_v49  ;;  %2160 = vadd.xlane.f32.xlu1 %v2103_v43  ;;  %v2104_v25 = vmul.f32 %v6024_v27, %v6024_v27  ;;  %v6029_v42 = vsub.f32 %v5874_v57, %v2041_v51 }
 0x448   :  { %v2008_v52 = vpop.xlane.xlu1 %2007 }
 0x449   :  { %7277 = vst [vmem:[#allocation72_spill] sm:$0xff] %v6029_v42  ;;  %v2043_v0 = vmul.f32 0.0078125, %v2008_v52  ;;  %2162 = vadd.xlane.f32.xlu0 %v2104_v25  ;;  %v2105_v28 = vmul.f32 %v6029_v42, %v6029_v42  ;;  %v6034_v45 = vsub.f32 %v5883_v3, %v2042_v24 }
 0x44a   :  { %v2010_v30 = vpop.xlane.xlu0 %2009 }
 0x44b   :  { %7278 = vst [vmem:[#allocation73_spill] sm:$0xff] %v6034_v45  ;;  %v2044_v12 = vmul.f32 0.0078125, %v2010_v30  ;;  %2164 = vadd.xlane.f32.xlu1 %v2105_v28  ;;  %v2106_v20 = vmul.f32 %v6034_v45, %v6034_v45  ;;  %v6039_v43 = vsub.f32 %v5888_v44, %v2043_v0 }
 0x44c   :  { %v2012_v57 = vpop.xlane.xlu1 %2011 }
 0x44d   :  { %7279 = vst [vmem:[#allocation74_spill] sm:$0xff] %v6039_v43  ;;  %v2045_v51 = vmul.f32 0.0078125, %v2012_v57  ;;  %2166 = vadd.xlane.f32.xlu0 %v2106_v20  ;;  %v2107_v49 = vmul.f32 %v6039_v43, %v6039_v43  ;;  %v6044_v25 = vsub.f32 %v5881_v61, %v2044_v12 }
 0x44f   :  { %7280 = vst [vmem:[#allocation75_spill] sm:$0xff] %v6044_v25  ;;  %2168 = vadd.xlane.f32.xlu1 %v2107_v49  ;;  %v2108_v3 = vmul.f32 %v6044_v25, %v6044_v25  ;;  %v6049_v24 = vsub.f32 %v5886_v10, %v2045_v51  ;;  %v7218_v25 = vsub.s32 2, %v5433_v59 }
 0x451   :  { %7281 = vst [vmem:[#allocation76_spill] sm:$0xff] %v6049_v24  ;;  %2170 = vadd.xlane.f32.xlu0 %v2108_v3  ;;  %v2109_v44 = vmul.f32 %v6049_v24, %v6049_v24  ;;  %v6057_v3 = vrot.slane %v5746_v63, %v7218_v25 }
 0x453   :  { %2172 = vadd.xlane.f32.xlu1 %v2109_v44  ;;  %v7222_v44 = vsub.s32 3, %v5433_v59 }
 0x47a   :  { %v2111_v52 = vpop.xlane.xlu0 %2110 }
 0x47b   :  { %v2174_v0 = vmul.f32 0.0078125, %v2111_v52 }
 0x47d   :  { %v2206_v28 = vadd.f32 1e-05, %v2174_v0 }
 0x47e   :  { %v2115_v30 = vpop.xlane.xlu0 %2114  ;;  %v2113_v20 = vpop.xlane.xlu1 %2112 }
 0x47f   :  { %4778 = vrsqrt.f32 %v2206_v28  ;;  %v2176_v61 = vmul.f32 0.0078125, %v2115_v30  ;;  %v2175_v12 = vmul.f32 0.0078125, %v2113_v20  ;;  %v6064_v30 = vrot.slane %v5746_v63, %v7222_v44 }
 0x480   :  { %v1204_v20 = vsub.s32 4, %v5433_v59 }
 0x481   :  { %v2208_v57 = vadd.f32 1e-05, %v2176_v61  ;;  %v2207_v49 = vadd.f32 1e-05, %v2175_v12 }
 0x482   :  { %v2117_v43 = vpop.xlane.xlu1 %2116 }
 0x483   :  { %4780 = vrsqrt.f32 %v2208_v57  ;;  %v2177_v10 = vmul.f32 0.0078125, %v2117_v43 }
 0x484   :  { %4782 = vrsqrt.f32 %v2207_v49 }
 0x485   :  { %v2209_v51 = vadd.f32 1e-05, %v2177_v10 }
 0x487   :  { %4784 = vrsqrt.f32 %v2209_v51 }
 0x489   :  { %v4779_v52 = vpop.eup %4778 }
 0x48a   :  { %v2119_v0 = vpop.xlane.xlu0 %2118  ;;  %v2274_v28 = vmul.f32 %v4779_v52, %v6057_v3 }
 0x48b   :  { %v2178_v43 = vmul.f32 0.0078125, %v2119_v0  ;;  %v6072_v0 = vrot.slane %v5746_v63, %v1204_v20 }
 0x48c   :  { %v2121_v61 = vpop.xlane.xlu1 %2120  ;;  %v2306_v12 = vmul.f32 %v2274_v28, %v5894_v48 }
 0x48d   :  { %v4781_v57 = vpop.eup %4780  ;;  %v2210_v49 = vadd.f32 1e-05, %v2178_v43  ;;  %v2179_v10 = vmul.f32 0.0078125, %v2121_v61 }
 0x48e   :  { %v4783_v25 = vpop.eup %4782  ;;  %v2276_v51 = vmul.f32 %v4781_v57, %v6057_v3  ;;  %v2123_v24 = vpop.xlane.xlu0 %2122  ;;  %v2342_v52 = vadd.f32 %v6064_v30, %v2306_v12 }
 0x48f   :  { %4786 = vrsqrt.f32 %v2210_v49  ;;  %v2211_v45 = vadd.f32 1e-05, %v2179_v10  ;;  %v2180_v42 = vmul.f32 0.0078125, %v2123_v24  ;;  %v2275_v44 = vmul.f32 %v4783_v25, %v6057_v3 }
 0x490   :  { %v2308_v59 = vmul.f32 %v2276_v51, %v5899_v2  ;;  %v2125_v48 = vpop.xlane.xlu1 %2124  ;;  %v2374_v49 = vmax.f32 %v2342_v52, 0.0  ;;  %v1289_v2 = vadd.f32 %v5621_v53, %v6072_v0  ;;  %v1297_v10 = vadd.f32 %v5618_v9, %v6072_v0 }
 0x491   :  { %v4785_v28 = vpop.eup %4784  ;;  %4788 = vrsqrt.f32 %v2211_v45  ;;  %v2212_v43 = vadd.f32 1e-05, %v2180_v42  ;;  %v2181_v61 = vmul.f32 0.0078125, %v2125_v48  ;;  %v2307_v57 = vmul.f32 %v2275_v44, %v5902_v6 }
 0x492   :  { %v2277_v27 = vmul.f32 %v4785_v28, %v6057_v3  ;;  %v2344_v12 = vadd.f32 %v6064_v30, %v2308_v59  ;;  %v1292_v42 = vadd.f32 %v5627_v16, %v6072_v0  ;;  %v2422_v20 = vmul.f32 %v2374_v49, %v1289_v2 }
 0x493   :  { %4790 = vrsqrt.f32 %v2212_v43  ;;  %v2213_v24 = vadd.f32 1e-05, %v2181_v61  ;;  %v2343_v25 = vadd.f32 %v6064_v30, %v2307_v57  ;;  %v1300_v51 = vadd.f32 %v5624_v36, %v6072_v0 }
 0x494   :  { %v2309_v63 = vmul.f32 %v2277_v27, %v5909_v17  ;;  %v2376_v44 = vmax.f32 %v2344_v12, 0.0 }
 0x495   :  { %4792 = vrsqrt.f32 %v2213_v24  ;;  %v2375_v45 = vmax.f32 %v2343_v25, 0.0 }
 0x496   :  { %v2345_v6 = vadd.f32 %v6064_v30, %v2309_v63  ;;  %v2424_v48 = vmul.f32 %v2376_v44, %v1297_v10 }
 0x497   :  { %v2423_v59 = vmul.f32 %v2375_v45, %v1292_v42 }
 0x498   :  { %v2377_v17 = vmax.f32 %v2345_v6, 0.0 }
 0x499   :  { %v4787_v27 = vpop.eup %4786  ;;  %v2454_v52 = vpack.c.bf16 %v2423_v59, %v2422_v20 }
 0x49a   :  { %v2127_v53 = vpop.xlane.xlu0 %2126  ;;  %v2425_v28 = vmul.f32 %v2377_v17, %v1300_v51  ;;  %v2278_v16 = vmul.f32 %v4787_v27, %v6057_v3  ;;  %v1305_v27 = vadd.f32 %v5633_v41, %v6072_v0  ;;  %v1313_v41 = vadd.f32 %v5630_v33, %v6072_v0 }
 0x49b   :  { %v4789_v43 = vpop.eup %4788  ;;  %v2182_v61 = vmul.f32 0.0078125, %v2127_v53  ;;  %4554 = vmatprep.mubr.bf16.mxu1 %v2454_v52  ;;  %v1308_v53 = vadd.f32 %v5639_v50, %v6072_v0 }
 0x49c   :  { %v2129_v57 = vpop.xlane.xlu1 %2128  ;;  %v2455_v12 = vpack.c.bf16 %v2425_v28, %v2424_v48  ;;  %v2279_v24 = vmul.f32 %v4789_v43, %v6057_v3  ;;  %v2310_v9 = vmul.f32 %v2278_v16, %v5914_v21 }
 0x49d   :  { %v4791_v25 = vpop.eup %4790  ;;  %v2214_v49 = vadd.f32 1e-05, %v2182_v61  ;;  %v2183_v36 = vmul.f32 0.0078125, %v2129_v57 }
 0x49e   :  { %v2131_v63 = vpop.xlane.xlu0 %2130  ;;  %4555 = vmatmul.mubr.bf16.vlgmr.msra.gmra.mrb[112].mxu1 %v2455_v12  ;;  %v2311_v2 = vmul.f32 %v2279_v24, %v5919_v23  ;;  %v2346_v42 = vadd.f32 %v6064_v30, %v2310_v9  ;;  %v2280_v45 = vmul.f32 %v4791_v25, %v6057_v3  ;;  %v1316_v24 = vadd.f32 %v5636_v46, %v6072_v0 }
 0x49f   :  { %v4793_v6 = vpop.eup %4792  ;;  %4794 = vrsqrt.f32 %v2214_v49  ;;  %v2215_v44 = vadd.f32 1e-05, %v2183_v36  ;;  %v2184_v20 = vmul.f32 0.0078125, %v2131_v63 }
 0x4a0   :  { %v2133_v59 = vpop.xlane.xlu1 %2132  ;;  %v2347_v10 = vadd.f32 %v6064_v30, %v2311_v2  ;;  %v2378_v51 = vmax.f32 %v2346_v42, 0.0  ;;  %v2281_v21 = vmul.f32 %v4793_v6, %v6057_v3  ;;  %v2312_v17 = vmul.f32 %v2280_v45, %v5924_v62 }
 0x4a1   :  { %4796 = vrsqrt.f32 %v2215_v44  ;;  %v2216_v23 = vadd.f32 1e-05, %v2184_v20  ;;  %v2185_v52 = vmul.f32 0.0078125, %v2133_v59 }
 0x4a2   :  { %v2379_v48 = vmax.f32 %v2347_v10, 0.0  ;;  %v2313_v28 = vmul.f32 %v2281_v21, %v5929_v35  ;;  %v2348_v16 = vadd.f32 %v6064_v30, %v2312_v17  ;;  %v2426_v61 = vmul.f32 %v2378_v51, %v1305_v27 }
 0x4a3   :  { %4798 = vrsqrt.f32 %v2216_v23  ;;  %v2217_v43 = vadd.f32 1e-05, %v2185_v52 }
 0x4a4   :  { %v2427_v57 = vmul.f32 %v2379_v48, %v1308_v53  ;;  %v2349_v62 = vadd.f32 %v6064_v30, %v2313_v28  ;;  %v2380_v12 = vmax.f32 %v2348_v16, 0.0 }
 0x4a5   :  { %4800 = vrsqrt.f32 %v2217_v43  ;;  %v1321_v43 = vadd.f32 %v5645_v19, %v6072_v0  ;;  %v1329_v19 = vadd.f32 %v5642_v11, %v6072_v0 }
 0x4a6   :  { %v2456_v50 = vpack.c.bf16 %v2427_v57, %v2426_v61  ;;  %v2381_v9 = vmax.f32 %v2349_v62, 0.0  ;;  %v2428_v35 = vmul.f32 %v2380_v12, %v1313_v41  ;;  %v1324_v57 = vadd.f32 %v5651_v13, %v6072_v0 }
 0x4a8   :  { %4558 = vmatprep.mubr.bf16.mxu1 %v2456_v50  ;;  %v2429_v25 = vmul.f32 %v2381_v9, %v1316_v24 }
 0x4a9   :  { %v4795_v49 = vpop.eup %4794 }
 0x4aa   :  { %v2135_v36 = vpop.xlane.xlu0 %2134  ;;  %v2457_v63 = vpack.c.bf16 %v2429_v25, %v2428_v35  ;;  %v2282_v2 = vmul.f32 %v4795_v49, %v6057_v3  ;;  %v1332_v25 = vadd.f32 %v5648_v34, %v6072_v0 }
 0x4ab   :  { %v4797_v42 = vpop.eup %4796  ;;  %v2186_v45 = vmul.f32 0.0078125, %v2135_v36 }
 0x4ac   :  { %4559 = vmatmul.mubr.bf16.gmra.mrb[116].mxu1 %v2457_v63  ;;  %v2137_v6 = vpop.xlane.xlu1 %2136  ;;  %v2283_v44 = vmul.f32 %v4797_v42, %v6057_v3  ;;  %v2314_v33 = vmul.f32 %v2282_v2, %v5934_v5 }
 0x4ad   :  { %v4799_v20 = vpop.eup %4798  ;;  %v2218_v46 = vadd.f32 1e-05, %v2186_v45  ;;  %v2187_v59 = vmul.f32 0.0078125, %v2137_v6 }
 0x4ae   :  { %v2139_v10 = vpop.xlane.xlu0 %2138  ;;  %v2315_v51 = vmul.f32 %v2283_v44, %v5939_v31  ;;  %v2350_v21 = vadd.f32 %v6064_v30, %v2314_v33  ;;  %v2284_v17 = vmul.f32 %v4799_v20, %v6057_v3 }
 0x4af   :  { %v4801_v27 = vpop.eup %4800  ;;  %4802 = vrsqrt.f32 %v2218_v46  ;;  %v2219_v23 = vadd.f32 1e-05, %v2187_v59  ;;  %v2188_v52 = vmul.f32 0.0078125, %v2139_v10 }
 0x4b0   :  { %v2141_v53 = vpop.xlane.xlu1 %2140  ;;  %v2351_v48 = vadd.f32 %v6064_v30, %v2315_v51  ;;  %v2382_v28 = vmax.f32 %v2350_v21, 0.0  ;;  %v2285_v5 = vmul.f32 %v4801_v27, %v6057_v3  ;;  %v2316_v16 = vmul.f32 %v2284_v17, %v5944_v14 }
 0x4b1   :  { %4804 = vrsqrt.f32 %v2219_v23  ;;  %v2220_v31 = vadd.f32 1e-05, %v2188_v52  ;;  %v2189_v61 = vmul.f32 0.0078125, %v2141_v53 }
 0x4b2   :  { %v2383_v62 = vmax.f32 %v2351_v48, 0.0  ;;  %v2317_v12 = vmul.f32 %v2285_v5, %v5949_v58  ;;  %v2352_v41 = vadd.f32 %v6064_v30, %v2316_v16  ;;  %v2430_v50 = vmul.f32 %v2382_v28, %v1321_v43 }
 0x4b3   :  { %4806 = vrsqrt.f32 %v2220_v31  ;;  %v2221_v24 = vadd.f32 1e-05, %v2189_v61  ;;  %v1337_v16 = vadd.f32 %v5657_v29, %v6072_v0  ;;  %v1340_v31 = vadd.f32 %v5663_v40, %v6072_v0 }
 0x4b4   :  { %v2431_v9 = vmul.f32 %v2383_v62, %v1324_v57  ;;  %v2353_v14 = vadd.f32 %v6064_v30, %v2317_v12  ;;  %v2384_v35 = vmax.f32 %v2352_v41, 0.0  ;;  %v1345_v29 = vadd.f32 %v5654_v22, %v6072_v0 }
 0x4b5   :  { %4808 = vrsqrt.f32 %v2221_v24 }
 0x4b6   :  { %v2458_v13 = vpack.c.bf16 %v2431_v9, %v2430_v50  ;;  %v2385_v49 = vmax.f32 %v2353_v14, 0.0  ;;  %v2432_v58 = vmul.f32 %v2384_v35, %v1329_v19  ;;  %v1348_v9 = vadd.f32 %v5660_v38, %v6072_v0 }
 0x4b8   :  { %4562 = vmatprep.mubr.bf16.mxu1 %v2458_v13  ;;  %v2433_v36 = vmul.f32 %v2385_v49, %v1332_v25 }
 0x4b9   :  { %v4803_v63 = vpop.eup %4802 }
 0x4ba   :  { %v2143_v2 = vpop.xlane.xlu0 %2142  ;;  %v2459_v42 = vpack.c.bf16 %v2433_v36, %v2432_v58  ;;  %v2286_v45 = vmul.f32 %v4803_v63, %v6057_v3 }
 0x4bb   :  { %v4805_v6 = vpop.eup %4804  ;;  %v2190_v44 = vmul.f32 0.0078125, %v2143_v2 }
 0x4bc   :  { %4563 = vmatmul.mubr.bf16.gmra.mrb[120].mxu1 %v2459_v42  ;;  %v2145_v33 = vpop.xlane.xlu1 %2144  ;;  %v2287_v20 = vmul.f32 %v4805_v6, %v6057_v3  ;;  %v2318_v11 = vmul.f32 %v2286_v45, %v5954_v54 }
 0x4bd   :  { %v4807_v46 = vpop.eup %4806  ;;  %v2222_v34 = vadd.f32 1e-05, %v2190_v44  ;;  %v2191_v59 = vmul.f32 0.0078125, %v2145_v33 }
 0x4be   :  { %v2147_v10 = vpop.xlane.xlu0 %2146  ;;  %v2319_v51 = vmul.f32 %v2287_v20, %v5959_v47  ;;  %v2354_v21 = vadd.f32 %v6064_v30, %v2318_v11  ;;  %v2288_v17 = vmul.f32 %v4807_v46, %v6057_v3 }
 0x4bf   :  { %v4809_v27 = vpop.eup %4808  ;;  %4810 = vrsqrt.f32 %v2222_v34  ;;  %v2223_v23 = vadd.f32 1e-05, %v2191_v59  ;;  %v2192_v52 = vmul.f32 0.0078125, %v2147_v10 }
 0x4c0   :  { %v2149_v53 = vpop.xlane.xlu1 %2148  ;;  %v2355_v48 = vadd.f32 %v6064_v30, %v2319_v51  ;;  %v2386_v28 = vmax.f32 %v2354_v21, 0.0  ;;  %v2289_v54 = vmul.f32 %v4809_v27, %v6057_v3  ;;  %v2320_v5 = vmul.f32 %v2288_v17, %v5964_v4 }
 0x4c1   :  { %4812 = vrsqrt.f32 %v2223_v23  ;;  %v2224_v47 = vadd.f32 1e-05, %v2192_v52  ;;  %v2193_v43 = vmul.f32 0.0078125, %v2149_v53  ;;  %v1353_v17 = vadd.f32 %v5669_v1, %v6072_v0  ;;  %v7282_v23 = vld [vmem:[#allocation25_spill] sm:$0xff] }
 0x4c2   :  { %v2387_v61 = vmax.f32 %v2355_v48, 0.0  ;;  %v2321_v57 = vmul.f32 %v2289_v54, %v5969_v15  ;;  %v2356_v62 = vadd.f32 %v6064_v30, %v2320_v5  ;;  %v2434_v41 = vmul.f32 %v2386_v28, %v1337_v16 }
 0x4c3   :  { %4814 = vrsqrt.f32 %v2224_v47  ;;  %v2225_v12 = vadd.f32 1e-05, %v2193_v43  ;;  %v1356_v52 = vadd.f32 %v7282_v23, %v6072_v0 }
 0x4c4   :  { %v2435_v24 = vmul.f32 %v2387_v61, %v1340_v31  ;;  %v2357_v4 = vadd.f32 %v6064_v30, %v2321_v57  ;;  %v2388_v50 = vmax.f32 %v2356_v62, 0.0  ;;  %v7283_v62 = vld [vmem:[#allocation23_spill] sm:$0xff] }
 0x4c5   :  { %4816 = vrsqrt.f32 %v2225_v12  ;;  %v1361_v12 = vadd.f32 %v7283_v62, %v6072_v0  ;;  %v7287_v62 = vld [vmem:[#allocation26_spill] sm:$0xff] }
 0x4c6   :  { %v2460_v40 = vpack.c.bf16 %v2435_v24, %v2434_v41  ;;  %v2389_v14 = vmax.f32 %v2357_v4, 0.0  ;;  %v2436_v15 = vmul.f32 %v2388_v50, %v1345_v29  ;;  %v7284_v41 = vld [vmem:[#allocation24_spill] sm:$0xff] }
 0x4c8   :  { %4566 = vmatprep.mubr.bf16.mxu1 %v2460_v40  ;;  %v2437_v35 = vmul.f32 %v2389_v14, %v1348_v9 }
 0x4c9   :  { %v4811_v19 = vpop.eup %4810 }
 0x4ca   :  { %v2151_v25 = vpop.xlane.xlu0 %2150  ;;  %v2461_v13 = vpack.c.bf16 %v2437_v35, %v2436_v15  ;;  %v2290_v49 = vmul.f32 %v4811_v19, %v6057_v3 }
 0x4cb   :  { %v4813_v58 = vpop.eup %4812  ;;  %v2194_v36 = vmul.f32 0.0078125, %v2151_v25 }
 0x4cc   :  { %4567 = vmatmul.mubr.bf16.gmra.mrb[124].mxu1 %v2461_v13  ;;  %v2153_v63 = vpop.xlane.xlu1 %2152  ;;  %v2291_v2 = vmul.f32 %v4813_v58, %v6057_v3  ;;  %v2322_v22 = vmul.f32 %v2290_v49, %v5974_v18 }
 0x4cd   :  { %v4815_v42 = vpop.eup %4814  ;;  %v2226_v38 = vadd.f32 1e-05, %v2194_v36  ;;  %v2195_v45 = vmul.f32 0.0078125, %v2153_v63 }
 0x4ce   :  { %v2155_v6 = vpop.xlane.xlu0 %2154  ;;  %v2323_v44 = vmul.f32 %v2291_v2, %v5979_v39  ;;  %v2358_v33 = vadd.f32 %v6064_v30, %v2322_v22  ;;  %v2292_v20 = vmul.f32 %v4815_v42, %v6057_v3 }
 0x4cf   :  { %v4817_v11 = vpop.eup %4816  ;;  %4818 = vrsqrt.f32 %v2226_v38  ;;  %v2227_v46 = vadd.f32 1e-05, %v2195_v45  ;;  %v2196_v34 = vmul.f32 0.0078125, %v2155_v6 }
 0x4d0   :  { %v2157_v59 = vpop.xlane.xlu1 %2156  ;;  %v2359_v10 = vadd.f32 %v6064_v30, %v2323_v44  ;;  %v2390_v51 = vmax.f32 %v2358_v33, 0.0  ;;  %v2293_v18 = vmul.f32 %v4817_v11, %v6057_v3  ;;  %v2324_v21 = vmul.f32 %v2292_v20, %v5984_v56 }
 0x4d1   :  { %4820 = vrsqrt.f32 %v2227_v46  ;;  %v2228_v39 = vadd.f32 1e-05, %v2196_v34  ;;  %v2197_v27 = vmul.f32 0.0078125, %v2157_v59 }
 0x4d2   :  { %v2159_v53 = vpop.xlane.xlu0 %2158  ;;  %v2391_v48 = vmax.f32 %v2359_v10, 0.0  ;;  %v2325_v28 = vmul.f32 %v2293_v18, %v5989_v8  ;;  %v2360_v54 = vadd.f32 %v6064_v30, %v2324_v21  ;;  %v2438_v56 = vmul.f32 %v2390_v51, %v1353_v17 }
 0x4d3   :  { %4822 = vrsqrt.f32 %v2228_v39  ;;  %v2229_v5 = vadd.f32 1e-05, %v2197_v27  ;;  %v2198_v16 = vmul.f32 0.0078125, %v2159_v53  ;;  %v1364_v8 = vadd.f32 %v7284_v41, %v6072_v0  ;;  %v7285_v27 = vld [vmem:[#allocation27_spill] sm:$0xff]  ;;  %v7286_v53 = vld [vmem:[#allocation29_spill] sm:$0xff]  ;;  %v7288_v41 = vld [vmem:[#allocation28_spill] sm:$0xff] }
 0x4d4   :  { %v2161_v47 = vpop.xlane.xlu1 %2160  ;;  %v2439_v43 = vmul.f32 %v2391_v48, %v1356_v52  ;;  %v2361_v1 = vadd.f32 %v6064_v30, %v2325_v28  ;;  %v2392_v31 = vmax.f32 %v2360_v54, 0.0  ;;  %v1372_v48 = vadd.f32 %v7286_v53, %v6072_v0 }
 0x4d5   :  { %4824 = vrsqrt.f32 %v2229_v5  ;;  %v2230_v61 = vadd.f32 1e-05, %v2198_v16  ;;  %v2199_v57 = vmul.f32 0.0078125, %v2161_v47 }
 0x4d6   :  { %v2163_v24 = vpop.xlane.xlu0 %2162  ;;  %v2462_v4 = vpack.c.bf16 %v2439_v43, %v2438_v56  ;;  %v2393_v50 = vmax.f32 %v2361_v1, 0.0  ;;  %v2440_v14 = vmul.f32 %v2392_v31, %v1361_v12  ;;  %v1377_v12 = vadd.f32 %v7287_v62, %v6072_v0 }
 0x4d7   :  { %4826 = vrsqrt.f32 %v2230_v61  ;;  %v2231_v29 = vadd.f32 1e-05, %v2199_v57  ;;  %v2200_v9 = vmul.f32 0.0078125, %v2163_v24 }
 0x4d8   :  { %4570 = vmatprep.mubr.bf16.mxu1 %v2462_v4  ;;  %v2165_v40 = vpop.xlane.xlu1 %2164  ;;  %v2441_v15 = vmul.f32 %v2393_v50, %v1364_v8  ;;  %v1380_v8 = vadd.f32 %v7288_v41, %v6072_v0 }
 0x4d9   :  { %v4819_v35 = vpop.eup %4818  ;;  %4828 = vrsqrt.f32 %v2231_v29  ;;  %v2232_v19 = vadd.f32 1e-05, %v2200_v9  ;;  %v2201_v25 = vmul.f32 0.0078125, %v2165_v40 }
 0x4da   :  { %v2167_v13 = vpop.xlane.xlu0 %2166  ;;  %v2463_v49 = vpack.c.bf16 %v2441_v15, %v2440_v14  ;;  %v2294_v58 = vmul.f32 %v4819_v35, %v6057_v3 }
 0x4db   :  { %v4821_v36 = vpop.eup %4820  ;;  %4830 = vrsqrt.f32 %v2232_v19  ;;  %v2233_v63 = vadd.f32 1e-05, %v2201_v25  ;;  %v2202_v2 = vmul.f32 0.0078125, %v2167_v13  ;;  %v7289_v25 = vld [vmem:[#allocation31_spill] sm:$0xff] }
 0x4dc   :  { %4571 = vmatmul.mubr.bf16.gmra.mrb[128].mxu1 %v2463_v49  ;;  %v2169_v22 = vpop.xlane.xlu1 %2168  ;;  %v2295_v42 = vmul.f32 %v4821_v36, %v6057_v3  ;;  %v2326_v38 = vmul.f32 %v2294_v58, %v5994_v55  ;;  %v1385_v13 = vadd.f32 %v7289_v25, %v6072_v0  ;;  %v7290_v49 = vld [vmem:[#allocation33_spill] sm:$0xff]  ;;  %v7291_v36 = vld [vmem:[#allocation71_spill] sm:$0xff] }
 0x4dd   :  { %v4823_v45 = vpop.eup %4822  ;;  %4832 = vrsqrt.f32 %v2233_v63  ;;  %v2234_v6 = vadd.f32 1e-05, %v2202_v2  ;;  %v2203_v44 = vmul.f32 0.0078125, %v2169_v22  ;;  %v1388_v58 = vadd.f32 %v7290_v49, %v6072_v0 }
 0x4de   :  { %v2171_v33 = vpop.xlane.xlu0 %2170  ;;  %v2327_v20 = vmul.f32 %v2295_v42, %v5999_v26  ;;  %v2362_v11 = vadd.f32 %v6064_v30, %v2326_v38  ;;  %v2296_v46 = vmul.f32 %v4823_v45, %v6057_v3  ;;  %v1369_v26 = vadd.f32 %v7285_v27, %v6072_v0  ;;  %v7292_v42 = vld [vmem:[#allocation72_spill] sm:$0xff] }
 0x4df   :  { %v4825_v34 = vpop.eup %4824  ;;  %4834 = vrsqrt.f32 %v2234_v6  ;;  %v2235_v59 = vadd.f32 1e-05, %v2203_v44  ;;  %v2204_v10 = vmul.f32 0.0078125, %v2171_v33 }
 0x4e0   :  { %v2173_v51 = vpop.xlane.xlu1 %2172  ;;  %v2363_v18 = vadd.f32 %v6064_v30, %v2327_v20  ;;  %v2394_v21 = vmax.f32 %v2362_v11, 0.0  ;;  %v2297_v55 = vmul.f32 %v4825_v34, %v6057_v3  ;;  %v2328_v17 = vmul.f32 %v2296_v46, %v6004_v37  ;;  %v7293_v34 = vld [vmem:[#allocation73_spill] sm:$0xff] }
 0x4e1   :  { %v4827_v39 = vpop.eup %4826  ;;  %4836 = vrsqrt.f32 %v2235_v59  ;;  %v2236_v23 = vadd.f32 1e-05, %v2204_v10  ;;  %v2205_v52 = vmul.f32 0.0078125, %v2173_v51  ;;  %v7294_v51 = vld [vmem:[#allocation30_spill] sm:$0xff] }
 0x4e2   :  { %v2395_v28 = vmax.f32 %v2363_v18, 0.0  ;;  %v2329_v54 = vmul.f32 %v2297_v55, %v6009_v7  ;;  %v2364_v5 = vadd.f32 %v6064_v30, %v2328_v17  ;;  %v2442_v56 = vmul.f32 %v2394_v21, %v1369_v26  ;;  %v7295_v21 = vld [vmem:[#allocation32_spill] sm:$0xff]  ;;  %v7296_v26 = vld [vmem:[#allocation74_spill] sm:$0xff] }
 0x4e3   :  { %v4829_v16 = vpop.eup %4828  ;;  %4838 = vrsqrt.f32 %v2236_v23  ;;  %v2237_v47 = vadd.f32 1e-05, %v2205_v52  ;;  %v2298_v37 = vmul.f32 %v4827_v39, %v6057_v3  ;;  %v1393_v18 = vadd.f32 %v7294_v51, %v6072_v0 }
 0x4e4   :  { %v2443_v43 = vmul.f32 %v2395_v28, %v1372_v48  ;;  %v2365_v1 = vadd.f32 %v6064_v30, %v2329_v54  ;;  %v2396_v31 = vmax.f32 %v2364_v5, 0.0  ;;  %v2299_v61 = vmul.f32 %v4829_v16, %v6057_v3 }
 0x4e5   :  { %v4831_v57 = vpop.eup %4830  ;;  %4840 = vrsqrt.f32 %v2237_v47  ;;  %v2330_v7 = vmul.f32 %v2298_v37, %v6014_v60  ;;  %v1396_v55 = vadd.f32 %v7295_v21, %v6072_v0 }
 0x4e6   :  { %v2464_v24 = vpack.c.bf16 %v2443_v43, %v2442_v56  ;;  %v2397_v4 = vmax.f32 %v2365_v1, 0.0  ;;  %v2331_v50 = vmul.f32 %v2299_v61, %v6019_v32  ;;  %v2300_v40 = vmul.f32 %v4831_v57, %v6057_v3  ;;  %v7297_v56 = vld [vmem:[#allocation35_spill] sm:$0xff] }
 0x4e7   :  { %v4833_v29 = vpop.eup %4832  ;;  %v2366_v9 = vadd.f32 %v6064_v30, %v2330_v7  ;;  %v2444_v14 = vmul.f32 %v2396_v31, %v1377_v12  ;;  %v1401_v37 = vadd.f32 %v7297_v56, %v6072_v0  ;;  %v7298_v43 = vld [vmem:[#allocation75_spill] sm:$0xff]  ;;  %v7299_v31 = vld [vmem:[#allocation37_spill] sm:$0xff]  ;;  %v7300_v12 = vld [vmem:[#allocation76_spill] sm:$0xff] }
 0x4e8   :  { %4574 = vmatprep.mubr.bf16.mxu1 %v2464_v24  ;;  %v2445_v15 = vmul.f32 %v2397_v4, %v1380_v8  ;;  %v2367_v35 = vadd.f32 %v6064_v30, %v2331_v50  ;;  %v2301_v19 = vmul.f32 %v4833_v29, %v6057_v3  ;;  %v2332_v63 = vmul.f32 %v2300_v40, %v7291_v36  ;;  %v7301_v50 = vld [vmem:[#allocation34_spill] sm:$0xff] }
 0x4e9   :  { %v4835_v60 = vpop.eup %4834  ;;  %v2398_v32 = vmax.f32 %v2366_v9, 0.0  ;;  %v1404_v61 = vadd.f32 %v7299_v31, %v6072_v0  ;;  %v1409_v29 = vadd.f32 %v7301_v50, %v6072_v0  ;;  %v7302_v9 = vld [vmem:[#allocation36_spill] sm:$0xff] }
 0x4ea   :  { %v2465_v2 = vpack.c.bf16 %v2445_v15, %v2444_v14  ;;  %v2399_v22 = vmax.f32 %v2367_v35, 0.0  ;;  %v2333_v38 = vmul.f32 %v2301_v19, %v7292_v42  ;;  %v2302_v45 = vmul.f32 %v4835_v60, %v6057_v3 }
 0x4eb   :  { %v4837_v6 = vpop.eup %4836  ;;  %v2446_v44 = vmul.f32 %v2398_v32, %v1385_v13  ;;  %v2368_v33 = vadd.f32 %v6064_v30, %v2332_v63  ;;  %v1412_v40 = vadd.f32 %v7302_v9, %v6072_v0 }
 0x4ec   :  { %4575 = vmatmul.mubr.bf16.gmra.mrb[132].mxu1 %v2465_v2  ;;  %v2447_v20 = vmul.f32 %v2399_v22, %v1388_v58  ;;  %v2369_v11 = vadd.f32 %v6064_v30, %v2333_v38  ;;  %v2303_v46 = vmul.f32 %v4837_v6, %v6057_v3  ;;  %v2334_v59 = vmul.f32 %v2302_v45, %v7293_v34 }
 0x4ed   :  { %v4839_v10 = vpop.eup %4838  ;;  %v2400_v17 = vmax.f32 %v2368_v33, 0.0 }
 0x4ee   :  { %v2466_v39 = vpack.c.bf16 %v2447_v20, %v2446_v44  ;;  %v2401_v27 = vmax.f32 %v2369_v11, 0.0  ;;  %v2335_v23 = vmul.f32 %v2303_v46, %v7296_v26  ;;  %v2370_v52 = vadd.f32 %v6064_v30, %v2334_v59 }
 0x4ef   :  { %v4841_v53 = vpop.eup %4840  ;;  %v2448_v48 = vmul.f32 %v2400_v17, %v1393_v18  ;;  %v2304_v28 = vmul.f32 %v4839_v10, %v6057_v3 }
 0x4f0   :  { %4578 = vmatprep.mubr.bf16.mxu1 %v2466_v39  ;;  %v2449_v54 = vmul.f32 %v2401_v27, %v1396_v55  ;;  %v2371_v5 = vadd.f32 %v6064_v30, %v2335_v23  ;;  %v2402_v16 = vmax.f32 %v2370_v52, 0.0  ;;  %v2305_v47 = vmul.f32 %v4841_v53, %v6057_v3 }
 0x4f1   :  { %v2336_v1 = vmul.f32 %v2304_v28, %v7298_v43 }
 0x4f2   :  { %v2467_v57 = vpack.c.bf16 %v2449_v54, %v2448_v48  ;;  %v2403_v62 = vmax.f32 %v2371_v5, 0.0  ;;  %v2337_v7 = vmul.f32 %v2305_v47, %v7300_v12  ;;  %v2450_v8 = vmul.f32 %v2402_v16, %v1401_v37 }
 0x4f3   :  { %v2372_v41 = vadd.f32 %v6064_v30, %v2336_v1 }
 0x4f4   :  { %4579 = vmatmul.mubr.bf16.gmra.mrb[136].mxu1 %v2467_v57  ;;  %v2451_v24 = vmul.f32 %v2403_v62, %v1404_v61  ;;  %v2373_v4 = vadd.f32 %v6064_v30, %v2337_v7 }
 0x4f5   :  { %v2404_v3 = vmax.f32 %v2372_v41, 0.0 }
 0x4f6   :  { %v2468_v14 = vpack.c.bf16 %v2451_v24, %v2450_v8  ;;  %v2405_v15 = vmax.f32 %v2373_v4, 0.0 }
 0x4f7   :  { %v2452_v35 = vmul.f32 %v2404_v3, %v1409_v29 }
 0x4f8   :  { %4582 = vmatprep.mubr.bf16.mxu1 %v2468_v14  ;;  %v2453_v19 = vmul.f32 %v2405_v15, %v1412_v40 }
 0x4fa   :  { %v2469_v60 = vpack.c.bf16 %v2453_v19, %v2452_v35  ;;  %v4754_v35 = vld [vmem:[#allocation15] sm:$0xff]  }
 0x4fb   :  { %4586 = vmatprep.subr.bf16.mxu0 %v4754_v35 }
 0x4fc   :  { %4583 = vmatmul.mubr.bf16.gmra.mrb[140].mxu1 %v2469_v60  ;;  %4587 = vmatpush3.bf16.msra.mxu0 %v4754_v35 }
 0x571   :  { %v6229_v25 = vpop.f32.mrb[112].mxu1 }
 0x572   :  { %v6231_v13 = vpop.f32.mrb[113].mxu1 }
 0x573   :  { %2679 = vadd.xlane.f32.xlu0 %v6231_v13  ;;  %v6234_v30 = vpop.f32.mrb[114].mxu1 }
 0x574   :  { %v6236_v49 = vpop.f32.mrb[115].mxu1 }
 0x575   :  { %2681 = vadd.xlane.f32.xlu1 %v6236_v49 }
 0x577   :  { %2683 = vadd.xlane.f32.xlu0 %v6229_v25 }
 0x579   :  { %2685 = vadd.xlane.f32.xlu1 %v6234_v30 }
 0x57f   :  { %v6241_v0 = vpop.f32.mrb[116].mxu1 }
 0x580   :  { %v6243_v58 = vpop.f32.mrb[117].mxu1 }
 0x581   :  { %2687 = vadd.xlane.f32.xlu0 %v6243_v58  ;;  %v6246_v32 = vpop.f32.mrb[118].mxu1 }
 0x582   :  { %v6248_v36 = vpop.f32.mrb[119].mxu1 }
 0x583   :  { %2689 = vadd.xlane.f32.xlu1 %v6248_v36 }
 0x585   :  { %2691 = vadd.xlane.f32.xlu0 %v6241_v0 }
 0x587   :  { %2693 = vadd.xlane.f32.xlu1 %v6246_v32 }
 0x58f   :  { %v6253_v63 = vpop.f32.mrb[120].mxu1 }
 0x590   :  { %v6255_v2 = vpop.f32.mrb[121].mxu1 }
 0x591   :  { %2695 = vadd.xlane.f32.xlu0 %v6255_v2  ;;  %v6258_v22 = vpop.f32.mrb[122].mxu1 }
 0x592   :  { %v6260_v42 = vpop.f32.mrb[123].mxu1 }
 0x593   :  { %2697 = vadd.xlane.f32.xlu1 %v6260_v42 }
 0x595   :  { %2699 = vadd.xlane.f32.xlu0 %v6253_v63 }
 0x597   :  { %2701 = vadd.xlane.f32.xlu1 %v6258_v22 }
 0x59f   :  { %v6265_v38 = vpop.f32.mrb[124].mxu1 }
 0x5a0   :  { %v6267_v45 = vpop.f32.mrb[125].mxu1 }
 0x5a1   :  { %2703 = vadd.xlane.f32.xlu0 %v6267_v45  ;;  %v6270_v6 = vpop.f32.mrb[126].mxu1 }
 0x5a2   :  { %v6272_v44 = vpop.f32.mrb[127].mxu1 }
 0x5a3   :  { %2705 = vadd.xlane.f32.xlu1 %v6272_v44 }
 0x5a5   :  { %2707 = vadd.xlane.f32.xlu0 %v6265_v38 }
 0x5a7   :  { %2709 = vadd.xlane.f32.xlu1 %v6270_v6 }
 0x5af   :  { %v6277_v33 = vpop.f32.mrb[128].mxu1 }
 0x5b0   :  { %v6279_v20 = vpop.f32.mrb[129].mxu1 }
 0x5b1   :  { %2711 = vadd.xlane.f32.xlu0 %v6279_v20  ;;  %v6282_v11 = vpop.f32.mrb[130].mxu1 }
 0x5b2   :  { %v6284_v46 = vpop.f32.mrb[131].mxu1 }
 0x5b3   :  { %2713 = vadd.xlane.f32.xlu1 %v6284_v46 }
 0x5b5   :  { %2715 = vadd.xlane.f32.xlu0 %v6277_v33 }
 0x5b7   :  { %2717 = vadd.xlane.f32.xlu1 %v6282_v11 }
 0x5bf   :  { %v6289_v34 = vpop.f32.mrb[132].mxu1 }
 0x5c0   :  { %v6291_v59 = vpop.f32.mrb[133].mxu1 }
 0x5c1   :  { %2719 = vadd.xlane.f32.xlu0 %v6291_v59  ;;  %v6294_v10 = vpop.f32.mrb[134].mxu1 }
 0x5c2   :  { %v6296_v51 = vpop.f32.mrb[135].mxu1 }
 0x5c3   :  { %2721 = vadd.xlane.f32.xlu1 %v6296_v51 }
 0x5c5   :  { %2723 = vadd.xlane.f32.xlu0 %v6289_v34 }
 0x5c7   :  { %2725 = vadd.xlane.f32.xlu1 %v6294_v10  ;;  %v6301_v18 = vpop.f32.mrb[136].mxu1 }
 0x5c8   :  { %v6303_v21 = vpop.f32.mrb[137].mxu1 }
 0x5c9   :  { %2727 = vadd.xlane.f32.xlu0 %v6303_v21  ;;  %v6306_v55 = vpop.f32.mrb[138].mxu1 }
 0x5ca   :  { %v6308_v17 = vpop.f32.mrb[139].mxu1 }
 0x5cb   :  { %2729 = vadd.xlane.f32.xlu1 %v6308_v17 }
 0x5cd   :  { %2731 = vadd.xlane.f32.xlu0 %v6301_v18 }
 0x5cf   :  { %2733 = vadd.xlane.f32.xlu1 %v6306_v55  ;;  %v6313_v39 = vpop.f32.mrb[140].mxu1 }
 0x5d0   :  { %v6315_v27 = vpop.f32.mrb[141].mxu1 }
 0x5d1   :  { %2735 = vadd.xlane.f32.xlu0 %v6315_v27  ;;  %v6318_v26 = vpop.f32.mrb[142].mxu1 }
 0x5d2   :  { %v6320_v23 = vpop.f32.mrb[143].mxu1 }
 0x5d3   :  { %2737 = vadd.xlane.f32.xlu1 %v6320_v23 }
 0x5d5   :  { %2739 = vadd.xlane.f32.xlu0 %v6313_v39 }
 0x5d7   :  { %2741 = vadd.xlane.f32.xlu1 %v6318_v26 }
 0x600   :  { %v2680_v52 = vpop.xlane.xlu0 %2679 }
 0x601   :  { %v2743_v53 = vmul.f32 0.0078125, %v2680_v52  ;;  %v4757_v52 = vld [vmem:[#allocation15 + $0x18] sm:$0xff]  }
 0x602   :  { %v2682_v48 = vpop.xlane.xlu1 %2681 }
 0x603   :  { %v2744_v28 = vmul.f32 0.0078125, %v2682_v48  ;;  %v6326_v54 = vsub.f32 %v6231_v13, %v2743_v53  ;;  %v4755_v13 = vld [vmem:[#allocation15 + $0x8] sm:$0xff]  }
 0x604   :  { %v2684_v5 = vpop.xlane.xlu0 %2683  ;;  %4588 = vmatprep.subr.bf16.mxu0 %v4755_v13 }
 0x605   :  { %v2745_v16 = vmul.f32 0.0078125, %v2684_v5  ;;  %v2807_v47 = vmul.f32 %v6326_v54, %v6326_v54  ;;  %v6331_v56 = vsub.f32 %v6236_v49, %v2744_v28  ;;  %4589 = vmatpush3.bf16.msra.mxu0 %v4755_v13 }
 0x606   :  { %v2686_v37 = vpop.xlane.xlu1 %2685 }
 0x607   :  { %v6334_v43 = vsub.f32 %v6229_v25, %v2745_v16  ;;  %v2746_v1 = vmul.f32 0.0078125, %v2686_v37  ;;  %2839 = vadd.xlane.f32.xlu0 %v2807_v47  ;;  %v2808_v31 = vmul.f32 %v6331_v56, %v6331_v56 }
 0x609   :  { %v6339_v61 = vsub.f32 %v6234_v30, %v2746_v1  ;;  %2841 = vadd.xlane.f32.xlu1 %v2808_v31  ;;  %v2809_v57 = vmul.f32 %v6334_v43, %v6334_v43  ;;  %v4756_v30 = vld [vmem:[#allocation15 + $0x10] sm:$0xff]   ;;  %v4758_v1 = vld [vmem:[#allocation15 + $0x20] sm:$0xff]  }
 0x60a   :  { %4590 = vmatprep.subr.bf16.mxu0 %v4756_v30 }
 0x60b   :  { %2843 = vadd.xlane.f32.xlu0 %v2809_v57  ;;  %v2810_v62 = vmul.f32 %v6339_v61, %v6339_v61  ;;  %4591 = vmatpush3.bf16.msra.mxu0 %v4756_v30  ;;  %v4759_v57 = vld [vmem:[#allocation15 + $0x28] sm:$0xff]  }
 0x60c   :  { %4592 = vmatprep.subr.bf16.mxu0 %v4757_v52 }
 0x60d   :  { %2845 = vadd.xlane.f32.xlu1 %v2810_v62  ;;  %v4760_v62 = vld [vmem:[#allocation15 + $0x30] sm:$0xff]  }
 0x60e   :  { %v2688_v12 = vpop.xlane.xlu0 %2687 }
 0x60f   :  { %v2747_v7 = vmul.f32 0.0078125, %v2688_v12  ;;  %4593 = vmatpush3.bf16.msra.mxu0 %v4757_v52  ;;  %v4761_v12 = vld [vmem:[#allocation15 + $0x38] sm:$0xff]  }
 0x610   :  { %v2690_v41 = vpop.xlane.xlu1 %2689  ;;  %4594 = vmatprep.subr.bf16.mxu0 %v4758_v1 }
 0x611   :  { %v6346_v8 = vsub.f32 %v6243_v58, %v2747_v7  ;;  %v2748_v24 = vmul.f32 0.0078125, %v2690_v41 }
 0x612   :  { %v2692_v4 = vpop.xlane.xlu0 %2691 }
 0x613   :  { %v6349_v3 = vsub.f32 %v6248_v36, %v2748_v24  ;;  %v2749_v50 = vmul.f32 0.0078125, %v2692_v4  ;;  %v2811_v29 = vmul.f32 %v6346_v8, %v6346_v8  ;;  %4595 = vmatpush3.bf16.msra.mxu0 %v4758_v1 }
 0x614   :  { %v2694_v9 = vpop.xlane.xlu1 %2693  ;;  %4596 = vmatprep.subr.bf16.mxu0 %v4759_v57 }
 0x615   :  { %v6354_v40 = vsub.f32 %v6241_v0, %v2749_v50  ;;  %v2750_v14 = vmul.f32 0.0078125, %v2694_v9  ;;  %2847 = vadd.xlane.f32.xlu0 %v2811_v29  ;;  %v2812_v15 = vmul.f32 %v6349_v3, %v6349_v3 }
 0x617   :  { %v6359_v19 = vsub.f32 %v6246_v32, %v2750_v14  ;;  %2849 = vadd.xlane.f32.xlu1 %v2812_v15  ;;  %v2813_v60 = vmul.f32 %v6354_v40, %v6354_v40  ;;  %4597 = vmatpush3.bf16.msra.mxu0 %v4759_v57 }
 0x618   :  { %4598 = vmatprep.subr.bf16.mxu0 %v4760_v62 }
 0x619   :  { %2851 = vadd.xlane.f32.xlu0 %v2813_v60  ;;  %v2814_v25 = vmul.f32 %v6359_v19, %v6359_v19 }
 0x61b   :  { %2853 = vadd.xlane.f32.xlu1 %v2814_v25  ;;  %4599 = vmatpush3.bf16.msra.mxu0 %v4760_v62 }
 0x61c   :  { %4600 = vmatprep.subr.bf16.mxu0 %v4761_v12 }
 0x61e   :  { %v2696_v49 = vpop.xlane.xlu0 %2695 }
 0x61f   :  { %v2751_v0 = vmul.f32 0.0078125, %v2696_v49  ;;  %4601 = vmatpush3.bf16.msra.mxu0 %v4761_v12 }
 0x620   :  { %v2698_v58 = vpop.xlane.xlu1 %2697 }
 0x621   :  { %v6366_v32 = vsub.f32 %v6255_v2, %v2751_v0  ;;  %v2752_v36 = vmul.f32 0.0078125, %v2698_v58 }
 0x622   :  { %v2700_v53 = vpop.xlane.xlu0 %2699 }
 0x623   :  { %v6369_v48 = vsub.f32 %v6260_v42, %v2752_v36  ;;  %v2753_v28 = vmul.f32 0.0078125, %v2700_v53  ;;  %v2815_v5 = vmul.f32 %v6366_v32, %v6366_v32 }
 0x624   :  { %v2702_v16 = vpop.xlane.xlu1 %2701 }
 0x625   :  { %v6374_v47 = vsub.f32 %v6253_v63, %v2753_v28  ;;  %v2754_v37 = vmul.f32 0.0078125, %v2702_v16  ;;  %2855 = vadd.xlane.f32.xlu0 %v2815_v5  ;;  %v2816_v2 = vmul.f32 %v6369_v48, %v6369_v48 }
 0x627   :  { %v6379_v31 = vsub.f32 %v6258_v22, %v2754_v37  ;;  %2857 = vadd.xlane.f32.xlu1 %v2816_v2  ;;  %v2817_v42 = vmul.f32 %v6374_v47, %v6374_v47 }
 0x629   :  { %2859 = vadd.xlane.f32.xlu0 %v2817_v42  ;;  %v2818_v63 = vmul.f32 %v6379_v31, %v6379_v31 }
 0x62b   :  { %2861 = vadd.xlane.f32.xlu1 %v2818_v63 }
 0x62e   :  { %v2704_v7 = vpop.xlane.xlu0 %2703 }
 0x62f   :  { %v2755_v41 = vmul.f32 0.0078125, %v2704_v7 }
 0x630   :  { %v2706_v22 = vpop.xlane.xlu1 %2705 }
 0x631   :  { %v6386_v24 = vsub.f32 %v6267_v45, %v2755_v41  ;;  %v2756_v4 = vmul.f32 0.0078125, %v2706_v22 }
 0x632   :  { %v2708_v50 = vpop.xlane.xlu0 %2707 }
 0x633   :  { %v6389_v29 = vsub.f32 %v6272_v44, %v2756_v4  ;;  %v2757_v9 = vmul.f32 0.0078125, %v2708_v50  ;;  %v2819_v14 = vmul.f32 %v6386_v24, %v6386_v24 }
 0x634   :  { %v2710_v15 = vpop.xlane.xlu1 %2709 }
 0x635   :  { %v6394_v35 = vsub.f32 %v6265_v38, %v2757_v9  ;;  %v2758_v60 = vmul.f32 0.0078125, %v2710_v15  ;;  %2863 = vadd.xlane.f32.xlu0 %v2819_v14  ;;  %v2820_v45 = vmul.f32 %v6389_v29, %v6389_v29 }
 0x637   :  { %v6399_v25 = vsub.f32 %v6270_v6, %v2758_v60  ;;  %2865 = vadd.xlane.f32.xlu1 %v2820_v45  ;;  %v2821_v44 = vmul.f32 %v6394_v35, %v6394_v35 }
 0x639   :  { %2867 = vadd.xlane.f32.xlu0 %v2821_v44  ;;  %v2822_v13 = vmul.f32 %v6399_v25, %v6399_v25 }
 0x63b   :  { %2869 = vadd.xlane.f32.xlu1 %v2822_v13 }
 0x63e   :  { %v2712_v30 = vpop.xlane.xlu0 %2711 }
 0x63f   :  { %v2759_v38 = vmul.f32 0.0078125, %v2712_v30 }
 0x640   :  { %v2714_v49 = vpop.xlane.xlu1 %2713 }
 0x641   :  { %v6406_v0 = vsub.f32 %v6279_v20, %v2759_v38  ;;  %v2760_v58 = vmul.f32 0.0078125, %v2714_v49 }
 0x642   :  { %v2716_v36 = vpop.xlane.xlu0 %2715 }
 0x643   :  { %v6409_v6 = vsub.f32 %v6284_v46, %v2760_v58  ;;  %v2761_v52 = vmul.f32 0.0078125, %v2716_v36  ;;  %v2823_v53 = vmul.f32 %v6406_v0, %v6406_v0 }
 0x644   :  { %v2718_v28 = vpop.xlane.xlu1 %2717 }
 0x645   :  { %v6414_v5 = vsub.f32 %v6277_v33, %v2761_v52  ;;  %v2762_v16 = vmul.f32 0.0078125, %v2718_v28  ;;  %2871 = vadd.xlane.f32.xlu0 %v2823_v53  ;;  %v2824_v37 = vmul.f32 %v6409_v6, %v6409_v6 }
 0x647   :  { %v6419_v20 = vsub.f32 %v6282_v11, %v2762_v16  ;;  %2873 = vadd.xlane.f32.xlu1 %v2824_v37  ;;  %v2825_v46 = vmul.f32 %v6414_v5, %v6414_v5 }
 0x649   :  { %2875 = vadd.xlane.f32.xlu0 %v2825_v46  ;;  %v2826_v2 = vmul.f32 %v6419_v20, %v6419_v20 }
 0x64b   :  { %2877 = vadd.xlane.f32.xlu1 %v2826_v2 }
 0x64e   :  { %v2720_v1 = vpop.xlane.xlu0 %2719 }
 0x64f   :  { %v2763_v33 = vmul.f32 0.0078125, %v2720_v1 }
 0x650   :  { %v2722_v42 = vpop.xlane.xlu1 %2721 }
 0x651   :  { %v6426_v63 = vsub.f32 %v6291_v59, %v2763_v33  ;;  %v2764_v57 = vmul.f32 0.0078125, %v2722_v42 }
 0x652   :  { %v2724_v62 = vpop.xlane.xlu0 %2723 }
 0x653   :  { %v6429_v11 = vsub.f32 %v6296_v51, %v2764_v57  ;;  %v2765_v12 = vmul.f32 0.0078125, %v2724_v62  ;;  %v2827_v7 = vmul.f32 %v6426_v63, %v6426_v63 }
 0x654   :  { %v2726_v41 = vpop.xlane.xlu1 %2725 }
 0x655   :  { %v6434_v22 = vsub.f32 %v6289_v34, %v2765_v12  ;;  %v2766_v4 = vmul.f32 0.0078125, %v2726_v41  ;;  %2879 = vadd.xlane.f32.xlu0 %v2827_v7  ;;  %v2828_v50 = vmul.f32 %v6429_v11, %v6429_v11 }
 0x656   :  { %v2728_v59 = vpop.xlane.xlu0 %2727 }
 0x657   :  { %v6439_v9 = vsub.f32 %v6294_v10, %v2766_v4  ;;  %v2767_v14 = vmul.f32 0.0078125, %v2728_v59  ;;  %2881 = vadd.xlane.f32.xlu1 %v2828_v50  ;;  %v2829_v51 = vmul.f32 %v6434_v22, %v6434_v22 }
 0x658   :  { %v2730_v15 = vpop.xlane.xlu1 %2729 }
 0x659   :  { %v6444_v60 = vsub.f32 %v6303_v21, %v2767_v14  ;;  %v2768_v34 = vmul.f32 0.0078125, %v2730_v15  ;;  %2883 = vadd.xlane.f32.xlu0 %v2829_v51  ;;  %v2830_v45 = vmul.f32 %v6439_v9, %v6439_v9 }
 0x65a   :  { %v2732_v44 = vpop.xlane.xlu0 %2731 }
 0x65b   :  { %v6449_v13 = vsub.f32 %v6308_v17, %v2768_v34  ;;  %v2769_v10 = vmul.f32 0.0078125, %v2732_v44  ;;  %2885 = vadd.xlane.f32.xlu1 %v2830_v45  ;;  %v2831_v30 = vmul.f32 %v6444_v60, %v6444_v60  ;;  %v7303_v45 = vld [vmem:[#allocation21_spill] sm:$0xff] }
 0x65c   :  { %v2734_v38 = vpop.xlane.xlu1 %2733  ;;  %v3001_v44 = vsub.s32 5, %v7303_v45 }
 0x65d   :  { %v6454_v49 = vsub.f32 %v6301_v18, %v2769_v10  ;;  %v2770_v21 = vmul.f32 0.0078125, %v2734_v38  ;;  %2887 = vadd.xlane.f32.xlu0 %v2831_v30  ;;  %v2832_v58 = vmul.f32 %v6449_v13, %v6449_v13  ;;  %v4987_v30 = vld [vmem:[#allocation6] sm:$0xff] }
 0x65e   :  { %v2736_v36 = vpop.xlane.xlu0 %2735  ;;  %v6486_v38 = vrot.slane %v4987_v30, %v3001_v44  ;;  %v7305_v44 = vld [vmem:[#allocation39_spill] sm:$0xff] }
 0x65f   :  { %v6459_v52 = vsub.f32 %v6306_v55, %v2770_v21  ;;  %v2771_v17 = vmul.f32 0.0078125, %v2736_v36  ;;  %2889 = vadd.xlane.f32.xlu1 %v2832_v58  ;;  %v2833_v53 = vmul.f32 %v6454_v49, %v6454_v49  ;;  %v3069_v21 = vsub.s32 6, %v7303_v45 }
 0x660   :  { %v2738_v28 = vpop.xlane.xlu1 %2737 }
 0x661   :  { %v6464_v16 = vsub.f32 %v6315_v27, %v2771_v17  ;;  %v2772_v18 = vmul.f32 0.0078125, %v2738_v28  ;;  %2891 = vadd.xlane.f32.xlu0 %v2833_v53  ;;  %v2834_v37 = vmul.f32 %v6459_v52, %v6459_v52 }
 0x662   :  { %v2740_v46 = vpop.xlane.xlu0 %2739 }
 0x663   :  { %v6469_v2 = vsub.f32 %v6320_v23, %v2772_v18  ;;  %v2773_v55 = vmul.f32 0.0078125, %v2740_v46  ;;  %2893 = vadd.xlane.f32.xlu1 %v2834_v37  ;;  %v2835_v1 = vmul.f32 %v6464_v16, %v6464_v16  ;;  %v6490_v18 = vrot.slane %v4987_v30, %v3069_v21 }
 0x664   :  { %v2742_v33 = vpop.xlane.xlu1 %2741 }
 0x665   :  { %v6474_v42 = vsub.f32 %v6313_v39, %v2773_v55  ;;  %v2774_v27 = vmul.f32 0.0078125, %v2742_v33  ;;  %2895 = vadd.xlane.f32.xlu0 %v2835_v1  ;;  %v2836_v57 = vmul.f32 %v6469_v2, %v6469_v2 }
 0x667   :  { %v6479_v62 = vsub.f32 %v6318_v26, %v2774_v27  ;;  %2897 = vadd.xlane.f32.xlu1 %v2836_v57  ;;  %v2837_v23 = vmul.f32 %v6474_v42, %v6474_v42 }
 0x669   :  { %2899 = vadd.xlane.f32.xlu0 %v2837_v23  ;;  %v2838_v12 = vmul.f32 %v6479_v62, %v6479_v62 }
 0x66b   :  { %2901 = vadd.xlane.f32.xlu1 %v2838_v12 }
 0x694   :  { %v2840_v7 = vpop.xlane.xlu0 %2839 }
 0x695   :  { %v2903_v39 = vmul.f32 0.0078125, %v2840_v7 }
 0x696   :  { %v2842_v41 = vpop.xlane.xlu1 %2841 }
 0x697   :  { %v2935_v4 = vadd.f32 1e-05, %v2903_v39  ;;  %v2904_v50 = vmul.f32 0.0078125, %v2842_v41 }
 0x698   :  { %v2844_v59 = vpop.xlane.xlu0 %2843 }
 0x699   :  { %4842 = vrsqrt.f32 %v2935_v4  ;;  %v2936_v14 = vadd.f32 1e-05, %v2904_v50  ;;  %v2905_v51 = vmul.f32 0.0078125, %v2844_v59 }
 0x69a   :  { %v2846_v26 = vpop.xlane.xlu1 %2845 }
 0x69b   :  { %4844 = vrsqrt.f32 %v2936_v14  ;;  %v2937_v15 = vadd.f32 1e-05, %v2905_v51  ;;  %v2906_v34 = vmul.f32 0.0078125, %v2846_v26 }
 0x69d   :  { %4846 = vrsqrt.f32 %v2937_v15  ;;  %v2938_v10 = vadd.f32 1e-05, %v2906_v34  ;;  %v7304_v34 = vld [vmem:[#allocation54_spill] sm:$0xff] }
 0x69f   :  { %4848 = vrsqrt.f32 %v2938_v10  ;;  %v1518_v10 = vadd.f32 %v7305_v44, %v7304_v34 }
 0x6a2   :  { %v2848_v58 = vpop.xlane.xlu0 %2847 }
 0x6a3   :  { %v4843_v36 = vpop.eup %4842  ;;  %v2907_v17 = vmul.f32 0.0078125, %v2848_v58 }
 0x6a4   :  { %v2850_v53 = vpop.xlane.xlu1 %2849  ;;  %v3003_v28 = vmul.f32 %v4843_v36, %v6486_v38 }
 0x6a5   :  { %v4845_v37 = vpop.eup %4844  ;;  %v2939_v46 = vadd.f32 1e-05, %v2907_v17  ;;  %v2908_v55 = vmul.f32 0.0078125, %v2850_v53 }
 0x6a6   :  { %v2852_v1 = vpop.xlane.xlu0 %2851  ;;  %v3004_v33 = vmul.f32 %v4845_v37, %v6486_v38  ;;  %v3035_v27 = vmul.f32 %v3003_v28, %v6326_v54 }
 0x6a7   :  { %v4847_v57 = vpop.eup %4846  ;;  %4850 = vrsqrt.f32 %v2939_v46  ;;  %v2940_v23 = vadd.f32 1e-05, %v2908_v55  ;;  %v2909_v12 = vmul.f32 0.0078125, %v2852_v1  ;;  %v7307_v46 = vld [vmem:[#allocation38_spill] sm:$0xff]  ;;  %v7308_v1 = vld [vmem:[#allocation40_spill] sm:$0xff] }
 0x6a8   :  { %v3005_v7 = vmul.f32 %v4847_v57, %v6486_v38  ;;  %v2854_v39 = vpop.xlane.xlu1 %2853  ;;  %v3036_v41 = vmul.f32 %v3004_v33, %v6331_v56  ;;  %v3071_v4 = vadd.f32 %v6490_v18, %v3035_v27  ;;  %v7306_v56 = vld [vmem:[#allocation41_spill] sm:$0xff]  ;;  %v1526_v55 = vadd.f32 %v7307_v46, %v7304_v34 }
 0x6a9   :  { %v4849_v50 = vpop.eup %4848  ;;  %4852 = vrsqrt.f32 %v2940_v23  ;;  %v2941_v59 = vadd.f32 1e-05, %v2909_v12  ;;  %v2910_v14 = vmul.f32 0.0078125, %v2854_v39  ;;  %v1521_v21 = vadd.f32 %v7306_v56, %v7304_v34 }
 0x6aa   :  { %v3037_v51 = vmul.f32 %v3005_v7, %v6334_v43  ;;  %v3006_v26 = vmul.f32 %v4849_v50, %v6486_v38  ;;  %v3072_v54 = vadd.f32 %v6490_v18, %v3036_v41  ;;  %v3103_v15 = vmax.f32 %v3071_v4, 0.0 }
 0x6ab   :  { %4854 = vrsqrt.f32 %v2941_v59  ;;  %v2942_v30 = vadd.f32 1e-05, %v2910_v14  ;;  %v1529_v33 = vadd.f32 %v7308_v1, %v7304_v34  ;;  %v7310_v1 = vld [vmem:[#allocation45_spill] sm:$0xff] }
 0x6ac   :  { %v3038_v58 = vmul.f32 %v3006_v26, %v6339_v61  ;;  %v3104_v36 = vmax.f32 %v3072_v54, 0.0  ;;  %v3073_v17 = vadd.f32 %v6490_v18, %v3037_v51  ;;  %v3151_v43 = vmul.f32 %v3103_v15, %v1518_v10 }
 0x6ad   :  { %4856 = vrsqrt.f32 %v2942_v30 }
 0x6ae   :  { %v3152_v53 = vmul.f32 %v3104_v36, %v1521_v21  ;;  %v3074_v28 = vadd.f32 %v6490_v18, %v3038_v58  ;;  %v3105_v37 = vmax.f32 %v3073_v17, 0.0 }
 0x6b0   :  { %v3183_v27 = vpack.c.bf16 %v3152_v53, %v3151_v43  ;;  %v3106_v57 = vmax.f32 %v3074_v28, 0.0  ;;  %v3153_v61 = vmul.f32 %v3105_v37, %v1526_v55  ;;  %v7309_v37 = vld [vmem:[#allocation43_spill] sm:$0xff] }
 0x6b1   :  { %v4851_v23 = vpop.eup %4850  ;;  %v1534_v46 = vadd.f32 %v7309_v37, %v7304_v34 }
 0x6b2   :  { %v2856_v12 = vpop.xlane.xlu0 %2855  ;;  %4602 = vmatprep.mubr.bf16.mxu0 %v3183_v27  ;;  %v3154_v7 = vmul.f32 %v3106_v57, %v1529_v33  ;;  %v3007_v39 = vmul.f32 %v4851_v23, %v6486_v38  ;;  %v1537_v33 = vadd.f32 %v7310_v1, %v7304_v34 }
 0x6b3   :  { %v4853_v41 = vpop.eup %4852  ;;  %v2911_v4 = vmul.f32 0.0078125, %v2856_v12 }
 0x6b4   :  { %v2858_v50 = vpop.xlane.xlu1 %2857  ;;  %v3184_v59 = vpack.c.bf16 %v3154_v7, %v3153_v61  ;;  %v3008_v14 = vmul.f32 %v4853_v41, %v6486_v38  ;;  %v3039_v51 = vmul.f32 %v3007_v39, %v6346_v8  ;;  %v7311_v41 = vld [vmem:[#allocation42_spill] sm:$0xff] }
 0x6b5   :  { %v4855_v26 = vpop.eup %4854  ;;  %v2943_v54 = vadd.f32 1e-05, %v2911_v4  ;;  %v2912_v15 = vmul.f32 0.0078125, %v2858_v50  ;;  %v1542_v4 = vadd.f32 %v7311_v41, %v7304_v34  ;;  %v7312_v50 = vld [vmem:[#allocation44_spill] sm:$0xff] }
 0x6b6   :  { %v2860_v44 = vpop.xlane.xlu0 %2859  ;;  %4603 = vmatmul.mubr.bf16.vlgmr.msra.gmra.mrb[112].mxu0 %v3184_v59  ;;  %v3040_v10 = vmul.f32 %v3008_v14, %v6349_v3  ;;  %v3075_v30 = vadd.f32 %v6490_v18, %v3039_v51  ;;  %v3009_v56 = vmul.f32 %v4855_v26, %v6486_v38  ;;  %v1545_v59 = vadd.f32 %v7312_v50, %v7304_v34 }
 0x6b7   :  { %v4857_v21 = vpop.eup %4856  ;;  %4858 = vrsqrt.f32 %v2943_v54  ;;  %v2944_v58 = vadd.f32 1e-05, %v2912_v15  ;;  %v2913_v36 = vmul.f32 0.0078125, %v2860_v44 }
 0x6b8   :  { %v2862_v17 = vpop.xlane.xlu1 %2861  ;;  %v3076_v43 = vadd.f32 %v6490_v18, %v3040_v10  ;;  %v3107_v53 = vmax.f32 %v3075_v30, 0.0  ;;  %v3010_v8 = vmul.f32 %v4857_v21, %v6486_v38  ;;  %v3041_v28 = vmul.f32 %v3009_v56, %v6354_v40 }
 0x6b9   :  { %4860 = vrsqrt.f32 %v2944_v58  ;;  %v2945_v3 = vadd.f32 1e-05, %v2913_v36  ;;  %v2914_v55 = vmul.f32 0.0078125, %v2862_v17 }
 0x6ba   :  { %v3108_v27 = vmax.f32 %v3076_v43, 0.0  ;;  %v3042_v57 = vmul.f32 %v3010_v8, %v6359_v19  ;;  %v3077_v23 = vadd.f32 %v6490_v18, %v3041_v28  ;;  %v3155_v61 = vmul.f32 %v3107_v53, %v1534_v46 }
 0x6bb   :  { %4862 = vrsqrt.f32 %v2945_v3  ;;  %v2946_v12 = vadd.f32 1e-05, %v2914_v55 }
 0x6bc   :  { %v3156_v7 = vmul.f32 %v3108_v27, %v1537_v33  ;;  %v3078_v40 = vadd.f32 %v6490_v18, %v3042_v57  ;;  %v3109_v39 = vmax.f32 %v3077_v23, 0.0 }
 0x6bd   :  { %4864 = vrsqrt.f32 %v2946_v12  ;;  %v7313_v12 = vld [vmem:[#allocation47_spill] sm:$0xff] }
 0x6be   :  { %v3185_v14 = vpack.c.bf16 %v3156_v7, %v3155_v61  ;;  %v3110_v51 = vmax.f32 %v3078_v40, 0.0  ;;  %v3157_v19 = vmul.f32 %v3109_v39, %v1542_v4  ;;  %v1550_v61 = vadd.f32 %v7313_v12, %v7304_v34  ;;  %v7314_v40 = vld [vmem:[#allocation49_spill] sm:$0xff] }
 0x6bf   :  { %v1553_v39 = vadd.f32 %v7314_v40, %v7304_v34 }
 0x6c0   :  { %4606 = vmatprep.mubr.bf16.mxu0 %v3185_v14  ;;  %v3158_v26 = vmul.f32 %v3110_v51, %v1545_v59 }
 0x6c1   :  { %v4859_v54 = vpop.eup %4858 }
 0x6c2   :  { %v2864_v15 = vpop.xlane.xlu0 %2863  ;;  %v3186_v44 = vpack.c.bf16 %v3158_v26, %v3157_v19  ;;  %v3011_v10 = vmul.f32 %v4859_v54, %v6486_v38  ;;  %v7315_v26 = vld [vmem:[#allocation46_spill] sm:$0xff] }
 0x6c3   :  { %v4861_v30 = vpop.eup %4860  ;;  %v2915_v56 = vmul.f32 0.0078125, %v2864_v15  ;;  %v1558_v54 = vadd.f32 %v7315_v26, %v7304_v34  ;;  %v7316_v15 = vld [vmem:[#allocation48_spill] sm:$0xff] }
 0x6c4   :  { %4607 = vmatmul.mubr.bf16.gmra.mrb[116].mxu0 %v3186_v44  ;;  %v2866_v21 = vpop.xlane.xlu1 %2865  ;;  %v3012_v58 = vmul.f32 %v4861_v30, %v6486_v38  ;;  %v3043_v36 = vmul.f32 %v3011_v10, %v6366_v32  ;;  %v1561_v44 = vadd.f32 %v7316_v15, %v7304_v34 }
 0x6c5   :  { %v4863_v17 = vpop.eup %4862  ;;  %v2947_v43 = vadd.f32 1e-05, %v2915_v56  ;;  %v2916_v53 = vmul.f32 0.0078125, %v2866_v21 }
 0x6c6   :  { %v2868_v8 = vpop.xlane.xlu0 %2867  ;;  %v3044_v28 = vmul.f32 %v3012_v58, %v6369_v48  ;;  %v3079_v37 = vadd.f32 %v6490_v18, %v3043_v36  ;;  %v3013_v46 = vmul.f32 %v4863_v17, %v6486_v38 }
 0x6c7   :  { %v4865_v3 = vpop.eup %4864  ;;  %4866 = vrsqrt.f32 %v2947_v43  ;;  %v2948_v55 = vadd.f32 1e-05, %v2916_v53  ;;  %v2917_v1 = vmul.f32 0.0078125, %v2868_v8 }
 0x6c8   :  { %v2870_v33 = vpop.xlane.xlu1 %2869  ;;  %v3080_v27 = vadd.f32 %v6490_v18, %v3044_v28  ;;  %v3111_v57 = vmax.f32 %v3079_v37, 0.0  ;;  %v3014_v32 = vmul.f32 %v4865_v3, %v6486_v38  ;;  %v3045_v23 = vmul.f32 %v3013_v46, %v6374_v47 }
 0x6c9   :  { %4868 = vrsqrt.f32 %v2948_v55  ;;  %v2949_v48 = vadd.f32 1e-05, %v2917_v1  ;;  %v2918_v7 = vmul.f32 0.0078125, %v2870_v33 }
 0x6ca   :  { %v3112_v41 = vmax.f32 %v3080_v27, 0.0  ;;  %v3046_v4 = vmul.f32 %v3014_v32, %v6379_v31  ;;  %v3081_v50 = vadd.f32 %v6490_v18, %v3045_v23  ;;  %v3159_v14 = vmul.f32 %v3111_v57, %v1550_v61 }
 0x6cb   :  { %4870 = vrsqrt.f32 %v2949_v48  ;;  %v2950_v59 = vadd.f32 1e-05, %v2918_v7 }
 0x6cc   :  { %v3160_v51 = vmul.f32 %v3112_v41, %v1553_v39  ;;  %v3082_v47 = vadd.f32 %v6490_v18, %v3046_v4  ;;  %v3113_v19 = vmax.f32 %v3081_v50, 0.0  ;;  %v7317_v39 = vld [vmem:[#allocation51_spill] sm:$0xff]  ;;  %v7318_v50 = vld [vmem:[#allocation53_spill] sm:$0xff] }
 0x6cd   :  { %4872 = vrsqrt.f32 %v2950_v59  ;;  %v1566_v41 = vadd.f32 %v7317_v39, %v7304_v34  ;;  %v1569_v59 = vadd.f32 %v7318_v50, %v7304_v34  ;;  %v7322_v50 = vld [vmem:[#allocation58_spill] sm:$0xff] }
 0x6ce   :  { %v3187_v10 = vpack.c.bf16 %v3160_v51, %v3159_v14  ;;  %v3114_v30 = vmax.f32 %v3082_v47, 0.0  ;;  %v3161_v31 = vmul.f32 %v3113_v19, %v1558_v54 }
 0x6d0   :  { %4610 = vmatprep.mubr.bf16.mxu0 %v3187_v10  ;;  %v3162_v56 = vmul.f32 %v3114_v30, %v1561_v44  ;;  %v7319_v44 = vld [vmem:[#allocation50_spill] sm:$0xff]  ;;  %v7320_v30 = vld [vmem:[#allocation52_spill] sm:$0xff] }
 0x6d1   :  { %v4867_v21 = vpop.eup %4866  ;;  %v1574_v10 = vadd.f32 %v7319_v44, %v7304_v34 }
 0x6d2   :  { %v2872_v58 = vpop.xlane.xlu0 %2871  ;;  %v3188_v36 = vpack.c.bf16 %v3162_v56, %v3161_v31  ;;  %v3015_v17 = vmul.f32 %v4867_v21, %v6486_v38  ;;  %v1577_v31 = vadd.f32 %v7320_v30, %v7304_v34 }
 0x6d3   :  { %v4869_v43 = vpop.eup %4868  ;;  %v2919_v53 = vmul.f32 0.0078125, %v2872_v58 }
 0x6d4   :  { %4611 = vmatmul.mubr.bf16.gmra.mrb[120].mxu0 %v3188_v36  ;;  %v2874_v8 = vpop.xlane.xlu1 %2873  ;;  %v3016_v28 = vmul.f32 %v4869_v43, %v6486_v38  ;;  %v3047_v37 = vmul.f32 %v3015_v17, %v6386_v24 }
 0x6d5   :  { %v4871_v46 = vpop.eup %4870  ;;  %v2951_v3 = vadd.f32 1e-05, %v2919_v53  ;;  %v2920_v55 = vmul.f32 0.0078125, %v2874_v8 }
 0x6d6   :  { %v2876_v1 = vpop.xlane.xlu0 %2875  ;;  %v3048_v33 = vmul.f32 %v3016_v28, %v6389_v29  ;;  %v3083_v27 = vadd.f32 %v6490_v18, %v3047_v37  ;;  %v3017_v57 = vmul.f32 %v4871_v46, %v6486_v38 }
 0x6d7   :  { %v4873_v32 = vpop.eup %4872  ;;  %4874 = vrsqrt.f32 %v2951_v3  ;;  %v2952_v23 = vadd.f32 1e-05, %v2920_v55  ;;  %v2921_v12 = vmul.f32 0.0078125, %v2876_v1 }
 0x6d8   :  { %v2878_v61 = vpop.xlane.xlu1 %2877  ;;  %v3084_v48 = vadd.f32 %v6490_v18, %v3048_v33  ;;  %v3115_v7 = vmax.f32 %v3083_v27, 0.0  ;;  %v3018_v24 = vmul.f32 %v4873_v32, %v6486_v38  ;;  %v3049_v40 = vmul.f32 %v3017_v57, %v6394_v35 }
 0x6d9   :  { %4876 = vrsqrt.f32 %v2952_v23  ;;  %v2953_v29 = vadd.f32 1e-05, %v2921_v12  ;;  %v2922_v4 = vmul.f32 0.0078125, %v2878_v61 }
 0x6da   :  { %v3116_v14 = vmax.f32 %v3084_v48, 0.0  ;;  %v3050_v51 = vmul.f32 %v3018_v24, %v6399_v25  ;;  %v3085_v47 = vadd.f32 %v6490_v18, %v3049_v40  ;;  %v3163_v26 = vmul.f32 %v3115_v7, %v1566_v41  ;;  %v7321_v41 = vld [vmem:[#allocation56_spill] sm:$0xff] }
 0x6db   :  { %4878 = vrsqrt.f32 %v2953_v29  ;;  %v2954_v19 = vadd.f32 1e-05, %v2922_v4  ;;  %v1582_v29 = vadd.f32 %v7321_v41, %v7304_v34 }
 0x6dc   :  { %v3164_v54 = vmul.f32 %v3116_v14, %v1569_v59  ;;  %v3086_v35 = vadd.f32 %v6490_v18, %v3050_v51  ;;  %v3117_v15 = vmax.f32 %v3085_v47, 0.0  ;;  %v1585_v59 = vadd.f32 %v7322_v50, %v7304_v34 }
 0x6dd   :  { %4880 = vrsqrt.f32 %v2954_v19 }
 0x6de   :  { %v3189_v56 = vpack.c.bf16 %v3164_v54, %v3163_v26  ;;  %v3118_v21 = vmax.f32 %v3086_v35, 0.0  ;;  %v3165_v25 = vmul.f32 %v3117_v15, %v1574_v10 }
 0x6e0   :  { %4614 = vmatprep.mubr.bf16.mxu0 %v3189_v56  ;;  %v3166_v58 = vmul.f32 %v3118_v21, %v1577_v31 }
 0x6e1   :  { %v4875_v36 = vpop.eup %4874 }
 0x6e2   :  { %v2880_v17 = vpop.xlane.xlu0 %2879  ;;  %v3190_v43 = vpack.c.bf16 %v3166_v58, %v3165_v25  ;;  %v3019_v53 = vmul.f32 %v4875_v36, %v6486_v38  ;;  %v7323_v36 = vld [vmem:[#allocation55_spill] sm:$0xff] }
 0x6e3   :  { %v4877_v8 = vpop.eup %4876  ;;  %v2923_v28 = vmul.f32 0.0078125, %v2880_v17 }
 0x6e4   :  { %4615 = vmatmul.mubr.bf16.gmra.mrb[124].mxu0 %v3190_v43  ;;  %v2882_v37 = vpop.xlane.xlu1 %2881  ;;  %v3020_v46 = vmul.f32 %v4877_v8, %v6486_v38  ;;  %v3051_v3 = vmul.f32 %v3019_v53, %v6406_v0  ;;  %v7324_v43 = vld [vmem:[#allocation57_spill] sm:$0xff] }
 0x6e5   :  { %v4879_v55 = vpop.eup %4878  ;;  %v2955_v1 = vadd.f32 1e-05, %v2923_v28  ;;  %v2924_v33 = vmul.f32 0.0078125, %v2882_v37 }
 0x6e6   :  { %v2884_v27 = vpop.xlane.xlu0 %2883  ;;  %v3052_v57 = vmul.f32 %v3020_v46, %v6409_v6  ;;  %v3087_v32 = vadd.f32 %v6490_v18, %v3051_v3  ;;  %v3021_v23 = vmul.f32 %v4879_v55, %v6486_v38 }
 0x6e7   :  { %v4881_v12 = vpop.eup %4880  ;;  %4882 = vrsqrt.f32 %v2955_v1  ;;  %v2956_v61 = vadd.f32 1e-05, %v2924_v33  ;;  %v2925_v48 = vmul.f32 0.0078125, %v2884_v27 }
 0x6e8   :  { %v2886_v7 = vpop.xlane.xlu1 %2885  ;;  %v3088_v24 = vadd.f32 %v6490_v18, %v3052_v57  ;;  %v3119_v40 = vmax.f32 %v3087_v32, 0.0  ;;  %v3022_v0 = vmul.f32 %v4881_v12, %v6486_v38  ;;  %v3053_v39 = vmul.f32 %v3021_v23, %v6414_v5 }
 0x6e9   :  { %4884 = vrsqrt.f32 %v2956_v61  ;;  %v2957_v6 = vadd.f32 1e-05, %v2925_v48  ;;  %v2926_v4 = vmul.f32 0.0078125, %v2886_v7 }
 0x6ea   :  { %v2888_v14 = vpop.xlane.xlu0 %2887  ;;  %v3120_v51 = vmax.f32 %v3088_v24, 0.0  ;;  %v3054_v47 = vmul.f32 %v3022_v0, %v6419_v20  ;;  %v3089_v19 = vadd.f32 %v6490_v18, %v3053_v39  ;;  %v3167_v5 = vmul.f32 %v3119_v40, %v1582_v29 }
 0x6eb   :  { %4886 = vrsqrt.f32 %v2957_v6  ;;  %v2958_v26 = vadd.f32 1e-05, %v2926_v4  ;;  %v2927_v54 = vmul.f32 0.0078125, %v2888_v14 }
 0x6ec   :  { %v2890_v35 = vpop.xlane.xlu1 %2889  ;;  %v3168_v15 = vmul.f32 %v3120_v51, %v1585_v59  ;;  %v3090_v44 = vadd.f32 %v6490_v18, %v3054_v47  ;;  %v3121_v10 = vmax.f32 %v3089_v19, 0.0 }
 0x6ed   :  { %4888 = vrsqrt.f32 %v2958_v26  ;;  %v2959_v30 = vadd.f32 1e-05, %v2927_v54  ;;  %v2928_v31 = vmul.f32 0.0078125, %v2890_v35 }
 0x6ee   :  { %v2892_v56 = vpop.xlane.xlu0 %2891  ;;  %v3191_v34 = vpack.c.bf16 %v3168_v15, %v3167_v5  ;;  %v3122_v21 = vmax.f32 %v3090_v44, 0.0  ;;  %v3169_v17 = vmul.f32 %v3121_v10, %v7323_v36  ;;  %v7325_v5 = vld [vmem:[#allocation60_spill] sm:$0xff]  ;;  %v7326_v10 = vld [vmem:[#allocation62_spill] sm:$0xff] }
 0x6ef   :  { %4890 = vrsqrt.f32 %v2959_v30  ;;  %v2960_v25 = vadd.f32 1e-05, %v2928_v31  ;;  %v2929_v20 = vmul.f32 0.0078125, %v2892_v56 }
 0x6f0   :  { %4618 = vmatprep.mubr.bf16.mxu0 %v3191_v34  ;;  %v2894_v58 = vpop.xlane.xlu1 %2893  ;;  %v3170_v53 = vmul.f32 %v3122_v21, %v7324_v43  ;;  %v7327_v43 = vld [vmem:[#allocation59_spill] sm:$0xff] }
 0x6f1   :  { %v4883_v8 = vpop.eup %4882  ;;  %4892 = vrsqrt.f32 %v2960_v25  ;;  %v2961_v28 = vadd.f32 1e-05, %v2929_v20  ;;  %v2930_v37 = vmul.f32 0.0078125, %v2894_v58 }
 0x6f2   :  { %v2896_v46 = vpop.xlane.xlu0 %2895  ;;  %v3192_v3 = vpack.c.bf16 %v3170_v53, %v3169_v17  ;;  %v3023_v55 = vmul.f32 %v4883_v8, %v6486_v38  ;;  %v7328_v8 = vld [vmem:[#allocation61_spill] sm:$0xff] }
 0x6f3   :  { %v4885_v1 = vpop.eup %4884  ;;  %4894 = vrsqrt.f32 %v2961_v28  ;;  %v2962_v33 = vadd.f32 1e-05, %v2930_v37  ;;  %v2931_v27 = vmul.f32 0.0078125, %v2896_v46 }
 0x6f4   :  { %4619 = vmatmul.mubr.bf16.gmra.mrb[128].mxu0 %v3192_v3  ;;  %v2898_v57 = vpop.xlane.xlu1 %2897  ;;  %v3024_v32 = vmul.f32 %v4885_v1, %v6486_v38  ;;  %v3055_v23 = vmul.f32 %v3023_v55, %v6426_v63 }
 0x6f5   :  { %v4887_v12 = vpop.eup %4886  ;;  %4896 = vrsqrt.f32 %v2962_v33  ;;  %v2963_v61 = vadd.f32 1e-05, %v2931_v27  ;;  %v2932_v48 = vmul.f32 0.0078125, %v2898_v57 }
 0x6f6   :  { %v2900_v7 = vpop.xlane.xlu0 %2899  ;;  %v3056_v24 = vmul.f32 %v3024_v32, %v6429_v11  ;;  %v3091_v40 = vadd.f32 %v6490_v18, %v3055_v23  ;;  %v3025_v0 = vmul.f32 %v4887_v12, %v6486_v38  ;;  %v7329_v32 = vld [vmem:[#allocation64_spill] sm:$0xff] }
 0x6f7   :  { %v4889_v39 = vpop.eup %4888  ;;  %4898 = vrsqrt.f32 %v2963_v61  ;;  %v2964_v41 = vadd.f32 1e-05, %v2932_v48  ;;  %v2933_v29 = vmul.f32 0.0078125, %v2900_v7  ;;  %v7330_v61 = vld [vmem:[#allocation66_spill] sm:$0xff] }
 0x6f8   :  { %v2902_v6 = vpop.xlane.xlu1 %2901  ;;  %v3092_v4 = vadd.f32 %v6490_v18, %v3056_v24  ;;  %v3123_v50 = vmax.f32 %v3091_v40, 0.0  ;;  %v3026_v63 = vmul.f32 %v4889_v39, %v6486_v38  ;;  %v3057_v59 = vmul.f32 %v3025_v0, %v6434_v22 }
 0x6f9   :  { %v4891_v14 = vpop.eup %4890  ;;  %4900 = vrsqrt.f32 %v2964_v41  ;;  %v2965_v51 = vadd.f32 1e-05, %v2933_v29  ;;  %v2934_v11 = vmul.f32 0.0078125, %v2902_v6 }
 0x6fa   :  { %v3124_v47 = vmax.f32 %v3092_v4, 0.0  ;;  %v3058_v19 = vmul.f32 %v3026_v63, %v6439_v9  ;;  %v3093_v26 = vadd.f32 %v6490_v18, %v3057_v59  ;;  %v3171_v15 = vmul.f32 %v3123_v50, %v7325_v5  ;;  %v7331_v4 = vld [vmem:[#allocation63_spill] sm:$0xff]  ;;  %v7332_v59 = vld [vmem:[#allocation65_spill] sm:$0xff] }
 0x6fb   :  { %v4893_v54 = vpop.eup %4892  ;;  %4902 = vrsqrt.f32 %v2965_v51  ;;  %v2966_v35 = vadd.f32 1e-05, %v2934_v11  ;;  %v3027_v44 = vmul.f32 %v4891_v14, %v6486_v38 }
 0x6fc   :  { %v3172_v30 = vmul.f32 %v3124_v47, %v7326_v10  ;;  %v3094_v22 = vadd.f32 %v6490_v18, %v3058_v19  ;;  %v3125_v31 = vmax.f32 %v3093_v26, 0.0  ;;  %v3028_v56 = vmul.f32 %v4893_v54, %v6486_v38 }
 0x6fd   :  { %v4895_v34 = vpop.eup %4894  ;;  %4904 = vrsqrt.f32 %v2966_v35  ;;  %v3059_v9 = vmul.f32 %v3027_v44, %v6444_v60  ;;  %v7333_v35 = vld [vmem:[#allocation68_spill] sm:$0xff] }
 0x6fe   :  { %v3193_v21 = vpack.c.bf16 %v3172_v30, %v3171_v15  ;;  %v3126_v25 = vmax.f32 %v3094_v22, 0.0  ;;  %v3060_v20 = vmul.f32 %v3028_v56, %v6449_v13  ;;  %v3029_v17 = vmul.f32 %v4895_v34, %v6486_v38  ;;  %v7334_v15 = vld [vmem:[#allocation70_spill] sm:$0xff] }
 0x6ff   :  { %v4897_v58 = vpop.eup %4896  ;;  %v3095_v36 = vadd.f32 %v6490_v18, %v3059_v9  ;;  %v3173_v53 = vmul.f32 %v3125_v31, %v7327_v43 }
 0x700   :  { %4622 = vmatprep.mubr.bf16.mxu0 %v3193_v21  ;;  %v3174_v28 = vmul.f32 %v3126_v25, %v7328_v8  ;;  %v3096_v37 = vadd.f32 %v6490_v18, %v3060_v20  ;;  %v3030_v46 = vmul.f32 %v4897_v58, %v6486_v38  ;;  %v3061_v55 = vmul.f32 %v3029_v17, %v6454_v49 }
 0x701   :  { %v4899_v3 = vpop.eup %4898  ;;  %v3127_v60 = vmax.f32 %v3095_v36, 0.0 }
 0x702   :  { %v3194_v1 = vpack.c.bf16 %v3174_v28, %v3173_v53  ;;  %v3128_v13 = vmax.f32 %v3096_v37, 0.0  ;;  %v3062_v33 = vmul.f32 %v3030_v46, %v6459_v52  ;;  %v3031_v27 = vmul.f32 %v4899_v3, %v6486_v38 }
 0x703   :  { %v4901_v57 = vpop.eup %4900  ;;  %v3175_v23 = vmul.f32 %v3127_v60, %v7329_v32  ;;  %v3097_v12 = vadd.f32 %v6490_v18, %v3061_v55 }
 0x704   :  { %4623 = vmatmul.mubr.bf16.gmra.mrb[132].mxu0 %v3194_v1  ;;  %v3176_v48 = vmul.f32 %v3128_v13, %v7330_v61  ;;  %v3098_v7 = vadd.f32 %v6490_v18, %v3062_v33  ;;  %v3032_v24 = vmul.f32 %v4901_v57, %v6486_v38  ;;  %v3063_v49 = vmul.f32 %v3031_v27, %v6464_v16 }
 0x705   :  { %v4903_v40 = vpop.eup %4902  ;;  %v3129_v0 = vmax.f32 %v3097_v12, 0.0 }
 0x706   :  { %v3195_v39 = vpack.c.bf16 %v3176_v48, %v3175_v23  ;;  %v3130_v52 = vmax.f32 %v3098_v7, 0.0  ;;  %v3064_v41 = vmul.f32 %v3032_v24, %v6469_v2  ;;  %v3099_v29 = vadd.f32 %v6490_v18, %v3063_v49 }
 0x707   :  { %v4905_v6 = vpop.eup %4904  ;;  %v3177_v50 = vmul.f32 %v3129_v0, %v7331_v4  ;;  %v3033_v63 = vmul.f32 %v4903_v40, %v6486_v38 }
 0x708   :  { %4626 = vmatprep.mubr.bf16.mxu0 %v3195_v39  ;;  %v3178_v14 = vmul.f32 %v3130_v52, %v7332_v59  ;;  %v3100_v51 = vadd.f32 %v6490_v18, %v3064_v41  ;;  %v3131_v11 = vmax.f32 %v3099_v29, 0.0  ;;  %v3034_v16 = vmul.f32 %v4905_v6, %v6486_v38  ;;  %v7335_v38 = vld [vmem:[#allocation67_spill] sm:$0xff] }
 0x709   :  { %v3065_v47 = vmul.f32 %v3033_v63, %v6474_v42  ;;  %v7336_v42 = vld [vmem:[#allocation69_spill] sm:$0xff] }
 0x70a   :  { %v3196_v19 = vpack.c.bf16 %v3178_v14, %v3177_v50  ;;  %v3132_v26 = vmax.f32 %v3100_v51, 0.0  ;;  %v3066_v2 = vmul.f32 %v3034_v16, %v6479_v62  ;;  %v3179_v5 = vmul.f32 %v3131_v11, %v7333_v35 }
 0x70b   :  { %v3101_v54 = vadd.f32 %v6490_v18, %v3065_v47 }
 0x70c   :  { %4627 = vmatmul.mubr.bf16.gmra.mrb[136].mxu0 %v3196_v19  ;;  %v3180_v44 = vmul.f32 %v3132_v26, %v7334_v15  ;;  %v3102_v10 = vadd.f32 %v6490_v18, %v3066_v2 }
 0x70d   :  { %v3133_v30 = vmax.f32 %v3101_v54, 0.0 }
 0x70e   :  { %v3197_v22 = vpack.c.bf16 %v3180_v44, %v3179_v5  ;;  %v3134_v31 = vmax.f32 %v3102_v10, 0.0 }
 0x70f   :  { %v3181_v56 = vmul.f32 %v3133_v30, %v7335_v38 }
 0x710   :  { %4630 = vmatprep.mubr.bf16.mxu0 %v3197_v22  ;;  %v3182_v34 = vmul.f32 %v3134_v31, %v7336_v42 }
 0x712   :  { %v3198_v9 = vpack.c.bf16 %v3182_v34, %v3181_v56 }
 0x714   :  { %4631 = vmatmul.mubr.bf16.gmra.mrb[140].mxu0 %v3198_v9 }
 0x789   :  { %v6637_v62 = vpop.f32.mrb[112].mxu0 }
 0x78a   :  { %3412 = vadd.xlane.f32.xlu0 %v6637_v62  ;;  %v6640_v21 = vpop.f32.mrb[113].mxu0 }
 0x78b   :  { %v6642_v25 = vpop.f32.mrb[114].mxu0 }
 0x78c   :  { %3414 = vadd.xlane.f32.xlu1 %v6642_v25  ;;  %v6645_v18 = vpop.f32.mrb[115].mxu0 }
 0x78e   :  { %3408 = vadd.xlane.f32.xlu0 %v6640_v21 }
 0x790   :  { %3410 = vadd.xlane.f32.xlu1 %v6645_v18 }
 0x797   :  { %v6649_v20 = vpop.f32.mrb[116].mxu0 }
 0x798   :  { %3420 = vadd.xlane.f32.xlu0 %v6649_v20  ;;  %v6652_v58 = vpop.f32.mrb[117].mxu0 }
 0x799   :  { %v6654_v36 = vpop.f32.mrb[118].mxu0 }
 0x79a   :  { %3422 = vadd.xlane.f32.xlu1 %v6654_v36  ;;  %v6657_v17 = vpop.f32.mrb[119].mxu0 }
 0x79c   :  { %3416 = vadd.xlane.f32.xlu0 %v6652_v58 }
 0x79e   :  { %3418 = vadd.xlane.f32.xlu1 %v6657_v17 }
 0x7a7   :  { %v6661_v43 = vpop.f32.mrb[120].mxu0 }
 0x7a8   :  { %3428 = vadd.xlane.f32.xlu0 %v6661_v43  ;;  %v6664_v53 = vpop.f32.mrb[121].mxu0 }
 0x7a9   :  { %v6666_v8 = vpop.f32.mrb[122].mxu0 }
 0x7aa   :  { %3430 = vadd.xlane.f32.xlu1 %v6666_v8  ;;  %v6669_v28 = vpop.f32.mrb[123].mxu0 }
 0x7ac   :  { %3424 = vadd.xlane.f32.xlu0 %v6664_v53 }
 0x7ae   :  { %3426 = vadd.xlane.f32.xlu1 %v6669_v28 }
 0x7b7   :  { %v6673_v37 = vpop.f32.mrb[124].mxu0 }
 0x7b8   :  { %3436 = vadd.xlane.f32.xlu0 %v6673_v37  ;;  %v6676_v46 = vpop.f32.mrb[125].mxu0 }
 0x7b9   :  { %v6678_v3 = vpop.f32.mrb[126].mxu0 }
 0x7ba   :  { %3438 = vadd.xlane.f32.xlu1 %v6678_v3  ;;  %v6681_v60 = vpop.f32.mrb[127].mxu0 }
 0x7bc   :  { %3432 = vadd.xlane.f32.xlu0 %v6676_v46 }
 0x7be   :  { %3434 = vadd.xlane.f32.xlu1 %v6681_v60 }
 0x7c7   :  { %v6685_v55 = vpop.f32.mrb[128].mxu0 }
 0x7c8   :  { %3444 = vadd.xlane.f32.xlu0 %v6685_v55  ;;  %v6688_v1 = vpop.f32.mrb[129].mxu0 }
 0x7c9   :  { %v6690_v13 = vpop.f32.mrb[130].mxu0 }
 0x7ca   :  { %3446 = vadd.xlane.f32.xlu1 %v6690_v13  ;;  %v6693_v33 = vpop.f32.mrb[131].mxu0 }
 0x7cc   :  { %3440 = vadd.xlane.f32.xlu0 %v6688_v1 }
 0x7ce   :  { %3442 = vadd.xlane.f32.xlu1 %v6693_v33 }
 0x7d7   :  { %v6697_v27 = vpop.f32.mrb[132].mxu0 }
 0x7d8   :  { %3452 = vadd.xlane.f32.xlu0 %v6697_v27  ;;  %v6700_v57 = vpop.f32.mrb[133].mxu0 }
 0x7d9   :  { %v6702_v32 = vpop.f32.mrb[134].mxu0 }
 0x7da   :  { %3454 = vadd.xlane.f32.xlu1 %v6702_v32  ;;  %v6705_v23 = vpop.f32.mrb[135].mxu0 }
 0x7dc   :  { %3448 = vadd.xlane.f32.xlu0 %v6700_v57 }
 0x7de   :  { %3450 = vadd.xlane.f32.xlu1 %v6705_v23 }
 0x7df   :  { %v6709_v12 = vpop.f32.mrb[136].mxu0 }
 0x7e0   :  { %3460 = vadd.xlane.f32.xlu0 %v6709_v12  ;;  %v6712_v61 = vpop.f32.mrb[137].mxu0 }
 0x7e1   :  { %v6714_v48 = vpop.f32.mrb[138].mxu0 }
 0x7e2   :  { %3462 = vadd.xlane.f32.xlu1 %v6714_v48  ;;  %v6717_v7 = vpop.f32.mrb[139].mxu0 }
 0x7e4   :  { %3456 = vadd.xlane.f32.xlu0 %v6712_v61 }
 0x7e6   :  { %3458 = vadd.xlane.f32.xlu1 %v6717_v7 }
 0x7e7   :  { %v6721_v24 = vpop.f32.mrb[140].mxu0 }
 0x7e8   :  { %v6723_v49 = vpop.f32.mrb[141].mxu0 }
 0x7e9   :  { %3464 = vadd.xlane.f32.xlu0 %v6723_v49  ;;  %v6726_v40 = vpop.f32.mrb[142].mxu0 }
 0x7ea   :  { %v6728_v0 = vpop.f32.mrb[143].mxu0 }
 0x7eb   :  { %3466 = vadd.xlane.f32.xlu1 %v6728_v0 }
 0x7ed   :  { %3468 = vadd.xlane.f32.xlu0 %v6721_v24 }
 0x7ef   :  { %3470 = vadd.xlane.f32.xlu1 %v6726_v40 }
 0x817   :  { %v3413_v39 = vpop.xlane.xlu0 %3412 }
 0x818   :  { %v3474_v52 = vmul.f32 0.0078125, %v3413_v39 }
 0x819   :  { %v3415_v41 = vpop.xlane.xlu1 %3414 }
 0x81a   :  { %v6734_v29 = vsub.f32 %v6637_v62, %v3474_v52  ;;  %v3475_v6 = vmul.f32 0.0078125, %v3415_v41 }
 0x81b   :  { %v3409_v4 = vpop.xlane.xlu0 %3408 }
 0x81c   :  { %v6737_v50 = vsub.f32 %v6642_v25, %v3475_v6  ;;  %v3472_v63 = vmul.f32 0.0078125, %v3409_v4  ;;  %v3538_v59 = vmul.f32 %v6734_v29, %v6734_v29 }
 0x81d   :  { %v3411_v14 = vpop.xlane.xlu1 %3410 }
 0x81e   :  { %v6742_v51 = vsub.f32 %v6640_v21, %v3472_v63  ;;  %v3473_v11 = vmul.f32 0.0078125, %v3411_v14  ;;  %3572 = vadd.xlane.f32.xlu0 %v3538_v59  ;;  %v3539_v16 = vmul.f32 %v6737_v50, %v6737_v50 }
 0x820   :  { %v6747_v47 = vsub.f32 %v6645_v18, %v3473_v11  ;;  %3574 = vadd.xlane.f32.xlu1 %v3539_v16  ;;  %v3536_v19 = vmul.f32 %v6742_v51, %v6742_v51 }
 0x822   :  { %3568 = vadd.xlane.f32.xlu0 %v3536_v19  ;;  %v3537_v26 = vmul.f32 %v6747_v47, %v6747_v47 }
 0x824   :  { %3570 = vadd.xlane.f32.xlu1 %v3537_v26 }
 0x825   :  { %v3421_v2 = vpop.xlane.xlu0 %3420 }
 0x826   :  { %v3478_v54 = vmul.f32 0.0078125, %v3421_v2 }
 0x827   :  { %v3423_v35 = vpop.xlane.xlu1 %3422 }
 0x828   :  { %v6754_v5 = vsub.f32 %v6649_v20, %v3478_v54  ;;  %v3479_v15 = vmul.f32 0.0078125, %v3423_v35 }
 0x829   :  { %v3417_v44 = vpop.xlane.xlu0 %3416 }
 0x82a   :  { %v6757_v10 = vsub.f32 %v6654_v36, %v3479_v15  ;;  %v3476_v30 = vmul.f32 0.0078125, %v3417_v44  ;;  %v3542_v22 = vmul.f32 %v6754_v5, %v6754_v5 }
 0x82b   :  { %v3419_v31 = vpop.xlane.xlu1 %3418 }
 0x82c   :  { %v6762_v38 = vsub.f32 %v6652_v58, %v3476_v30  ;;  %v3477_v56 = vmul.f32 0.0078125, %v3419_v31  ;;  %3580 = vadd.xlane.f32.xlu0 %v3542_v22  ;;  %v3543_v42 = vmul.f32 %v6757_v10, %v6757_v10 }
 0x82e   :  { %v6767_v34 = vsub.f32 %v6657_v17, %v3477_v56  ;;  %3582 = vadd.xlane.f32.xlu1 %v3543_v42  ;;  %v3540_v9 = vmul.f32 %v6762_v38, %v6762_v38 }
 0x830   :  { %3576 = vadd.xlane.f32.xlu0 %v3540_v9  ;;  %v3541_v62 = vmul.f32 %v6767_v34, %v6767_v34 }
 0x832   :  { %3578 = vadd.xlane.f32.xlu1 %v3541_v62 }
 0x835   :  { %v3429_v21 = vpop.xlane.xlu0 %3428 }
 0x836   :  { %v3482_v25 = vmul.f32 0.0078125, %v3429_v21 }
 0x837   :  { %v3431_v18 = vpop.xlane.xlu1 %3430 }
 0x838   :  { %v6774_v20 = vsub.f32 %v6661_v43, %v3482_v25  ;;  %v3483_v58 = vmul.f32 0.0078125, %v3431_v18 }
 0x839   :  { %v3425_v36 = vpop.xlane.xlu0 %3424 }
 0x83a   :  { %v6777_v17 = vsub.f32 %v6666_v8, %v3483_v58  ;;  %v3480_v39 = vmul.f32 0.0078125, %v3425_v36  ;;  %v3546_v52 = vmul.f32 %v6774_v20, %v6774_v20 }
 0x83b   :  { %v3427_v41 = vpop.xlane.xlu1 %3426 }
 0x83c   :  { %v6782_v6 = vsub.f32 %v6664_v53, %v3480_v39  ;;  %v3481_v4 = vmul.f32 0.0078125, %v3427_v41  ;;  %3588 = vadd.xlane.f32.xlu0 %v3546_v52  ;;  %v3547_v63 = vmul.f32 %v6777_v17, %v6777_v17 }
 0x83e   :  { %v6787_v43 = vsub.f32 %v6669_v28, %v3481_v4  ;;  %3590 = vadd.xlane.f32.xlu1 %v3547_v63  ;;  %v3544_v8 = vmul.f32 %v6782_v6, %v6782_v6 }
 0x840   :  { %3584 = vadd.xlane.f32.xlu0 %v3544_v8  ;;  %v3545_v59 = vmul.f32 %v6787_v43, %v6787_v43 }
 0x842   :  { %3586 = vadd.xlane.f32.xlu1 %v3545_v59 }
 0x845   :  { %v3437_v14 = vpop.xlane.xlu0 %3436 }
 0x846   :  { %v3486_v53 = vmul.f32 0.0078125, %v3437_v14 }
 0x847   :  { %v3439_v11 = vpop.xlane.xlu1 %3438 }
 0x848   :  { %v6794_v16 = vsub.f32 %v6673_v37, %v3486_v53  ;;  %v3487_v19 = vmul.f32 0.0078125, %v3439_v11 }
 0x849   :  { %v3433_v26 = vpop.xlane.xlu0 %3432 }
 0x84a   :  { %v6797_v28 = vsub.f32 %v6678_v3, %v3487_v19  ;;  %v3484_v2 = vmul.f32 0.0078125, %v3433_v26  ;;  %v3550_v54 = vmul.f32 %v6794_v16, %v6794_v16 }
 0x84b   :  { %v3435_v35 = vpop.xlane.xlu1 %3434 }
 0x84c   :  { %v6802_v15 = vsub.f32 %v6676_v46, %v3484_v2  ;;  %v3485_v44 = vmul.f32 0.0078125, %v3435_v35  ;;  %3596 = vadd.xlane.f32.xlu0 %v3550_v54  ;;  %v3551_v30 = vmul.f32 %v6797_v28, %v6797_v28 }
 0x84e   :  { %v6807_v37 = vsub.f32 %v6681_v60, %v3485_v44  ;;  %3598 = vadd.xlane.f32.xlu1 %v3551_v30  ;;  %v3548_v3 = vmul.f32 %v6802_v15, %v6802_v15 }
 0x850   :  { %3592 = vadd.xlane.f32.xlu0 %v3548_v3  ;;  %v3549_v22 = vmul.f32 %v6807_v37, %v6807_v37 }
 0x852   :  { %3594 = vadd.xlane.f32.xlu1 %v3549_v22 }
 0x855   :  { %v3445_v31 = vpop.xlane.xlu0 %3444 }
 0x856   :  { %v3490_v46 = vmul.f32 0.0078125, %v3445_v31 }
 0x857   :  { %v3447_v56 = vpop.xlane.xlu1 %3446 }
 0x858   :  { %v6814_v42 = vsub.f32 %v6685_v55, %v3490_v46  ;;  %v3491_v9 = vmul.f32 0.0078125, %v3447_v56 }
 0x859   :  { %v3441_v62 = vpop.xlane.xlu0 %3440 }
 0x85a   :  { %v6817_v60 = vsub.f32 %v6690_v13, %v3491_v9  ;;  %v3488_v21 = vmul.f32 0.0078125, %v3441_v62  ;;  %v3554_v25 = vmul.f32 %v6814_v42, %v6814_v42 }
 0x85b   :  { %v3443_v18 = vpop.xlane.xlu1 %3442 }
 0x85c   :  { %v6822_v58 = vsub.f32 %v6688_v1, %v3488_v21  ;;  %v3489_v36 = vmul.f32 0.0078125, %v3443_v18  ;;  %3604 = vadd.xlane.f32.xlu0 %v3554_v25  ;;  %v3555_v39 = vmul.f32 %v6817_v60, %v6817_v60 }
 0x85e   :  { %v6827_v55 = vsub.f32 %v6693_v33, %v3489_v36  ;;  %3606 = vadd.xlane.f32.xlu1 %v3555_v39  ;;  %v3552_v13 = vmul.f32 %v6822_v58, %v6822_v58 }
 0x860   :  { %3600 = vadd.xlane.f32.xlu0 %v3552_v13  ;;  %v3553_v52 = vmul.f32 %v6827_v55, %v6827_v55 }
 0x862   :  { %3602 = vadd.xlane.f32.xlu1 %v3553_v52 }
 0x865   :  { %v3453_v41 = vpop.xlane.xlu0 %3452 }
 0x866   :  { %v3494_v1 = vmul.f32 0.0078125, %v3453_v41 }
 0x867   :  { %v3455_v4 = vpop.xlane.xlu1 %3454 }
 0x868   :  { %v6834_v63 = vsub.f32 %v6697_v27, %v3494_v1  ;;  %v3495_v8 = vmul.f32 0.0078125, %v3455_v4 }
 0x869   :  { %v3449_v59 = vpop.xlane.xlu0 %3448 }
 0x86a   :  { %v6837_v33 = vsub.f32 %v6702_v32, %v3495_v8  ;;  %v3492_v14 = vmul.f32 0.0078125, %v3449_v59  ;;  %v3558_v53 = vmul.f32 %v6834_v63, %v6834_v63 }
 0x86b   :  { %v3451_v11 = vpop.xlane.xlu1 %3450 }
 0x86c   :  { %v6842_v19 = vsub.f32 %v6700_v57, %v3492_v14  ;;  %v3493_v26 = vmul.f32 0.0078125, %v3451_v11  ;;  %3612 = vadd.xlane.f32.xlu0 %v3558_v53  ;;  %v3559_v2 = vmul.f32 %v6837_v33, %v6837_v33 }
 0x86d   :  { %v3461_v27 = vpop.xlane.xlu0 %3460 }
 0x86e   :  { %v6847_v54 = vsub.f32 %v6705_v23, %v3493_v26  ;;  %v3498_v35 = vmul.f32 0.0078125, %v3461_v27  ;;  %3614 = vadd.xlane.f32.xlu1 %v3559_v2  ;;  %v3556_v32 = vmul.f32 %v6842_v19, %v6842_v19 }
 0x86f   :  { %v3463_v44 = vpop.xlane.xlu1 %3462 }
 0x870   :  { %v6852_v30 = vsub.f32 %v6709_v12, %v3498_v35  ;;  %v3499_v57 = vmul.f32 0.0078125, %v3463_v44  ;;  %3608 = vadd.xlane.f32.xlu0 %v3556_v32  ;;  %v3557_v3 = vmul.f32 %v6847_v54, %v6847_v54 }
 0x871   :  { %v3457_v22 = vpop.xlane.xlu0 %3456 }
 0x872   :  { %v6857_v31 = vsub.f32 %v6714_v48, %v3499_v57  ;;  %v3496_v23 = vmul.f32 0.0078125, %v3457_v22  ;;  %3610 = vadd.xlane.f32.xlu1 %v3557_v3  ;;  %v3562_v46 = vmul.f32 %v6852_v30, %v6852_v30 }
 0x873   :  { %v3459_v56 = vpop.xlane.xlu1 %3458 }
 0x874   :  { %v6862_v9 = vsub.f32 %v6712_v61, %v3496_v23  ;;  %v3497_v12 = vmul.f32 0.0078125, %v3459_v56  ;;  %3620 = vadd.xlane.f32.xlu0 %v3562_v46  ;;  %v3563_v62 = vmul.f32 %v6857_v31, %v6857_v31  ;;  %v6893_v23 = vld [vmem:[#allocation6 + $0x18] sm:$0xf] }
 0x875   :  { %v7337_v46 = vld [vmem:[#allocation22_spill] sm:$0xff] }
 0x876   :  { %v6867_v21 = vsub.f32 %v6717_v7, %v3497_v12  ;;  %v3465_v25 = vpop.xlane.xlu0 %3464  ;;  %3622 = vadd.xlane.f32.xlu1 %v3563_v62  ;;  %v3560_v48 = vmul.f32 %v6862_v9, %v6862_v9  ;;  %v6897_v56 = vrot.slane %v6893_v23, %v7337_v46 }
 0x877   :  { %v3500_v18 = vmul.f32 0.0078125, %v3465_v25 }
 0x878   :  { %3616 = vadd.xlane.f32.xlu0 %v3560_v48  ;;  %v3467_v36 = vpop.xlane.xlu1 %3466  ;;  %v3561_v61 = vmul.f32 %v6867_v21, %v6867_v21 }
 0x879   :  { %v6874_v39 = vsub.f32 %v6723_v49, %v3500_v18  ;;  %v3501_v13 = vmul.f32 0.0078125, %v3467_v36  ;;  %v7338_v36 = vsub.s32 1, %v7303_v45 }
 0x87a   :  { %v3469_v52 = vpop.xlane.xlu0 %3468  ;;  %3618 = vadd.xlane.f32.xlu1 %v3561_v61 }
 0x87b   :  { %v6877_v7 = vsub.f32 %v6728_v0, %v3501_v13  ;;  %v3502_v41 = vmul.f32 0.0078125, %v3469_v52  ;;  %v3564_v1 = vmul.f32 %v6874_v39, %v6874_v39  ;;  %v6903_v61 = vrot.slane %v6893_v23, %v7338_v36 }
 0x87c   :  { %v3471_v4 = vpop.xlane.xlu1 %3470 }
 0x87d   :  { %v6882_v8 = vsub.f32 %v6721_v24, %v3502_v41  ;;  %v3503_v59 = vmul.f32 0.0078125, %v3471_v4  ;;  %3624 = vadd.xlane.f32.xlu0 %v3564_v1  ;;  %v3565_v49 = vmul.f32 %v6877_v7, %v6877_v7 }
 0x87f   :  { %v6887_v14 = vsub.f32 %v6726_v40, %v3503_v59  ;;  %3626 = vadd.xlane.f32.xlu1 %v3565_v49  ;;  %v3566_v0 = vmul.f32 %v6882_v8, %v6882_v8 }
 0x881   :  { %3628 = vadd.xlane.f32.xlu0 %v3566_v0  ;;  %v3567_v53 = vmul.f32 %v6887_v14, %v6887_v14 }
 0x883   :  { %3630 = vadd.xlane.f32.xlu1 %v3567_v53 }
 0x8ab   :  { %v3573_v11 = vpop.xlane.xlu0 %3572 }
 0x8ac   :  { %v3634_v24 = vmul.f32 0.0078125, %v3573_v11 }
 0x8ad   :  { %v3575_v26 = vpop.xlane.xlu1 %3574 }
 0x8ae   :  { %v3666_v2 = vadd.f32 1e-05, %v3634_v24  ;;  %v3635_v27 = vmul.f32 0.0078125, %v3575_v26  ;;  %v7339_v26 = vsub.s32 2, %v7303_v45 }
 0x8af   :  { %v3569_v35 = vpop.xlane.xlu0 %3568 }
 0x8b0   :  { %4906 = vrsqrt.f32 %v3666_v2  ;;  %v3667_v32 = vadd.f32 1e-05, %v3635_v27  ;;  %v3632_v44 = vmul.f32 0.0078125, %v3569_v35  ;;  %v6911_v2 = vrot.slane %v6893_v23, %v7339_v26 }
 0x8b1   :  { %v3571_v40 = vpop.xlane.xlu1 %3570 }
 0x8b2   :  { %4908 = vrsqrt.f32 %v3667_v32  ;;  %v3664_v57 = vadd.f32 1e-05, %v3632_v44  ;;  %v3633_v3 = vmul.f32 0.0078125, %v3571_v40 }
 0x8b4   :  { %4910 = vrsqrt.f32 %v3664_v57  ;;  %v3665_v22 = vadd.f32 1e-05, %v3633_v3 }
 0x8b6   :  { %4912 = vrsqrt.f32 %v3665_v22 }
 0x8b9   :  { %v3581_v12 = vpop.xlane.xlu0 %3580 }
 0x8ba   :  { %v4907_v62 = vpop.eup %4906  ;;  %v3638_v25 = vmul.f32 0.0078125, %v3581_v12 }
 0x8bb   :  { %v3583_v48 = vpop.xlane.xlu1 %3582  ;;  %v3734_v18 = vmul.f32 %v4907_v62, %v6897_v56 }
 0x8bc   :  { %v4909_v13 = vpop.eup %4908  ;;  %v3670_v52 = vadd.f32 1e-05, %v3638_v25  ;;  %v3639_v41 = vmul.f32 0.0078125, %v3583_v48 }
 0x8bd   :  { %v3577_v1 = vpop.xlane.xlu0 %3576  ;;  %v3766_v4 = vmul.f32 %v3734_v18, %v6734_v29  ;;  %v3735_v59 = vmul.f32 %v4909_v13, %v6897_v56 }
 0x8be   :  { %v4911_v49 = vpop.eup %4910  ;;  %4914 = vrsqrt.f32 %v3670_v52  ;;  %v3671_v0 = vadd.f32 1e-05, %v3639_v41  ;;  %v3636_v53 = vmul.f32 0.0078125, %v3577_v1 }
 0x8bf   :  { %v3579_v11 = vpop.xlane.xlu1 %3578  ;;  %v3802_v24 = vadd.f32 %v6903_v61, %v3766_v4  ;;  %v3767_v27 = vmul.f32 %v3735_v59, %v6737_v50  ;;  %v3732_v35 = vmul.f32 %v4911_v49, %v6897_v56 }
 0x8c0   :  { %v4913_v32 = vpop.eup %4912  ;;  %4916 = vrsqrt.f32 %v3671_v0  ;;  %v3668_v29 = vadd.f32 1e-05, %v3636_v53  ;;  %v3637_v44 = vmul.f32 0.0078125, %v3579_v11 }
 0x8c1   :  { %v3834_v40 = vmax.f32 %v3802_v24, 0.0  ;;  %v3803_v57 = vadd.f32 %v6903_v61, %v3767_v27  ;;  %v3764_v3 = vmul.f32 %v3732_v35, %v6742_v51  ;;  %v3733_v22 = vmul.f32 %v4913_v32, %v6897_v56 }
 0x8c2   :  { %4918 = vrsqrt.f32 %v3668_v29  ;;  %v3669_v46 = vadd.f32 1e-05, %v3637_v44 }
 0x8c3   :  { %v3870_v12 = vmul.f32 %v6911_v2, %v3834_v40  ;;  %v3835_v62 = vmax.f32 %v3803_v57, 0.0  ;;  %v3800_v50 = vadd.f32 %v6903_v61, %v3764_v3  ;;  %v3765_v25 = vmul.f32 %v3733_v22, %v6747_v47 }
 0x8c4   :  { %4920 = vrsqrt.f32 %v3669_v46 }
 0x8c5   :  { %3904 = vadd.xlane.f32.xlu0 %v3870_v12  ;;  %v3871_v48 = vmul.f32 %v6911_v2, %v3835_v62  ;;  %v3832_v18 = vmax.f32 %v3800_v50, 0.0  ;;  %v3801_v36 = vadd.f32 %v6903_v61, %v3765_v25 }
 0x8c7   :  { %3906 = vadd.xlane.f32.xlu1 %v3871_v48  ;;  %v3868_v51 = vmul.f32 %v6911_v2, %v3832_v18  ;;  %v3833_v13 = vmax.f32 %v3801_v36, 0.0 }
 0x8c8   :  { %v4915_v52 = vpop.eup %4914 }
 0x8c9   :  { %3900 = vadd.xlane.f32.xlu0 %v3868_v51  ;;  %v3589_v41 = vpop.xlane.xlu0 %3588  ;;  %v3869_v1 = vmul.f32 %v6911_v2, %v3833_v13  ;;  %v3738_v4 = vmul.f32 %v4915_v52, %v6897_v56 }
 0x8ca   :  { %v4917_v59 = vpop.eup %4916  ;;  %v3642_v47 = vmul.f32 0.0078125, %v3589_v41 }
 0x8cb   :  { %3902 = vadd.xlane.f32.xlu1 %v3869_v1  ;;  %v3591_v49 = vpop.xlane.xlu1 %3590  ;;  %v3770_v0 = vmul.f32 %v3738_v4, %v6754_v5  ;;  %v3739_v53 = vmul.f32 %v4917_v59, %v6897_v56 }
 0x8cc   :  { %v4919_v11 = vpop.eup %4918  ;;  %v3674_v24 = vadd.f32 1e-05, %v3642_v47  ;;  %v3643_v26 = vmul.f32 0.0078125, %v3591_v49 }
 0x8cd   :  { %v3585_v27 = vpop.xlane.xlu0 %3584  ;;  %v3806_v35 = vadd.f32 %v6903_v61, %v3770_v0  ;;  %v3771_v32 = vmul.f32 %v3739_v53, %v6757_v10  ;;  %v3736_v29 = vmul.f32 %v4919_v11, %v6897_v56 }
 0x8ce   :  { %v4921_v44 = vpop.eup %4920  ;;  %4922 = vrsqrt.f32 %v3674_v24  ;;  %v3675_v40 = vadd.f32 1e-05, %v3643_v26  ;;  %v3640_v57 = vmul.f32 0.0078125, %v3585_v27 }
 0x8cf   :  { %v3587_v3 = vpop.xlane.xlu1 %3586  ;;  %v3838_v22 = vmax.f32 %v3806_v35, 0.0  ;;  %v3807_v5 = vadd.f32 %v6903_v61, %v3771_v32  ;;  %v3768_v46 = vmul.f32 %v3736_v29, %v6762_v38  ;;  %v3737_v12 = vmul.f32 %v4921_v44, %v6897_v56 }
 0x8d0   :  { %4924 = vrsqrt.f32 %v3675_v40  ;;  %v3672_v62 = vadd.f32 1e-05, %v3640_v57  ;;  %v3641_v50 = vmul.f32 0.0078125, %v3587_v3 }
 0x8d1   :  { %v3874_v25 = vmul.f32 %v6911_v2, %v3838_v22  ;;  %v3839_v10 = vmax.f32 %v3807_v5, 0.0  ;;  %v3804_v48 = vadd.f32 %v6903_v61, %v3768_v46  ;;  %v3769_v18 = vmul.f32 %v3737_v12, %v6767_v34 }
 0x8d2   :  { %4926 = vrsqrt.f32 %v3672_v62  ;;  %v3673_v36 = vadd.f32 1e-05, %v3641_v50 }
 0x8d3   :  { %3912 = vadd.xlane.f32.xlu0 %v3874_v25  ;;  %v3875_v51 = vmul.f32 %v6911_v2, %v3839_v10  ;;  %v3836_v13 = vmax.f32 %v3804_v48, 0.0  ;;  %v3805_v38 = vadd.f32 %v6903_v61, %v3769_v18 }
 0x8d4   :  { %4928 = vrsqrt.f32 %v3673_v36 }
 0x8d5   :  { %3914 = vadd.xlane.f32.xlu1 %v3875_v51  ;;  %v3872_v52 = vmul.f32 %v6911_v2, %v3836_v13  ;;  %v3837_v41 = vmax.f32 %v3805_v38, 0.0 }
 0x8d7   :  { %3908 = vadd.xlane.f32.xlu0 %v3872_v52  ;;  %v3873_v1 = vmul.f32 %v6911_v2, %v3837_v41 }
 0x8d8   :  { %v4923_v4 = vpop.eup %4922 }
 0x8d9   :  { %v3597_v59 = vpop.xlane.xlu0 %3596  ;;  %3910 = vadd.xlane.f32.xlu1 %v3873_v1  ;;  %v3742_v34 = vmul.f32 %v4923_v4, %v6897_v56 }
 0x8da   :  { %v4925_v47 = vpop.eup %4924  ;;  %v3646_v49 = vmul.f32 0.0078125, %v3597_v59 }
 0x8db   :  { %v3599_v0 = vpop.xlane.xlu1 %3598  ;;  %v3774_v53 = vmul.f32 %v3742_v34, %v6774_v20  ;;  %v3743_v11 = vmul.f32 %v4925_v47, %v6897_v56 }
 0x8dc   :  { %v4927_v24 = vpop.eup %4926  ;;  %v3678_v26 = vadd.f32 1e-05, %v3646_v49  ;;  %v3647_v27 = vmul.f32 0.0078125, %v3599_v0 }
 0x8dd   :  { %v3593_v35 = vpop.xlane.xlu0 %3592  ;;  %v3810_v32 = vadd.f32 %v6903_v61, %v3774_v53  ;;  %v3775_v29 = vmul.f32 %v3743_v11, %v6777_v17  ;;  %v3740_v44 = vmul.f32 %v4927_v24, %v6897_v56 }
 0x8de   :  { %v4929_v40 = vpop.eup %4928  ;;  %4930 = vrsqrt.f32 %v3678_v26  ;;  %v3679_v57 = vadd.f32 1e-05, %v3647_v27  ;;  %v3644_v3 = vmul.f32 0.0078125, %v3593_v35 }
 0x8df   :  { %v3595_v22 = vpop.xlane.xlu1 %3594  ;;  %v3842_v5 = vmax.f32 %v3810_v32, 0.0  ;;  %v3811_v20 = vadd.f32 %v6903_v61, %v3775_v29  ;;  %v3772_v46 = vmul.f32 %v3740_v44, %v6782_v6  ;;  %v3741_v12 = vmul.f32 %v4929_v40, %v6897_v56 }
 0x8e0   :  { %4932 = vrsqrt.f32 %v3679_v57  ;;  %v3676_v62 = vadd.f32 1e-05, %v3644_v3  ;;  %v3645_v50 = vmul.f32 0.0078125, %v3595_v22 }
 0x8e1   :  { %v3878_v25 = vmul.f32 %v6911_v2, %v3842_v5  ;;  %v3843_v17 = vmax.f32 %v3811_v20, 0.0  ;;  %v3808_v10 = vadd.f32 %v6903_v61, %v3772_v46  ;;  %v3773_v48 = vmul.f32 %v3741_v12, %v6787_v43 }
 0x8e2   :  { %4934 = vrsqrt.f32 %v3676_v62  ;;  %v3677_v18 = vadd.f32 1e-05, %v3645_v50 }
 0x8e3   :  { %3920 = vadd.xlane.f32.xlu0 %v3878_v25  ;;  %v3879_v36 = vmul.f32 %v6911_v2, %v3843_v17  ;;  %v3840_v51 = vmax.f32 %v3808_v10, 0.0  ;;  %v3809_v6 = vadd.f32 %v6903_v61, %v3773_v48 }
 0x8e4   :  { %4936 = vrsqrt.f32 %v3677_v18 }
 0x8e5   :  { %3922 = vadd.xlane.f32.xlu1 %v3879_v36  ;;  %v3876_v13 = vmul.f32 %v6911_v2, %v3840_v51  ;;  %v3841_v38 = vmax.f32 %v3809_v6, 0.0 }
 0x8e7   :  { %3916 = vadd.xlane.f32.xlu0 %v3876_v13  ;;  %v3877_v52 = vmul.f32 %v6911_v2, %v3841_v38 }
 0x8e8   :  { %v4931_v41 = vpop.eup %4930 }
 0x8e9   :  { %v3605_v1 = vpop.xlane.xlu0 %3604  ;;  %3918 = vadd.xlane.f32.xlu1 %v3877_v52  ;;  %v3746_v43 = vmul.f32 %v4931_v41, %v6897_v56 }
 0x8ea   :  { %v4933_v4 = vpop.eup %4932  ;;  %v3650_v59 = vmul.f32 0.0078125, %v3605_v1 }
 0x8eb   :  { %v3607_v34 = vpop.xlane.xlu1 %3606  ;;  %v3778_v47 = vmul.f32 %v3746_v43, %v6794_v16  ;;  %v3747_v49 = vmul.f32 %v4933_v4, %v6897_v56 }
 0x8ec   :  { %v4935_v0 = vpop.eup %4934  ;;  %v3682_v53 = vadd.f32 1e-05, %v3650_v59  ;;  %v3651_v11 = vmul.f32 0.0078125, %v3607_v34 }
 0x8ed   :  { %v3601_v24 = vpop.xlane.xlu0 %3600  ;;  %v3814_v26 = vadd.f32 %v6903_v61, %v3778_v47  ;;  %v3779_v27 = vmul.f32 %v3747_v49, %v6797_v28  ;;  %v3744_v35 = vmul.f32 %v4935_v0, %v6897_v56 }
 0x8ee   :  { %v4937_v32 = vpop.eup %4936  ;;  %4938 = vrsqrt.f32 %v3682_v53  ;;  %v3683_v29 = vadd.f32 1e-05, %v3651_v11  ;;  %v3648_v44 = vmul.f32 0.0078125, %v3601_v24 }
 0x8ef   :  { %v3603_v40 = vpop.xlane.xlu1 %3602  ;;  %v3846_v57 = vmax.f32 %v3814_v26, 0.0  ;;  %v3815_v16 = vadd.f32 %v6903_v61, %v3779_v27  ;;  %v3776_v3 = vmul.f32 %v3744_v35, %v6802_v15  ;;  %v3745_v22 = vmul.f32 %v4937_v32, %v6897_v56 }
 0x8f0   :  { %4940 = vrsqrt.f32 %v3683_v29  ;;  %v3680_v5 = vadd.f32 1e-05, %v3648_v44  ;;  %v3649_v20 = vmul.f32 0.0078125, %v3603_v40 }
 0x8f1   :  { %v3882_v46 = vmul.f32 %v6911_v2, %v3846_v57  ;;  %v3847_v28 = vmax.f32 %v3815_v16, 0.0  ;;  %v3812_v12 = vadd.f32 %v6903_v61, %v3776_v3  ;;  %v3777_v62 = vmul.f32 %v3745_v22, %v6807_v37 }
 0x8f2   :  { %4942 = vrsqrt.f32 %v3680_v5  ;;  %v3681_v50 = vadd.f32 1e-05, %v3649_v20 }
 0x8f3   :  { %3928 = vadd.xlane.f32.xlu0 %v3882_v46  ;;  %v3883_v25 = vmul.f32 %v6911_v2, %v3847_v28  ;;  %v3844_v17 = vmax.f32 %v3812_v12, 0.0  ;;  %v3813_v15 = vadd.f32 %v6903_v61, %v3777_v62 }
 0x8f4   :  { %4944 = vrsqrt.f32 %v3681_v50 }
 0x8f5   :  { %3930 = vadd.xlane.f32.xlu1 %v3883_v25  ;;  %v3880_v10 = vmul.f32 %v6911_v2, %v3844_v17  ;;  %v3845_v48 = vmax.f32 %v3813_v15, 0.0 }
 0x8f7   :  { %3924 = vadd.xlane.f32.xlu0 %v3880_v10  ;;  %v3881_v18 = vmul.f32 %v6911_v2, %v3845_v48 }
 0x8f8   :  { %v4939_v36 = vpop.eup %4938 }
 0x8f9   :  { %v3613_v51 = vpop.xlane.xlu0 %3612  ;;  %3926 = vadd.xlane.f32.xlu1 %v3881_v18  ;;  %v3750_v37 = vmul.f32 %v4939_v36, %v6897_v56 }
 0x8fa   :  { %v4941_v6 = vpop.eup %4940  ;;  %v3654_v13 = vmul.f32 0.0078125, %v3613_v51 }
 0x8fb   :  { %v3615_v38 = vpop.xlane.xlu1 %3614  ;;  %v3782_v52 = vmul.f32 %v3750_v37, %v6814_v42  ;;  %v3751_v41 = vmul.f32 %v4941_v6, %v6897_v56 }
 0x8fc   :  { %v4943_v1 = vpop.eup %4942  ;;  %v3686_v43 = vadd.f32 1e-05, %v3654_v13  ;;  %v3655_v4 = vmul.f32 0.0078125, %v3615_v38 }
 0x8fd   :  { %v3609_v59 = vpop.xlane.xlu0 %3608  ;;  %v3818_v34 = vadd.f32 %v6903_v61, %v3782_v52  ;;  %v3783_v47 = vmul.f32 %v3751_v41, %v6817_v60  ;;  %v3748_v49 = vmul.f32 %v4943_v1, %v6897_v56 }
 0x8fe   :  { %v4945_v0 = vpop.eup %4944  ;;  %4946 = vrsqrt.f32 %v3686_v43  ;;  %v3687_v53 = vadd.f32 1e-05, %v3655_v4  ;;  %v3652_v11 = vmul.f32 0.0078125, %v3609_v59 }
 0x8ff   :  { %v3611_v24 = vpop.xlane.xlu1 %3610  ;;  %v3850_v26 = vmax.f32 %v3818_v34, 0.0  ;;  %v3819_v42 = vadd.f32 %v6903_v61, %v3783_v47  ;;  %v3780_v27 = vmul.f32 %v3748_v49, %v6822_v58  ;;  %v3749_v35 = vmul.f32 %v4945_v0, %v6897_v56 }
 0x900   :  { %4948 = vrsqrt.f32 %v3687_v53  ;;  %v3684_v32 = vadd.f32 1e-05, %v3652_v11  ;;  %v3653_v29 = vmul.f32 0.0078125, %v3611_v24 }
 0x901   :  { %v3621_v44 = vpop.xlane.xlu0 %3620  ;;  %v3886_v60 = vmul.f32 %v6911_v2, %v3850_v26  ;;  %v3851_v40 = vmax.f32 %v3819_v42, 0.0  ;;  %v3816_v57 = vadd.f32 %v6903_v61, %v3780_v27  ;;  %v3781_v16 = vmul.f32 %v3749_v35, %v6827_v55 }
 0x902   :  { %4950 = vrsqrt.f32 %v3684_v32  ;;  %v3685_v3 = vadd.f32 1e-05, %v3653_v29  ;;  %v3658_v22 = vmul.f32 0.0078125, %v3621_v44 }
 0x903   :  { %3936 = vadd.xlane.f32.xlu0 %v3886_v60  ;;  %v3623_v5 = vpop.xlane.xlu1 %3622  ;;  %v3887_v58 = vmul.f32 %v6911_v2, %v3851_v40  ;;  %v3848_v20 = vmax.f32 %v3816_v57, 0.0  ;;  %v3817_v46 = vadd.f32 %v6903_v61, %v3781_v16 }
 0x904   :  { %4952 = vrsqrt.f32 %v3685_v3  ;;  %v3690_v28 = vadd.f32 1e-05, %v3658_v22  ;;  %v3659_v12 = vmul.f32 0.0078125, %v3623_v5 }
 0x905   :  { %v3617_v62 = vpop.xlane.xlu0 %3616  ;;  %3938 = vadd.xlane.f32.xlu1 %v3887_v58  ;;  %v3884_v50 = vmul.f32 %v6911_v2, %v3848_v20  ;;  %v3849_v25 = vmax.f32 %v3817_v46, 0.0 }
 0x906   :  { %4954 = vrsqrt.f32 %v3690_v28  ;;  %v3691_v55 = vadd.f32 1e-05, %v3659_v12  ;;  %v3656_v17 = vmul.f32 0.0078125, %v3617_v62 }
 0x907   :  { %3932 = vadd.xlane.f32.xlu0 %v3884_v50  ;;  %v3619_v15 = vpop.xlane.xlu1 %3618  ;;  %v3885_v10 = vmul.f32 %v6911_v2, %v3849_v25 }
 0x908   :  { %v4947_v48 = vpop.eup %4946  ;;  %4956 = vrsqrt.f32 %v3691_v55  ;;  %v3688_v18 = vadd.f32 1e-05, %v3656_v17  ;;  %v3657_v36 = vmul.f32 0.0078125, %v3619_v15 }
 0x909   :  { %3934 = vadd.xlane.f32.xlu1 %v3885_v10  ;;  %v3754_v51 = vmul.f32 %v4947_v48, %v6897_v56 }
 0x90a   :  { %v4949_v37 = vpop.eup %4948  ;;  %4958 = vrsqrt.f32 %v3688_v18  ;;  %v3689_v6 = vadd.f32 1e-05, %v3657_v36  ;;  %v3625_v13 = vpop.xlane.xlu0 %3624 }
 0x90b   :  { %v3660_v38 = vmul.f32 0.0078125, %v3625_v13  ;;  %v3786_v52 = vmul.f32 %v3754_v51, %v6834_v63  ;;  %v3755_v41 = vmul.f32 %v4949_v37, %v6897_v56 }
 0x90c   :  { %v4951_v1 = vpop.eup %4950  ;;  %4960 = vrsqrt.f32 %v3689_v6  ;;  %v3627_v43 = vpop.xlane.xlu1 %3626 }
 0x90d   :  { %v3692_v4 = vadd.f32 1e-05, %v3660_v38  ;;  %v3661_v59 = vmul.f32 0.0078125, %v3627_v43  ;;  %v3822_v34 = vadd.f32 %v6903_v61, %v3786_v52  ;;  %v3787_v47 = vmul.f32 %v3755_v41, %v6837_v33 }
 0x90e   :  { %v4953_v49 = vpop.eup %4952  ;;  %v3629_v0 = vpop.xlane.xlu0 %3628  ;;  %v3752_v53 = vmul.f32 %v4951_v1, %v6897_v56 }
 0x90f   :  { %4962 = vrsqrt.f32 %v3692_v4  ;;  %v3693_v11 = vadd.f32 1e-05, %v3661_v59  ;;  %v3662_v24 = vmul.f32 0.0078125, %v3629_v0  ;;  %v3854_v26 = vmax.f32 %v3822_v34, 0.0 }
 0x910   :  { %v4955_v63 = vpop.eup %4954  ;;  %v3631_v42 = vpop.xlane.xlu1 %3630  ;;  %v3823_v27 = vadd.f32 %v6903_v61, %v3787_v47  ;;  %v3784_v35 = vmul.f32 %v3752_v53, %v6842_v19  ;;  %v3753_v32 = vmul.f32 %v4953_v49, %v6897_v56 }
 0x911   :  { %4964 = vrsqrt.f32 %v3693_v11  ;;  %v3694_v29 = vadd.f32 1e-05, %v3662_v24  ;;  %v3663_v44 = vmul.f32 0.0078125, %v3631_v42  ;;  %v3890_v33 = vmul.f32 %v6911_v2, %v3854_v26 }
 0x912   :  { %v4957_v60 = vpop.eup %4956  ;;  %v3855_v40 = vmax.f32 %v3823_v27, 0.0  ;;  %v3820_v57 = vadd.f32 %v6903_v61, %v3784_v35  ;;  %v3785_v16 = vmul.f32 %v3753_v32, %v6847_v54  ;;  %v3758_v3 = vmul.f32 %v4955_v63, %v6897_v56 }
 0x913   :  { %4966 = vrsqrt.f32 %v3694_v29  ;;  %v3695_v22 = vadd.f32 1e-05, %v3663_v44  ;;  %3944 = vadd.xlane.f32.xlu0 %v3890_v33  ;;  %v3759_v19 = vmul.f32 %v4957_v60, %v6897_v56  ;;  %v7340_v44 = vsub.s32 3, %v7303_v45 }
 0x914   :  { %v4959_v5 = vpop.eup %4958  ;;  %v3891_v58 = vmul.f32 %v6911_v2, %v3855_v40  ;;  %v3852_v20 = vmax.f32 %v3820_v57, 0.0  ;;  %v3821_v46 = vadd.f32 %v6903_v61, %v3785_v16  ;;  %v3790_v28 = vmul.f32 %v3758_v3, %v6852_v30 }
 0x915   :  { %4968 = vrsqrt.f32 %v3695_v22  ;;  %v3791_v12 = vmul.f32 %v3759_v19, %v6857_v31  ;;  %v3756_v54 = vmul.f32 %v4959_v5, %v6897_v56  ;;  %v7040_v33 = vrot.slane %v6893_v23, %v7340_v44 }
 0x916   :  { %v4961_v62 = vpop.eup %4960  ;;  %3946 = vadd.xlane.f32.xlu1 %v3891_v58  ;;  %v3888_v50 = vmul.f32 %v6911_v2, %v3852_v20  ;;  %v3853_v25 = vmax.f32 %v3821_v46, 0.0  ;;  %v3826_v55 = vadd.f32 %v6903_v61, %v3790_v28 }
 0x917   :  { %v3827_v17 = vadd.f32 %v6903_v61, %v3791_v12  ;;  %v3788_v15 = vmul.f32 %v3756_v54, %v6862_v9  ;;  %v3757_v10 = vmul.f32 %v4961_v62, %v6897_v56 }
 0x918   :  { %3940 = vadd.xlane.f32.xlu0 %v3888_v50  ;;  %v3889_v30 = vmul.f32 %v6911_v2, %v3853_v25  ;;  %v3858_v48 = vmax.f32 %v3826_v55, 0.0 }
 0x919   :  { %v4963_v31 = vpop.eup %4962  ;;  %v3859_v18 = vmax.f32 %v3827_v17, 0.0  ;;  %v3824_v36 = vadd.f32 %v6903_v61, %v3788_v15  ;;  %v3789_v51 = vmul.f32 %v3757_v10, %v6867_v21 }
 0x91a   :  { %3942 = vadd.xlane.f32.xlu1 %v3889_v30  ;;  %v3894_v37 = vmul.f32 %v6911_v2, %v3858_v48  ;;  %v3760_v6 = vmul.f32 %v4963_v31, %v6897_v56 }
 0x91b   :  { %v4965_v13 = vpop.eup %4964  ;;  %v3895_v9 = vmul.f32 %v6911_v2, %v3859_v18  ;;  %v3856_v38 = vmax.f32 %v3824_v36, 0.0  ;;  %v3825_v52 = vadd.f32 %v6903_v61, %v3789_v51 }
 0x91c   :  { %3952 = vadd.xlane.f32.xlu0 %v3894_v37  ;;  %v3792_v41 = vmul.f32 %v3760_v6, %v6874_v39  ;;  %v3761_v1 = vmul.f32 %v4965_v13, %v6897_v56 }
 0x91d   :  { %v4967_v43 = vpop.eup %4966  ;;  %v3892_v4 = vmul.f32 %v6911_v2, %v3856_v38  ;;  %v3857_v21 = vmax.f32 %v3825_v52, 0.0 }
 0x91e   :  { %3954 = vadd.xlane.f32.xlu1 %v3895_v9  ;;  %v3828_v59 = vadd.f32 %v6903_v61, %v3792_v41  ;;  %v3793_v34 = vmul.f32 %v3761_v1, %v6877_v7  ;;  %v3762_v47 = vmul.f32 %v4967_v43, %v6897_v56 }
 0x91f   :  { %v4969_v49 = vpop.eup %4968  ;;  %v3893_v0 = vmul.f32 %v6911_v2, %v3857_v21 }
 0x920   :  { %3948 = vadd.xlane.f32.xlu0 %v3892_v4  ;;  %v3860_v53 = vmax.f32 %v3828_v59, 0.0  ;;  %v3829_v39 = vadd.f32 %v6903_v61, %v3793_v34  ;;  %v3794_v11 = vmul.f32 %v3762_v47, %v6882_v8  ;;  %v3763_v24 = vmul.f32 %v4969_v49, %v6897_v56 }
 0x922   :  { %3950 = vadd.xlane.f32.xlu1 %v3893_v0  ;;  %v3896_v26 = vmul.f32 %v6911_v2, %v3860_v53  ;;  %v3861_v63 = vmax.f32 %v3829_v39, 0.0  ;;  %v3830_v42 = vadd.f32 %v6903_v61, %v3794_v11  ;;  %v3795_v7 = vmul.f32 %v3763_v24, %v6887_v14 }
 0x924   :  { %3956 = vadd.xlane.f32.xlu0 %v3896_v26  ;;  %v3897_v27 = vmul.f32 %v6911_v2, %v3861_v63  ;;  %v3862_v35 = vmax.f32 %v3830_v42, 0.0  ;;  %v3831_v32 = vadd.f32 %v6903_v61, %v3795_v7 }
 0x926   :  { %3958 = vadd.xlane.f32.xlu1 %v3897_v27  ;;  %v3898_v29 = vmul.f32 %v6911_v2, %v3862_v35  ;;  %v3863_v8 = vmax.f32 %v3831_v32, 0.0 }
 0x928   :  { %3960 = vadd.xlane.f32.xlu0 %v3898_v29  ;;  %v3899_v56 = vmul.f32 %v6911_v2, %v3863_v8 }
 0x92a   :  { %3962 = vadd.xlane.f32.xlu1 %v3899_v56 }
 0x952   :  { %v3905_v14 = vpop.xlane.xlu0 %3904 }
 0x953   :  { %v3970_v60 = vadd.f32 %v7040_v33, %v3905_v14 }
 0x954   :  { %v3907_v40 = vpop.xlane.xlu1 %3906 }
 0x955   :  { %4003 = vst.msk [vmem:[%s7211_s9 + $0x10] sm:$0xff] %vm4000_vm0, %v3970_v60  ;;  %v3971_v61 = vadd.f32 %v7040_v33, %v3907_v40 }
 0x956   :  { %v3901_v57 = vpop.xlane.xlu0 %3900 }
 0x957   :  { %4004 = vst.msk [vmem:[%s7211_s9 + $0x18] sm:$0xff] %vm4000_vm0, %v3971_v61  ;;  %v3968_v45 = vadd.f32 %v7040_v33, %v3901_v57 }
 0x958   :  { %v3903_v23 = vpop.xlane.xlu1 %3902 }
 0x959   :  { %4001 = vst.msk [vmem:[%s7211_s9] sm:$0xff] %vm4000_vm0, %v3968_v45  ;;  %v3969_v2 = vadd.f32 %v7040_v33, %v3903_v23 }
 0x95b   :  { %4002 = vst.msk [vmem:[%s7211_s9 + $0x8] sm:$0xff] %vm4000_vm0, %v3969_v2 }
 0x960   :  { %v3913_v16 = vpop.xlane.xlu0 %3912 }
 0x961   :  { %v3974_v3 = vadd.f32 %v7040_v33, %v3913_v16 }
 0x962   :  { %v3915_v22 = vpop.xlane.xlu1 %3914 }
 0x963   :  { %4007 = vst.msk [vmem:[%s7211_s9 + $0x30] sm:$0xff] %vm4000_vm0, %v3974_v3  ;;  %v3975_v19 = vadd.f32 %v7040_v33, %v3915_v22 }
 0x964   :  { %v3909_v5 = vpop.xlane.xlu0 %3908 }
 0x965   :  { %4008 = vst.msk [vmem:[%s7211_s9 + $0x38] sm:$0xff] %vm4000_vm0, %v3975_v19  ;;  %v3972_v58 = vadd.f32 %v7040_v33, %v3909_v5 }
 0x966   :  { %v3911_v20 = vpop.xlane.xlu1 %3910 }
 0x967   :  { %4005 = vst.msk [vmem:[%s7211_s9 + $0x20] sm:$0xff] %vm4000_vm0, %v3972_v58  ;;  %v3973_v46 = vadd.f32 %v7040_v33, %v3911_v20 }
 0x969   :  { %4006 = vst.msk [vmem:[%s7211_s9 + $0x28] sm:$0xff] %vm4000_vm0, %v3973_v46 }
 0x970   :  { %v3921_v28 = vpop.xlane.xlu0 %3920 }
 0x971   :  { %v3978_v12 = vadd.f32 %v7040_v33, %v3921_v28 }
 0x972   :  { %v3923_v54 = vpop.xlane.xlu1 %3922 }
 0x973   :  { %4011 = vst.msk [vmem:[%s7211_s9 + $0x50] sm:$0xff] %vm4000_vm0, %v3978_v12  ;;  %v3979_v62 = vadd.f32 %v7040_v33, %v3923_v54 }
 0x974   :  { %v3917_v50 = vpop.xlane.xlu0 %3916 }
 0x975   :  { %4012 = vst.msk [vmem:[%s7211_s9 + $0x58] sm:$0xff] %vm4000_vm0, %v3979_v62  ;;  %v3976_v25 = vadd.f32 %v7040_v33, %v3917_v50 }
 0x976   :  { %v3919_v55 = vpop.xlane.xlu1 %3918 }
 0x977   :  { %4009 = vst.msk [vmem:[%s7211_s9 + $0x40] sm:$0xff] %vm4000_vm0, %v3976_v25  ;;  %v3977_v17 = vadd.f32 %v7040_v33, %v3919_v55 }
 0x979   :  { %4010 = vst.msk [vmem:[%s7211_s9 + $0x48] sm:$0xff] %vm4000_vm0, %v3977_v17 }
 0x980   :  { %v3929_v15 = vpop.xlane.xlu0 %3928 }
 0x981   :  { %v3982_v10 = vadd.f32 %v7040_v33, %v3929_v15 }
 0x982   :  { %v3931_v30 = vpop.xlane.xlu1 %3930 }
 0x983   :  { %4015 = vst.msk [vmem:[%s7211_s9 + $0x70] sm:$0xff] %vm4000_vm0, %v3982_v10  ;;  %v3983_v48 = vadd.f32 %v7040_v33, %v3931_v30 }
 0x984   :  { %v3925_v31 = vpop.xlane.xlu0 %3924 }
 0x985   :  { %4016 = vst.msk [vmem:[%s7211_s9 + $0x78] sm:$0xff] %vm4000_vm0, %v3983_v48  ;;  %v3980_v18 = vadd.f32 %v7040_v33, %v3925_v31 }
 0x986   :  { %v3927_v36 = vpop.xlane.xlu1 %3926 }
 0x987   :  { %4013 = vst.msk [vmem:[%s7211_s9 + $0x60] sm:$0xff] %vm4000_vm0, %v3980_v18  ;;  %v3981_v51 = vadd.f32 %v7040_v33, %v3927_v36 }
 0x989   :  { %4014 = vst.msk [vmem:[%s7211_s9 + $0x68] sm:$0xff] %vm4000_vm0, %v3981_v51 }
 0x990   :  { %v3937_v37 = vpop.xlane.xlu0 %3936 }
 0x991   :  { %v3986_v6 = vadd.f32 %v7040_v33, %v3937_v37 }
 0x992   :  { %v3939_v13 = vpop.xlane.xlu1 %3938 }
 0x993   :  { %4019 = vst.msk [vmem:[%s7211_s9 + $0x90] sm:$0xff] %vm4000_vm0, %v3986_v6  ;;  %v3987_v9 = vadd.f32 %v7040_v33, %v3939_v13 }
 0x994   :  { %v3933_v38 = vpop.xlane.xlu0 %3932 }
 0x995   :  { %4020 = vst.msk [vmem:[%s7211_s9 + $0x98] sm:$0xff] %vm4000_vm0, %v3987_v9  ;;  %v3984_v52 = vadd.f32 %v7040_v33, %v3933_v38 }
 0x996   :  { %v3935_v41 = vpop.xlane.xlu1 %3934 }
 0x997   :  { %4017 = vst.msk [vmem:[%s7211_s9 + $0x80] sm:$0xff] %vm4000_vm0, %v3984_v52  ;;  %v3985_v1 = vadd.f32 %v7040_v33, %v3935_v41 }
 0x999   :  { %4018 = vst.msk [vmem:[%s7211_s9 + $0x88] sm:$0xff] %vm4000_vm0, %v3985_v1 }
 0x9a0   :  { %v3945_v43 = vpop.xlane.xlu0 %3944 }
 0x9a1   :  { %v3990_v4 = vadd.f32 %v7040_v33, %v3945_v43 }
 0x9a3   :  { %4023 = vst.msk [vmem:[%s7211_s9 + $0xb0] sm:$0xff] %vm4000_vm0, %v3990_v4  ;;  %v3947_v21 = vpop.xlane.xlu1 %3946 }
 0x9a4   :  { %v3991_v59 = vadd.f32 %v7040_v33, %v3947_v21 }
 0x9a5   :  { %v3941_v34 = vpop.xlane.xlu0 %3940 }
 0x9a6   :  { %4024 = vst.msk [vmem:[%s7211_s9 + $0xb8] sm:$0xff] %vm4000_vm0, %v3991_v59  ;;  %v3988_v47 = vadd.f32 %v7040_v33, %v3941_v34 }
 0x9a7   :  { %v3943_v49 = vpop.xlane.xlu1 %3942 }
 0x9a8   :  { %4021 = vst.msk [vmem:[%s7211_s9 + $0xa0] sm:$0xff] %vm4000_vm0, %v3988_v47  ;;  %v3989_v0 = vadd.f32 %v7040_v33, %v3943_v49 }
 0x9a9   :  { %v3953_v53 = vpop.xlane.xlu0 %3952 }
 0x9aa   :  { %4022 = vst.msk [vmem:[%s7211_s9 + $0xa8] sm:$0xff] %vm4000_vm0, %v3989_v0  ;;  %v3994_v39 = vadd.f32 %v7040_v33, %v3953_v53 }
 0x9ab   :  { %v3955_v11 = vpop.xlane.xlu1 %3954 }
 0x9ac   :  { %4027 = vst.msk [vmem:[%s7211_s9 + $0xd0] sm:$0xff] %vm4000_vm0, %v3994_v39  ;;  %v3995_v24 = vadd.f32 %v7040_v33, %v3955_v11 }
 0x9ad   :  { %v3949_v26 = vpop.xlane.xlu0 %3948 }
 0x9ae   :  { %4028 = vst.msk [vmem:[%s7211_s9 + $0xd8] sm:$0xff] %vm4000_vm0, %v3995_v24  ;;  %v3992_v63 = vadd.f32 %v7040_v33, %v3949_v26 }
 0x9af   :  { %v3951_v42 = vpop.xlane.xlu1 %3950 }
 0x9b0   :  { %4025 = vst.msk [vmem:[%s7211_s9 + $0xc0] sm:$0xff] %vm4000_vm0, %v3992_v63  ;;  %v3993_v7 = vadd.f32 %v7040_v33, %v3951_v42 }
 0x9b1   :  { %v3957_v27 = vpop.xlane.xlu0 %3956 }
 0x9b2   :  { %4026 = vst.msk [vmem:[%s7211_s9 + $0xc8] sm:$0xff] %vm4000_vm0, %v3993_v7  ;;  %v3996_v35 = vadd.f32 %v7040_v33, %v3957_v27 }
 0x9b3   :  { %v3959_v32 = vpop.xlane.xlu1 %3958 }
 0x9b4   :  { %4029 = vst.msk [vmem:[%s7211_s9 + $0xe0] sm:$0xff] %vm4000_vm0, %v3996_v35  ;;  %v3997_v29 = vadd.f32 %v7040_v33, %v3959_v32 }
 0x9b5   :  { %v3961_v8 = vpop.xlane.xlu0 %3960 }
 0x9b6   :  { %4030 = vst.msk [vmem:[%s7211_s9 + $0xe8] sm:$0xff] %vm4000_vm0, %v3997_v29  ;;  %v3998_v56 = vadd.f32 %v7040_v33, %v3961_v8 }
 0x9b7   :  { %v3963_v44 = vpop.xlane.xlu1 %3962 }
 0x9b8   :  { %4031 = vst.msk [vmem:[%s7211_s9 + $0xf0] sm:$0xff] %vm4000_vm0, %v3998_v56  ;;  %v3999_v14 = vadd.f32 %v7040_v33, %v3963_v44 }
 0x9ba   :  { %4032 = vst.msk [vmem:[%s7211_s9 + $0xf8] sm:$0xff] %vm4000_vm0, %v3999_v14 }
 0x9bb   :  { %4037 = vsyncpa [#allocation3], 1 }
 0x9bc   :  { %4038 = vsyncpa [#allocation5], 1 }
 0x9bd   :  { %4039 = vsyncpa [#allocation8], 1 }
 0x9be   :  { %4040 = vsyncpa [#allocation11], 1 }
 0x9bf   :  { %4041 = vsyncpa [#allocation14], 1 }

</bundles_post_ra>
